<compile_context>
chip_gen: v5e
topology: v5e:2x2
jax: 0.10.0
libtpu: 0.0.40
codegen_flags: <defaults>
</compile_context>

<pallas_src>
import functools

import jax
import jax.numpy as jnp
from jax import lax
from jax.experimental import pallas as pl
from jax.experimental.pallas import tpu as pltpu


def dyn_lstm_kernel(
    x_ref,                       # (B*T, D)  batch-major rows: row = b*T + t
    wih0_ref, whh0_ref, b0_ref,  # (D, 4H), (H, 4H), (1, 4H)
    wih1_ref, whh1_ref, b1_ref,  # (H, 4H), (H, 4H), (1, 4H)
    wih2_ref, whh2_ref, b2_ref,  # (H, 4H), (H, 4H), (1, 4H)
    wlin_ref, blin_ref,          # (H, D),  (1, D)
    out_ref,                     # (B*T, D)  batch-major rows
    x_tm_ref,                    # VMEM scratch (T*B, D)  time-major: row = t*B + b
    seq_ref,                     # VMEM scratch (T*B, H)  time-major hidden states
    *, B, T,
):
    H = whh0_ref.shape[0]
    G = 4 * H

    # One-time reorder of the input rows: batch-major -> time-major (tiny,
    # one-row copies, not on the recurrent dependency chain).
    xv = x_ref[...]
    for t in range(T):
        for b in range(B):
            x_tm_ref[t * B + b: t * B + b + 1, :] = xv[b * T + t: b * T + t + 1, :]

    # Loop-invariant lane mask: lanes of the 'g' gate get tanh, the rest sigmoid.
    lane = lax.broadcasted_iota(jnp.int32, (B, G), 1)
    is_g = (lane >= 2 * H) & (lane < 3 * H)

    def run_layer(x_tm, wih_t, bias, whh_t):
        # Hoisted input projection + folded biases: ONE matmul per layer.
        xp = jnp.dot(x_tm, wih_t, preferred_element_type=jnp.float32) + bias  # (T*B, 4H)
        h = jnp.zeros((B, H), jnp.float32)
        c = jnp.zeros((B, H), jnp.float32)
        for t in range(T):                                   # fully unrolled
            gates = xp[t * B:(t + 1) * B, :] + jnp.dot(
                h, whh_t, preferred_element_type=jnp.float32)                 # (B, 4H)
            act = jnp.where(is_g, jnp.tanh(gates), jax.nn.sigmoid(gates))
            i = act[:, 0 * H:1 * H]
            f = act[:, 1 * H:2 * H]
            g = act[:, 2 * H:3 * H]
            o = act[:, 3 * H:4 * H]
            c = f * c + i * g
            h = o * jnp.tanh(c)
            seq_ref[t * B:(t + 1) * B, :] = h                # time-major rows
        # seq_ref now holds this layer's full output sequence.

    # Three stacked layers.  seq_ref is safely reused: each layer's projection
    # loads the ENTIRE previous output before the step loop starts overwriting.
    run_layer(x_tm_ref[...], wih0_ref[...], b0_ref[...], whh0_ref[...])
    run_layer(seq_ref[...], wih1_ref[...], b1_ref[...], whh1_ref[...])
    run_layer(seq_ref[...], wih2_ref[...], b2_ref[...], whh2_ref[...])

    # Linear head: one 2-D matmul over the whole (T*B, H) slab + one bias add.
    out_tm = jnp.dot(seq_ref[...], wlin_ref[...],
                     preferred_element_type=jnp.float32) + blin_ref[...]      # (T*B, D)

    # Reorder back: time-major -> batch-major output rows.
    for b in range(B):
        for t in range(T):
            out_ref[b * T + t: b * T + t + 1, :] = out_tm[t * B + b: t * B + b + 1, :]


def init_params(key, latent_dim, hidden_dim, num_layers=3):
    """Deterministic PyTorch-style init: U(-1/sqrt(H), 1/sqrt(H))."""
    k = 1.0 / jnp.sqrt(jnp.float32(hidden_dim))
    params = {}
    keys = jax.random.split(key, 4 * num_layers + 2)
    ki = 0
    for layer in range(num_layers):
        in_dim = latent_dim if layer == 0 else hidden_dim
        params[f"w_ih_{layer}"] = jax.random.uniform(
            keys[ki], (4 * hidden_dim, in_dim), jnp.float32, -k, k); ki += 1
        params[f"w_hh_{layer}"] = jax.random.uniform(
            keys[ki], (4 * hidden_dim, hidden_dim), jnp.float32, -k, k); ki += 1
        params[f"b_ih_{layer}"] = jax.random.uniform(
            keys[ki], (4 * hidden_dim,), jnp.float32, -k, k); ki += 1
        params[f"b_hh_{layer}"] = jax.random.uniform(
            keys[ki], (4 * hidden_dim,), jnp.float32, -k, k); ki += 1
    params["w_lin"] = jax.random.uniform(
        keys[ki], (latent_dim, hidden_dim), jnp.float32, -k, k); ki += 1
    params["b_lin"] = jax.random.uniform(
        keys[ki], (latent_dim,), jnp.float32, -k, k); ki += 1
    return params


@functools.partial(jax.jit, static_argnames=("hidden_dim",))
def dyn_lstm_forward(x_btd, params, hidden_dim):
    """x_btd: (B, T, latent_dim) float32 -> (B, T, latent_dim) float32."""
    B, T, D = x_btd.shape
    H = hidden_dim

    # Zero-cost layout change (no transpose): (B, T, D) -> (B*T, D).
    x2d = x_btd.astype(jnp.float32).reshape(B * T, D)

    # Pre-transpose weights and fold the two biases (pure parameter prep).
    args = [x2d]
    for layer in range(3):
        args.append(params[f"w_ih_{layer}"].T)                       # (in, 4H)
        args.append(params[f"w_hh_{layer}"].T)                       # (H, 4H)
        args.append((params[f"b_ih_{layer}"]
                     + params[f"b_hh_{layer}"]).reshape(1, 4 * H))   # (1, 4H)
    args.append(params["w_lin"].T)                                   # (H, D)
    args.append(params["b_lin"].reshape(1, D))                       # (1, D)

    vmem = pl.BlockSpec(memory_space=pltpu.MemorySpace.VMEM)
    out2d = pl.pallas_call(
        functools.partial(dyn_lstm_kernel, B=B, T=T),
        out_shape=jax.ShapeDtypeStruct((B * T, D), jnp.float32),
        in_specs=[vmem] * len(args),
        out_specs=vmem,
        scratch_shapes=[
            pltpu.VMEM((T * B, D), jnp.float32),   # time-major input copy
            pltpu.VMEM((T * B, H), jnp.float32),   # time-major hidden sequence
        ],
    )(*args)

    # Zero-cost layout change back: (B*T, D) -> (B, T, D).
    return out2d.reshape(B, T, D)


def dyn_lstm_reference(x_btd, params, hidden_dim):
    """Pure-JAX reference (same math, lax.scan) for correctness checking."""
    H = hidden_dim
    B = x_btd.shape[0]
    seq = x_btd.astype(jnp.float32)  # (B, T, in)
    for layer in range(3):
        wih_t = params[f"w_ih_{layer}"].T
        whh_t = params[f"w_hh_{layer}"].T
        bias = params[f"b_ih_{layer}"] + params[f"b_hh_{layer}"]

        def cell(carry, x_t):
            h, c = carry
            gates = x_t @ wih_t + h @ whh_t + bias
            i = jax.nn.sigmoid(gates[:, 0 * H:1 * H])
            f = jax.nn.sigmoid(gates[:, 1 * H:2 * H])
            g = jnp.tanh(gates[:, 2 * H:3 * H])
            o = jax.nn.sigmoid(gates[:, 3 * H:4 * H])
            c_new = f * c + i * g
            h_new = o * jnp.tanh(c_new)
            return (h_new, c_new), h_new

        init = (jnp.zeros((B, H), jnp.float32), jnp.zeros((B, H), jnp.float32))
        _, hs = lax.scan(cell, init, jnp.transpose(seq, (1, 0, 2)))
        seq = jnp.transpose(hs, (1, 0, 2))
    return seq @ params["w_lin"].T + params["b_lin"]


if __name__ == "__main__":
    LATENT_DIM = 16       # latent_dim
    HIDDEN_DIM = 32       # dynamic_latent_dim
    BATCH, SEQ = 2, 8

    key = jax.random.PRNGKey(0)
    k_param, k_x = jax.random.split(key)
    params = init_params(k_param, LATENT_DIM, HIDDEN_DIM)
    x = jax.random.normal(k_x, (BATCH, SEQ, LATENT_DIM), jnp.float32)

    out = dyn_lstm_forward(x, params, HIDDEN_DIM)
    out = jax.block_until_ready(out)

    ref = dyn_lstm_reference(x, params, HIDDEN_DIM)
    assert out.shape == (BATCH, SEQ, LATENT_DIM)
    assert jnp.allclose(out, ref, atol=1e-4, rtol=1e-4), "mismatch vs JAX reference"

    print("KERNEL_OK")
</pallas_src>

<mosaic_0001>
module attributes {stable_mosaic.version = 11 : i64} {
  func.func @dyn_lstm_kernel(%arg0: memref<16x16xf32, #tpu.memory_space<vmem>>, %arg1: memref<16x128xf32, #tpu.memory_space<vmem>>, %arg2: memref<32x128xf32, #tpu.memory_space<vmem>>, %arg3: memref<1x128xf32, #tpu.memory_space<vmem>>, %arg4: memref<32x128xf32, #tpu.memory_space<vmem>>, %arg5: memref<32x128xf32, #tpu.memory_space<vmem>>, %arg6: memref<1x128xf32, #tpu.memory_space<vmem>>, %arg7: memref<32x128xf32, #tpu.memory_space<vmem>>, %arg8: memref<32x128xf32, #tpu.memory_space<vmem>>, %arg9: memref<1x128xf32, #tpu.memory_space<vmem>>, %arg10: memref<32x16xf32, #tpu.memory_space<vmem>>, %arg11: memref<1x16xf32, #tpu.memory_space<vmem>>, %arg12: memref<16x16xf32, #tpu.memory_space<vmem>>, %arg13: memref<16x16xf32, #tpu.memory_space<vmem>>, %arg14: memref<16x32xf32, #tpu.memory_space<vmem>>) attributes {dimension_semantics = [], scalar_prefetch = 0 : i64, scratch_operands = 2 : i64, tpu.core_type = #tpu.core_type<tc>} {
    %c0 = arith.constant 0 : index
    %c0_0 = arith.constant 0 : index
    %0 = vector.load %arg0[%c0, %c0_0] : memref<16x16xf32, #tpu.memory_space<vmem>>, vector<16x16xf32>
    %1 = vector.extract_strided_slice %0 {offsets = [0, 0], sizes = [1, 16], strides = [1, 1]} : vector<16x16xf32> to vector<1x16xf32>
    %c0_1 = arith.constant 0 : index
    %c0_2 = arith.constant 0 : index
    %2 = vector.load %arg13[%c0_1, %c0_2] : memref<16x16xf32, #tpu.memory_space<vmem>>, vector<1x16xf32>
    tpu.vector_store %arg13[%c0_1, %c0_2], %1 {strides = array<i32>} : memref<16x16xf32, #tpu.memory_space<vmem>>, vector<1x16xf32>,
    %3 = vector.extract_strided_slice %0 {offsets = [8, 0], sizes = [1, 16], strides = [1, 1]} : vector<16x16xf32> to vector<1x16xf32>
    %c1 = arith.constant 1 : index
    %c0_3 = arith.constant 0 : index
    %4 = vector.load %arg13[%c1, %c0_3] : memref<16x16xf32, #tpu.memory_space<vmem>>, vector<1x16xf32>
    tpu.vector_store %arg13[%c1, %c0_3], %3 {strides = array<i32>} : memref<16x16xf32, #tpu.memory_space<vmem>>, vector<1x16xf32>,
    %5 = vector.extract_strided_slice %0 {offsets = [1, 0], sizes = [1, 16], strides = [1, 1]} : vector<16x16xf32> to vector<1x16xf32>
    %c2 = arith.constant 2 : index
    %c0_4 = arith.constant 0 : index
    %6 = vector.load %arg13[%c2, %c0_4] : memref<16x16xf32, #tpu.memory_space<vmem>>, vector<1x16xf32>
    tpu.vector_store %arg13[%c2, %c0_4], %5 {strides = array<i32>} : memref<16x16xf32, #tpu.memory_space<vmem>>, vector<1x16xf32>,
    %7 = vector.extract_strided_slice %0 {offsets = [9, 0], sizes = [1, 16], strides = [1, 1]} : vector<16x16xf32> to vector<1x16xf32>
    %c3 = arith.constant 3 : index
    %c0_5 = arith.constant 0 : index
    %8 = vector.load %arg13[%c3, %c0_5] : memref<16x16xf32, #tpu.memory_space<vmem>>, vector<1x16xf32>
    tpu.vector_store %arg13[%c3, %c0_5], %7 {strides = array<i32>} : memref<16x16xf32, #tpu.memory_space<vmem>>, vector<1x16xf32>,
    %9 = vector.extract_strided_slice %0 {offsets = [2, 0], sizes = [1, 16], strides = [1, 1]} : vector<16x16xf32> to vector<1x16xf32>
    %c4 = arith.constant 4 : index
    %c0_6 = arith.constant 0 : index
    %10 = vector.load %arg13[%c4, %c0_6] : memref<16x16xf32, #tpu.memory_space<vmem>>, vector<1x16xf32>
    tpu.vector_store %arg13[%c4, %c0_6], %9 {strides = array<i32>} : memref<16x16xf32, #tpu.memory_space<vmem>>, vector<1x16xf32>,
    %11 = vector.extract_strided_slice %0 {offsets = [10, 0], sizes = [1, 16], strides = [1, 1]} : vector<16x16xf32> to vector<1x16xf32>
    %c5 = arith.constant 5 : index
    %c0_7 = arith.constant 0 : index
    %12 = vector.load %arg13[%c5, %c0_7] : memref<16x16xf32, #tpu.memory_space<vmem>>, vector<1x16xf32>
    tpu.vector_store %arg13[%c5, %c0_7], %11 {strides = array<i32>} : memref<16x16xf32, #tpu.memory_space<vmem>>, vector<1x16xf32>,
    %13 = vector.extract_strided_slice %0 {offsets = [3, 0], sizes = [1, 16], strides = [1, 1]} : vector<16x16xf32> to vector<1x16xf32>
    %c6 = arith.constant 6 : index
    %c0_8 = arith.constant 0 : index
    %14 = vector.load %arg13[%c6, %c0_8] : memref<16x16xf32, #tpu.memory_space<vmem>>, vector<1x16xf32>
    tpu.vector_store %arg13[%c6, %c0_8], %13 {strides = array<i32>} : memref<16x16xf32, #tpu.memory_space<vmem>>, vector<1x16xf32>,
    %15 = vector.extract_strided_slice %0 {offsets = [11, 0], sizes = [1, 16], strides = [1, 1]} : vector<16x16xf32> to vector<1x16xf32>
    %c7 = arith.constant 7 : index
    %c0_9 = arith.constant 0 : index
    %16 = vector.load %arg13[%c7, %c0_9] : memref<16x16xf32, #tpu.memory_space<vmem>>, vector<1x16xf32>
    tpu.vector_store %arg13[%c7, %c0_9], %15 {strides = array<i32>} : memref<16x16xf32, #tpu.memory_space<vmem>>, vector<1x16xf32>,
    %17 = vector.extract_strided_slice %0 {offsets = [4, 0], sizes = [1, 16], strides = [1, 1]} : vector<16x16xf32> to vector<1x16xf32>
    %c8 = arith.constant 8 : index
    %c0_10 = arith.constant 0 : index
    %18 = vector.load %arg13[%c8, %c0_10] : memref<16x16xf32, #tpu.memory_space<vmem>>, vector<1x16xf32>
    tpu.vector_store %arg13[%c8, %c0_10], %17 {strides = array<i32>} : memref<16x16xf32, #tpu.memory_space<vmem>>, vector<1x16xf32>,
    %19 = vector.extract_strided_slice %0 {offsets = [12, 0], sizes = [1, 16], strides = [1, 1]} : vector<16x16xf32> to vector<1x16xf32>
    %c9 = arith.constant 9 : index
    %c0_11 = arith.constant 0 : index
    %20 = vector.load %arg13[%c9, %c0_11] : memref<16x16xf32, #tpu.memory_space<vmem>>, vector<1x16xf32>
    tpu.vector_store %arg13[%c9, %c0_11], %19 {strides = array<i32>} : memref<16x16xf32, #tpu.memory_space<vmem>>, vector<1x16xf32>,
    %21 = vector.extract_strided_slice %0 {offsets = [5, 0], sizes = [1, 16], strides = [1, 1]} : vector<16x16xf32> to vector<1x16xf32>
    %c10 = arith.constant 10 : index
    %c0_12 = arith.constant 0 : index
    %22 = vector.load %arg13[%c10, %c0_12] : memref<16x16xf32, #tpu.memory_space<vmem>>, vector<1x16xf32>
    tpu.vector_store %arg13[%c10, %c0_12], %21 {strides = array<i32>} : memref<16x16xf32, #tpu.memory_space<vmem>>, vector<1x16xf32>,
    %23 = vector.extract_strided_slice %0 {offsets = [13, 0], sizes = [1, 16], strides = [1, 1]} : vector<16x16xf32> to vector<1x16xf32>
    %c11 = arith.constant 11 : index
    %c0_13 = arith.constant 0 : index
    %24 = vector.load %arg13[%c11, %c0_13] : memref<16x16xf32, #tpu.memory_space<vmem>>, vector<1x16xf32>
    tpu.vector_store %arg13[%c11, %c0_13], %23 {strides = array<i32>} : memref<16x16xf32, #tpu.memory_space<vmem>>, vector<1x16xf32>,
    %25 = vector.extract_strided_slice %0 {offsets = [6, 0], sizes = [1, 16], strides = [1, 1]} : vector<16x16xf32> to vector<1x16xf32>
    %c12 = arith.constant 12 : index
    %c0_14 = arith.constant 0 : index
    %26 = vector.load %arg13[%c12, %c0_14] : memref<16x16xf32, #tpu.memory_space<vmem>>, vector<1x16xf32>
    tpu.vector_store %arg13[%c12, %c0_14], %25 {strides = array<i32>} : memref<16x16xf32, #tpu.memory_space<vmem>>, vector<1x16xf32>,
    %27 = vector.extract_strided_slice %0 {offsets = [14, 0], sizes = [1, 16], strides = [1, 1]} : vector<16x16xf32> to vector<1x16xf32>
    %c13 = arith.constant 13 : index
    %c0_15 = arith.constant 0 : index
    %28 = vector.load %arg13[%c13, %c0_15] : memref<16x16xf32, #tpu.memory_space<vmem>>, vector<1x16xf32>
    tpu.vector_store %arg13[%c13, %c0_15], %27 {strides = array<i32>} : memref<16x16xf32, #tpu.memory_space<vmem>>, vector<1x16xf32>,
    %29 = vector.extract_strided_slice %0 {offsets = [7, 0], sizes = [1, 16], strides = [1, 1]} : vector<16x16xf32> to vector<1x16xf32>
    %c14 = arith.constant 14 : index
    %c0_16 = arith.constant 0 : index
    %30 = vector.load %arg13[%c14, %c0_16] : memref<16x16xf32, #tpu.memory_space<vmem>>, vector<1x16xf32>
    tpu.vector_store %arg13[%c14, %c0_16], %29 {strides = array<i32>} : memref<16x16xf32, #tpu.memory_space<vmem>>, vector<1x16xf32>,
    %31 = vector.extract_strided_slice %0 {offsets = [15, 0], sizes = [1, 16], strides = [1, 1]} : vector<16x16xf32> to vector<1x16xf32>
    %c15 = arith.constant 15 : index
    %c0_17 = arith.constant 0 : index
    %32 = vector.load %arg13[%c15, %c0_17] : memref<16x16xf32, #tpu.memory_space<vmem>>, vector<1x16xf32>
    tpu.vector_store %arg13[%c15, %c0_17], %31 {strides = array<i32>} : memref<16x16xf32, #tpu.memory_space<vmem>>, vector<1x16xf32>,
    %33 = tpu.iota {dimensions = array<i32: 1>} : vector<2x128xi32>
    %c64_i32 = arith.constant 64 : i32
    %34 = vector.broadcast %c64_i32 : i32 to vector<2x128xi32>
    %35 = arith.cmpi sge, %33, %34 : vector<2x128xi32>
    %c96_i32 = arith.constant 96 : i32
    %36 = vector.broadcast %c96_i32 : i32 to vector<2x128xi32>
    %37 = arith.cmpi slt, %33, %36 : vector<2x128xi32>
    %38 = arith.andi %35, %37 : vector<2x128xi1>
    %c0_18 = arith.constant 0 : index
    %c0_19 = arith.constant 0 : index
    %39 = vector.load %arg13[%c0_18, %c0_19] : memref<16x16xf32, #tpu.memory_space<vmem>>, vector<16x16xf32>
    %c0_20 = arith.constant 0 : index
    %c0_21 = arith.constant 0 : index
    %40 = vector.load %arg1[%c0_20, %c0_21] : memref<16x128xf32, #tpu.memory_space<vmem>>, vector<16x128xf32>
    %c0_22 = arith.constant 0 : index
    %c0_23 = arith.constant 0 : index
    %41 = vector.load %arg3[%c0_22, %c0_23] : memref<1x128xf32, #tpu.memory_space<vmem>>, vector<1x128xf32>
    %c0_24 = arith.constant 0 : index
    %c0_25 = arith.constant 0 : index
    %42 = vector.load %arg2[%c0_24, %c0_25] : memref<32x128xf32, #tpu.memory_space<vmem>>, vector<32x128xf32>
    %cst = arith.constant dense<0.000000e+00> : vector<16x128xf32>
    %43 = tpu.matmul %39, %40, %cst {dimension_numbers = #tpu.dot_dimension_numbers<[1], [0], [0], [1], [0, 0, 1, 1], [], []>} : vector<16x16xf32>, vector<16x128xf32>, vector<16x128xf32> -> vector<16x128xf32>
    %44 = vector.broadcast %41 : vector<1x128xf32> to vector<16x128xf32>
    %45 = arith.addf %43, %44 : vector<16x128xf32>
    %cst_26 = arith.constant 0.000000e+00 : f32
    %46 = vector.broadcast %cst_26 : f32 to vector<2x32xf32>
    %cst_27 = arith.constant 0.000000e+00 : f32
    %47 = vector.broadcast %cst_27 : f32 to vector<2x32xf32>
    %48 = vector.extract_strided_slice %45 {offsets = [0, 0], sizes = [2, 128], strides = [1, 1]} : vector<16x128xf32> to vector<2x128xf32>
    %cst_28 = arith.constant dense<0.000000e+00> : vector<2x128xf32>
    %49 = tpu.matmul %46, %42, %cst_28 {dimension_numbers = #tpu.dot_dimension_numbers<[1], [0], [0], [1], [0, 0, 1, 1], [], []>} : vector<2x32xf32>, vector<32x128xf32>, vector<2x128xf32> -> vector<2x128xf32>
    %50 = arith.addf %48, %49 : vector<2x128xf32>
    %51 = math.tanh %50 : vector<2x128xf32>
    %52 = arith.negf %50 : vector<2x128xf32>
    %53 = math.exp %52 : vector<2x128xf32>
    %cst_29 = arith.constant 1.000000e+00 : f32
    %54 = vector.broadcast %cst_29 : f32 to vector<2x128xf32>
    %55 = arith.addf %54, %53 : vector<2x128xf32>
    %56 = arith.divf %54, %55 : vector<2x128xf32>
    %57 = arith.select %38, %51, %56 : vector<2x128xi1>, vector<2x128xf32>
    %58 = vector.extract_strided_slice %57 {offsets = [0, 0], sizes = [2, 32], strides = [1, 1]} : vector<2x128xf32> to vector<2x32xf32>
    %59 = vector.extract_strided_slice %57 {offsets = [0, 32], sizes = [2, 32], strides = [1, 1]} : vector<2x128xf32> to vector<2x32xf32>
    %60 = vector.extract_strided_slice %57 {offsets = [0, 64], sizes = [2, 32], strides = [1, 1]} : vector<2x128xf32> to vector<2x32xf32>
    %61 = vector.extract_strided_slice %57 {offsets = [0, 96], sizes = [2, 32], strides = [1, 1]} : vector<2x128xf32> to vector<2x32xf32>
    %62 = arith.mulf %59, %47 : vector<2x32xf32>
    %63 = arith.mulf %58, %60 : vector<2x32xf32>
    %64 = arith.addf %62, %63 : vector<2x32xf32>
    %65 = math.tanh %64 : vector<2x32xf32>
    %66 = arith.mulf %61, %65 : vector<2x32xf32>
    %c0_30 = arith.constant 0 : index
    %c0_31 = arith.constant 0 : index
    %67 = vector.load %arg14[%c0_30, %c0_31] : memref<16x32xf32, #tpu.memory_space<vmem>>, vector<2x32xf32>
    tpu.vector_store %arg14[%c0_30, %c0_31], %66 {strides = array<i32>} : memref<16x32xf32, #tpu.memory_space<vmem>>, vector<2x32xf32>,
    %68 = vector.extract_strided_slice %45 {offsets = [2, 0], sizes = [2, 128], strides = [1, 1]} : vector<16x128xf32> to vector<2x128xf32>
    %cst_32 = arith.constant dense<0.000000e+00> : vector<2x128xf32>
    %69 = tpu.matmul %66, %42, %cst_32 {dimension_numbers = #tpu.dot_dimension_numbers<[1], [0], [0], [1], [0, 0, 1, 1], [], []>} : vector<2x32xf32>, vector<32x128xf32>, vector<2x128xf32> -> vector<2x128xf32>
    %70 = arith.addf %68, %69 : vector<2x128xf32>
    %71 = math.tanh %70 : vector<2x128xf32>
    %72 = arith.negf %70 : vector<2x128xf32>
    %73 = math.exp %72 : vector<2x128xf32>
    %cst_33 = arith.constant 1.000000e+00 : f32
    %74 = vector.broadcast %cst_33 : f32 to vector<2x128xf32>
    %75 = arith.addf %74, %73 : vector<2x128xf32>
    %76 = arith.divf %74, %75 : vector<2x128xf32>
    %77 = arith.select %38, %71, %76 : vector<2x128xi1>, vector<2x128xf32>
    %78 = vector.extract_strided_slice %77 {offsets = [0, 0], sizes = [2, 32], strides = [1, 1]} : vector<2x128xf32> to vector<2x32xf32>
    %79 = vector.extract_strided_slice %77 {offsets = [0, 32], sizes = [2, 32], strides = [1, 1]} : vector<2x128xf32> to vector<2x32xf32>
    %80 = vector.extract_strided_slice %77 {offsets = [0, 64], sizes = [2, 32], strides = [1, 1]} : vector<2x128xf32> to vector<2x32xf32>
    %81 = vector.extract_strided_slice %77 {offsets = [0, 96], sizes = [2, 32], strides = [1, 1]} : vector<2x128xf32> to vector<2x32xf32>
    %82 = arith.mulf %79, %64 : vector<2x32xf32>
    %83 = arith.mulf %78, %80 : vector<2x32xf32>
    %84 = arith.addf %82, %83 : vector<2x32xf32>
    %85 = math.tanh %84 : vector<2x32xf32>
    %86 = arith.mulf %81, %85 : vector<2x32xf32>
    %c2_34 = arith.constant 2 : index
    %c0_35 = arith.constant 0 : index
    %87 = vector.load %arg14[%c2_34, %c0_35] : memref<16x32xf32, #tpu.memory_space<vmem>>, vector<2x32xf32>
    tpu.vector_store %arg14[%c2_34, %c0_35], %86 {strides = array<i32>} : memref<16x32xf32, #tpu.memory_space<vmem>>, vector<2x32xf32>,
    %88 = vector.extract_strided_slice %45 {offsets = [4, 0], sizes = [2, 128], strides = [1, 1]} : vector<16x128xf32> to vector<2x128xf32>
    %cst_36 = arith.constant dense<0.000000e+00> : vector<2x128xf32>
    %89 = tpu.matmul %86, %42, %cst_36 {dimension_numbers = #tpu.dot_dimension_numbers<[1], [0], [0], [1], [0, 0, 1, 1], [], []>} : vector<2x32xf32>, vector<32x128xf32>, vector<2x128xf32> -> vector<2x128xf32>
    %90 = arith.addf %88, %89 : vector<2x128xf32>
    %91 = math.tanh %90 : vector<2x128xf32>
    %92 = arith.negf %90 : vector<2x128xf32>
    %93 = math.exp %92 : vector<2x128xf32>
    %cst_37 = arith.constant 1.000000e+00 : f32
    %94 = vector.broadcast %cst_37 : f32 to vector<2x128xf32>
    %95 = arith.addf %94, %93 : vector<2x128xf32>
    %96 = arith.divf %94, %95 : vector<2x128xf32>
    %97 = arith.select %38, %91, %96 : vector<2x128xi1>, vector<2x128xf32>
    %98 = vector.extract_strided_slice %97 {offsets = [0, 0], sizes = [2, 32], strides = [1, 1]} : vector<2x128xf32> to vector<2x32xf32>
    %99 = vector.extract_strided_slice %97 {offsets = [0, 32], sizes = [2, 32], strides = [1, 1]} : vector<2x128xf32> to vector<2x32xf32>
    %100 = vector.extract_strided_slice %97 {offsets = [0, 64], sizes = [2, 32], strides = [1, 1]} : vector<2x128xf32> to vector<2x32xf32>
    %101 = vector.extract_strided_slice %97 {offsets = [0, 96], sizes = [2, 32], strides = [1, 1]} : vector<2x128xf32> to vector<2x32xf32>
    %102 = arith.mulf %99, %84 : vector<2x32xf32>
    %103 = arith.mulf %98, %100 : vector<2x32xf32>
    %104 = arith.addf %102, %103 : vector<2x32xf32>
    %105 = math.tanh %104 : vector<2x32xf32>
    %106 = arith.mulf %101, %105 : vector<2x32xf32>
    %c4_38 = arith.constant 4 : index
    %c0_39 = arith.constant 0 : index
    %107 = vector.load %arg14[%c4_38, %c0_39] : memref<16x32xf32, #tpu.memory_space<vmem>>, vector<2x32xf32>
    tpu.vector_store %arg14[%c4_38, %c0_39], %106 {strides = array<i32>} : memref<16x32xf32, #tpu.memory_space<vmem>>, vector<2x32xf32>,
    %108 = vector.extract_strided_slice %45 {offsets = [6, 0], sizes = [2, 128], strides = [1, 1]} : vector<16x128xf32> to vector<2x128xf32>
    %cst_40 = arith.constant dense<0.000000e+00> : vector<2x128xf32>
    %109 = tpu.matmul %106, %42, %cst_40 {dimension_numbers = #tpu.dot_dimension_numbers<[1], [0], [0], [1], [0, 0, 1, 1], [], []>} : vector<2x32xf32>, vector<32x128xf32>, vector<2x128xf32> -> vector<2x128xf32>
    %110 = arith.addf %108, %109 : vector<2x128xf32>
    %111 = math.tanh %110 : vector<2x128xf32>
    %112 = arith.negf %110 : vector<2x128xf32>
    %113 = math.exp %112 : vector<2x128xf32>
    %cst_41 = arith.constant 1.000000e+00 : f32
    %114 = vector.broadcast %cst_41 : f32 to vector<2x128xf32>
    %115 = arith.addf %114, %113 : vector<2x128xf32>
    %116 = arith.divf %114, %115 : vector<2x128xf32>
    %117 = arith.select %38, %111, %116 : vector<2x128xi1>, vector<2x128xf32>
    %118 = vector.extract_strided_slice %117 {offsets = [0, 0], sizes = [2, 32], strides = [1, 1]} : vector<2x128xf32> to vector<2x32xf32>
    %119 = vector.extract_strided_slice %117 {offsets = [0, 32], sizes = [2, 32], strides = [1, 1]} : vector<2x128xf32> to vector<2x32xf32>
    %120 = vector.extract_strided_slice %117 {offsets = [0, 64], sizes = [2, 32], strides = [1, 1]} : vector<2x128xf32> to vector<2x32xf32>
    %121 = vector.extract_strided_slice %117 {offsets = [0, 96], sizes = [2, 32], strides = [1, 1]} : vector<2x128xf32> to vector<2x32xf32>
    %122 = arith.mulf %119, %104 : vector<2x32xf32>
    %123 = arith.mulf %118, %120 : vector<2x32xf32>
    %124 = arith.addf %122, %123 : vector<2x32xf32>
    %125 = math.tanh %124 : vector<2x32xf32>
    %126 = arith.mulf %121, %125 : vector<2x32xf32>
    %c6_42 = arith.constant 6 : index
    %c0_43 = arith.constant 0 : index
    %127 = vector.load %arg14[%c6_42, %c0_43] : memref<16x32xf32, #tpu.memory_space<vmem>>, vector<2x32xf32>
    tpu.vector_store %arg14[%c6_42, %c0_43], %126 {strides = array<i32>} : memref<16x32xf32, #tpu.memory_space<vmem>>, vector<2x32xf32>,
    %128 = vector.extract_strided_slice %45 {offsets = [8, 0], sizes = [2, 128], strides = [1, 1]} : vector<16x128xf32> to vector<2x128xf32>
    %cst_44 = arith.constant dense<0.000000e+00> : vector<2x128xf32>
    %129 = tpu.matmul %126, %42, %cst_44 {dimension_numbers = #tpu.dot_dimension_numbers<[1], [0], [0], [1], [0, 0, 1, 1], [], []>} : vector<2x32xf32>, vector<32x128xf32>, vector<2x128xf32> -> vector<2x128xf32>
    %130 = arith.addf %128, %129 : vector<2x128xf32>
    %131 = math.tanh %130 : vector<2x128xf32>
    %132 = arith.negf %130 : vector<2x128xf32>
    %133 = math.exp %132 : vector<2x128xf32>
    %cst_45 = arith.constant 1.000000e+00 : f32
    %134 = vector.broadcast %cst_45 : f32 to vector<2x128xf32>
    %135 = arith.addf %134, %133 : vector<2x128xf32>
    %136 = arith.divf %134, %135 : vector<2x128xf32>
    %137 = arith.select %38, %131, %136 : vector<2x128xi1>, vector<2x128xf32>
    %138 = vector.extract_strided_slice %137 {offsets = [0, 0], sizes = [2, 32], strides = [1, 1]} : vector<2x128xf32> to vector<2x32xf32>
    %139 = vector.extract_strided_slice %137 {offsets = [0, 32], sizes = [2, 32], strides = [1, 1]} : vector<2x128xf32> to vector<2x32xf32>
    %140 = vector.extract_strided_slice %137 {offsets = [0, 64], sizes = [2, 32], strides = [1, 1]} : vector<2x128xf32> to vector<2x32xf32>
    %141 = vector.extract_strided_slice %137 {offsets = [0, 96], sizes = [2, 32], strides = [1, 1]} : vector<2x128xf32> to vector<2x32xf32>
    %142 = arith.mulf %139, %124 : vector<2x32xf32>
    %143 = arith.mulf %138, %140 : vector<2x32xf32>
    %144 = arith.addf %142, %143 : vector<2x32xf32>
    %145 = math.tanh %144 : vector<2x32xf32>
    %146 = arith.mulf %141, %145 : vector<2x32xf32>
    %c8_46 = arith.constant 8 : index
    %c0_47 = arith.constant 0 : index
    %147 = vector.load %arg14[%c8_46, %c0_47] : memref<16x32xf32, #tpu.memory_space<vmem>>, vector<2x32xf32>
    tpu.vector_store %arg14[%c8_46, %c0_47], %146 {strides = array<i32>} : memref<16x32xf32, #tpu.memory_space<vmem>>, vector<2x32xf32>,
    %148 = vector.extract_strided_slice %45 {offsets = [10, 0], sizes = [2, 128], strides = [1, 1]} : vector<16x128xf32> to vector<2x128xf32>
    %cst_48 = arith.constant dense<0.000000e+00> : vector<2x128xf32>
    %149 = tpu.matmul %146, %42, %cst_48 {dimension_numbers = #tpu.dot_dimension_numbers<[1], [0], [0], [1], [0, 0, 1, 1], [], []>} : vector<2x32xf32>, vector<32x128xf32>, vector<2x128xf32> -> vector<2x128xf32>
    %150 = arith.addf %148, %149 : vector<2x128xf32>
    %151 = math.tanh %150 : vector<2x128xf32>
    %152 = arith.negf %150 : vector<2x128xf32>
    %153 = math.exp %152 : vector<2x128xf32>
    %cst_49 = arith.constant 1.000000e+00 : f32
    %154 = vector.broadcast %cst_49 : f32 to vector<2x128xf32>
    %155 = arith.addf %154, %153 : vector<2x128xf32>
    %156 = arith.divf %154, %155 : vector<2x128xf32>
    %157 = arith.select %38, %151, %156 : vector<2x128xi1>, vector<2x128xf32>
    %158 = vector.extract_strided_slice %157 {offsets = [0, 0], sizes = [2, 32], strides = [1, 1]} : vector<2x128xf32> to vector<2x32xf32>
    %159 = vector.extract_strided_slice %157 {offsets = [0, 32], sizes = [2, 32], strides = [1, 1]} : vector<2x128xf32> to vector<2x32xf32>
    %160 = vector.extract_strided_slice %157 {offsets = [0, 64], sizes = [2, 32], strides = [1, 1]} : vector<2x128xf32> to vector<2x32xf32>
    %161 = vector.extract_strided_slice %157 {offsets = [0, 96], sizes = [2, 32], strides = [1, 1]} : vector<2x128xf32> to vector<2x32xf32>
    %162 = arith.mulf %159, %144 : vector<2x32xf32>
    %163 = arith.mulf %158, %160 : vector<2x32xf32>
    %164 = arith.addf %162, %163 : vector<2x32xf32>
    %165 = math.tanh %164 : vector<2x32xf32>
    %166 = arith.mulf %161, %165 : vector<2x32xf32>
    %c10_50 = arith.constant 10 : index
    %c0_51 = arith.constant 0 : index
    %167 = vector.load %arg14[%c10_50, %c0_51] : memref<16x32xf32, #tpu.memory_space<vmem>>, vector<2x32xf32>
    tpu.vector_store %arg14[%c10_50, %c0_51], %166 {strides = array<i32>} : memref<16x32xf32, #tpu.memory_space<vmem>>, vector<2x32xf32>,
    %168 = vector.extract_strided_slice %45 {offsets = [12, 0], sizes = [2, 128], strides = [1, 1]} : vector<16x128xf32> to vector<2x128xf32>
    %cst_52 = arith.constant dense<0.000000e+00> : vector<2x128xf32>
    %169 = tpu.matmul %166, %42, %cst_52 {dimension_numbers = #tpu.dot_dimension_numbers<[1], [0], [0], [1], [0, 0, 1, 1], [], []>} : vector<2x32xf32>, vector<32x128xf32>, vector<2x128xf32> -> vector<2x128xf32>
    %170 = arith.addf %168, %169 : vector<2x128xf32>
    %171 = math.tanh %170 : vector<2x128xf32>
    %172 = arith.negf %170 : vector<2x128xf32>
    %173 = math.exp %172 : vector<2x128xf32>
    %cst_53 = arith.constant 1.000000e+00 : f32
    %174 = vector.broadcast %cst_53 : f32 to vector<2x128xf32>
    %175 = arith.addf %174, %173 : vector<2x128xf32>
    %176 = arith.divf %174, %175 : vector<2x128xf32>
    %177 = arith.select %38, %171, %176 : vector<2x128xi1>, vector<2x128xf32>
    %178 = vector.extract_strided_slice %177 {offsets = [0, 0], sizes = [2, 32], strides = [1, 1]} : vector<2x128xf32> to vector<2x32xf32>
    %179 = vector.extract_strided_slice %177 {offsets = [0, 32], sizes = [2, 32], strides = [1, 1]} : vector<2x128xf32> to vector<2x32xf32>
    %180 = vector.extract_strided_slice %177 {offsets = [0, 64], sizes = [2, 32], strides = [1, 1]} : vector<2x128xf32> to vector<2x32xf32>
    %181 = vector.extract_strided_slice %177 {offsets = [0, 96], sizes = [2, 32], strides = [1, 1]} : vector<2x128xf32> to vector<2x32xf32>
    %182 = arith.mulf %179, %164 : vector<2x32xf32>
    %183 = arith.mulf %178, %180 : vector<2x32xf32>
    %184 = arith.addf %182, %183 : vector<2x32xf32>
    %185 = math.tanh %184 : vector<2x32xf32>
    %186 = arith.mulf %181, %185 : vector<2x32xf32>
    %c12_54 = arith.constant 12 : index
    %c0_55 = arith.constant 0 : index
    %187 = vector.load %arg14[%c12_54, %c0_55] : memref<16x32xf32, #tpu.memory_space<vmem>>, vector<2x32xf32>
    tpu.vector_store %arg14[%c12_54, %c0_55], %186 {strides = array<i32>} : memref<16x32xf32, #tpu.memory_space<vmem>>, vector<2x32xf32>,
    %188 = vector.extract_strided_slice %45 {offsets = [14, 0], sizes = [2, 128], strides = [1, 1]} : vector<16x128xf32> to vector<2x128xf32>
    %cst_56 = arith.constant dense<0.000000e+00> : vector<2x128xf32>
    %189 = tpu.matmul %186, %42, %cst_56 {dimension_numbers = #tpu.dot_dimension_numbers<[1], [0], [0], [1], [0, 0, 1, 1], [], []>} : vector<2x32xf32>, vector<32x128xf32>, vector<2x128xf32> -> vector<2x128xf32>
    %190 = arith.addf %188, %189 : vector<2x128xf32>
    %191 = math.tanh %190 : vector<2x128xf32>
    %192 = arith.negf %190 : vector<2x128xf32>
    %193 = math.exp %192 : vector<2x128xf32>
    %cst_57 = arith.constant 1.000000e+00 : f32
    %194 = vector.broadcast %cst_57 : f32 to vector<2x128xf32>
    %195 = arith.addf %194, %193 : vector<2x128xf32>
    %196 = arith.divf %194, %195 : vector<2x128xf32>
    %197 = arith.select %38, %191, %196 : vector<2x128xi1>, vector<2x128xf32>
    %198 = vector.extract_strided_slice %197 {offsets = [0, 0], sizes = [2, 32], strides = [1, 1]} : vector<2x128xf32> to vector<2x32xf32>
    %199 = vector.extract_strided_slice %197 {offsets = [0, 32], sizes = [2, 32], strides = [1, 1]} : vector<2x128xf32> to vector<2x32xf32>
    %200 = vector.extract_strided_slice %197 {offsets = [0, 64], sizes = [2, 32], strides = [1, 1]} : vector<2x128xf32> to vector<2x32xf32>
    %201 = vector.extract_strided_slice %197 {offsets = [0, 96], sizes = [2, 32], strides = [1, 1]} : vector<2x128xf32> to vector<2x32xf32>
    %202 = arith.mulf %199, %184 : vector<2x32xf32>
    %203 = arith.mulf %198, %200 : vector<2x32xf32>
    %204 = arith.addf %202, %203 : vector<2x32xf32>
    %205 = math.tanh %204 : vector<2x32xf32>
    %206 = arith.mulf %201, %205 : vector<2x32xf32>
    %c14_58 = arith.constant 14 : index
    %c0_59 = arith.constant 0 : index
    %207 = vector.load %arg14[%c14_58, %c0_59] : memref<16x32xf32, #tpu.memory_space<vmem>>, vector<2x32xf32>
    tpu.vector_store %arg14[%c14_58, %c0_59], %206 {strides = array<i32>} : memref<16x32xf32, #tpu.memory_space<vmem>>, vector<2x32xf32>,
    %c0_60 = arith.constant 0 : index
    %c0_61 = arith.constant 0 : index
    %208 = vector.load %arg14[%c0_60, %c0_61] : memref<16x32xf32, #tpu.memory_space<vmem>>, vector<16x32xf32>
    %c0_62 = arith.constant 0 : index
    %c0_63 = arith.constant 0 : index
    %209 = vector.load %arg4[%c0_62, %c0_63] : memref<32x128xf32, #tpu.memory_space<vmem>>, vector<32x128xf32>
    %c0_64 = arith.constant 0 : index
    %c0_65 = arith.constant 0 : index
    %210 = vector.load %arg6[%c0_64, %c0_65] : memref<1x128xf32, #tpu.memory_space<vmem>>, vector<1x128xf32>
    %c0_66 = arith.constant 0 : index
    %c0_67 = arith.constant 0 : index
    %211 = vector.load %arg5[%c0_66, %c0_67] : memref<32x128xf32, #tpu.memory_space<vmem>>, vector<32x128xf32>
    %cst_68 = arith.constant dense<0.000000e+00> : vector<16x128xf32>
    %212 = tpu.matmul %208, %209, %cst_68 {dimension_numbers = #tpu.dot_dimension_numbers<[1], [0], [0], [1], [0, 0, 1, 1], [], []>} : vector<16x32xf32>, vector<32x128xf32>, vector<16x128xf32> -> vector<16x128xf32>
    %213 = vector.broadcast %210 : vector<1x128xf32> to vector<16x128xf32>
    %214 = arith.addf %212, %213 : vector<16x128xf32>
    %cst_69 = arith.constant 0.000000e+00 : f32
    %215 = vector.broadcast %cst_69 : f32 to vector<2x32xf32>
    %cst_70 = arith.constant 0.000000e+00 : f32
    %216 = vector.broadcast %cst_70 : f32 to vector<2x32xf32>
    %217 = vector.extract_strided_slice %214 {offsets = [0, 0], sizes = [2, 128], strides = [1, 1]} : vector<16x128xf32> to vector<2x128xf32>
    %cst_71 = arith.constant dense<0.000000e+00> : vector<2x128xf32>
    %218 = tpu.matmul %215, %211, %cst_71 {dimension_numbers = #tpu.dot_dimension_numbers<[1], [0], [0], [1], [0, 0, 1, 1], [], []>} : vector<2x32xf32>, vector<32x128xf32>, vector<2x128xf32> -> vector<2x128xf32>
    %219 = arith.addf %217, %218 : vector<2x128xf32>
    %220 = math.tanh %219 : vector<2x128xf32>
    %221 = arith.negf %219 : vector<2x128xf32>
    %222 = math.exp %221 : vector<2x128xf32>
    %cst_72 = arith.constant 1.000000e+00 : f32
    %223 = vector.broadcast %cst_72 : f32 to vector<2x128xf32>
    %224 = arith.addf %223, %222 : vector<2x128xf32>
    %225 = arith.divf %223, %224 : vector<2x128xf32>
    %226 = arith.select %38, %220, %225 : vector<2x128xi1>, vector<2x128xf32>
    %227 = vector.extract_strided_slice %226 {offsets = [0, 0], sizes = [2, 32], strides = [1, 1]} : vector<2x128xf32> to vector<2x32xf32>
    %228 = vector.extract_strided_slice %226 {offsets = [0, 32], sizes = [2, 32], strides = [1, 1]} : vector<2x128xf32> to vector<2x32xf32>
    %229 = vector.extract_strided_slice %226 {offsets = [0, 64], sizes = [2, 32], strides = [1, 1]} : vector<2x128xf32> to vector<2x32xf32>
    %230 = vector.extract_strided_slice %226 {offsets = [0, 96], sizes = [2, 32], strides = [1, 1]} : vector<2x128xf32> to vector<2x32xf32>
    %231 = arith.mulf %228, %216 : vector<2x32xf32>
    %232 = arith.mulf %227, %229 : vector<2x32xf32>
    %233 = arith.addf %231, %232 : vector<2x32xf32>
    %234 = math.tanh %233 : vector<2x32xf32>
    %235 = arith.mulf %230, %234 : vector<2x32xf32>
    %c0_73 = arith.constant 0 : index
    %c0_74 = arith.constant 0 : index
    %236 = vector.load %arg14[%c0_73, %c0_74] : memref<16x32xf32, #tpu.memory_space<vmem>>, vector<2x32xf32>
    tpu.vector_store %arg14[%c0_73, %c0_74], %235 {strides = array<i32>} : memref<16x32xf32, #tpu.memory_space<vmem>>, vector<2x32xf32>,
    %237 = vector.extract_strided_slice %214 {offsets = [2, 0], sizes = [2, 128], strides = [1, 1]} : vector<16x128xf32> to vector<2x128xf32>
    %cst_75 = arith.constant dense<0.000000e+00> : vector<2x128xf32>
    %238 = tpu.matmul %235, %211, %cst_75 {dimension_numbers = #tpu.dot_dimension_numbers<[1], [0], [0], [1], [0, 0, 1, 1], [], []>} : vector<2x32xf32>, vector<32x128xf32>, vector<2x128xf32> -> vector<2x128xf32>
    %239 = arith.addf %237, %238 : vector<2x128xf32>
    %240 = math.tanh %239 : vector<2x128xf32>
    %241 = arith.negf %239 : vector<2x128xf32>
    %242 = math.exp %241 : vector<2x128xf32>
    %cst_76 = arith.constant 1.000000e+00 : f32
    %243 = vector.broadcast %cst_76 : f32 to vector<2x128xf32>
    %244 = arith.addf %243, %242 : vector<2x128xf32>
    %245 = arith.divf %243, %244 : vector<2x128xf32>
    %246 = arith.select %38, %240, %245 : vector<2x128xi1>, vector<2x128xf32>
    %247 = vector.extract_strided_slice %246 {offsets = [0, 0], sizes = [2, 32], strides = [1, 1]} : vector<2x128xf32> to vector<2x32xf32>
    %248 = vector.extract_strided_slice %246 {offsets = [0, 32], sizes = [2, 32], strides = [1, 1]} : vector<2x128xf32> to vector<2x32xf32>
    %249 = vector.extract_strided_slice %246 {offsets = [0, 64], sizes = [2, 32], strides = [1, 1]} : vector<2x128xf32> to vector<2x32xf32>
    %250 = vector.extract_strided_slice %246 {offsets = [0, 96], sizes = [2, 32], strides = [1, 1]} : vector<2x128xf32> to vector<2x32xf32>
    %251 = arith.mulf %248, %233 : vector<2x32xf32>
    %252 = arith.mulf %247, %249 : vector<2x32xf32>
    %253 = arith.addf %251, %252 : vector<2x32xf32>
    %254 = math.tanh %253 : vector<2x32xf32>
    %255 = arith.mulf %250, %254 : vector<2x32xf32>
    %c2_77 = arith.constant 2 : index
    %c0_78 = arith.constant 0 : index
    %256 = vector.load %arg14[%c2_77, %c0_78] : memref<16x32xf32, #tpu.memory_space<vmem>>, vector<2x32xf32>
    tpu.vector_store %arg14[%c2_77, %c0_78], %255 {strides = array<i32>} : memref<16x32xf32, #tpu.memory_space<vmem>>, vector<2x32xf32>,
    %257 = vector.extract_strided_slice %214 {offsets = [4, 0], sizes = [2, 128], strides = [1, 1]} : vector<16x128xf32> to vector<2x128xf32>
    %cst_79 = arith.constant dense<0.000000e+00> : vector<2x128xf32>
    %258 = tpu.matmul %255, %211, %cst_79 {dimension_numbers = #tpu.dot_dimension_numbers<[1], [0], [0], [1], [0, 0, 1, 1], [], []>} : vector<2x32xf32>, vector<32x128xf32>, vector<2x128xf32> -> vector<2x128xf32>
    %259 = arith.addf %257, %258 : vector<2x128xf32>
    %260 = math.tanh %259 : vector<2x128xf32>
    %261 = arith.negf %259 : vector<2x128xf32>
    %262 = math.exp %261 : vector<2x128xf32>
    %cst_80 = arith.constant 1.000000e+00 : f32
    %263 = vector.broadcast %cst_80 : f32 to vector<2x128xf32>
    %264 = arith.addf %263, %262 : vector<2x128xf32>
    %265 = arith.divf %263, %264 : vector<2x128xf32>
    %266 = arith.select %38, %260, %265 : vector<2x128xi1>, vector<2x128xf32>
    %267 = vector.extract_strided_slice %266 {offsets = [0, 0], sizes = [2, 32], strides = [1, 1]} : vector<2x128xf32> to vector<2x32xf32>
    %268 = vector.extract_strided_slice %266 {offsets = [0, 32], sizes = [2, 32], strides = [1, 1]} : vector<2x128xf32> to vector<2x32xf32>
    %269 = vector.extract_strided_slice %266 {offsets = [0, 64], sizes = [2, 32], strides = [1, 1]} : vector<2x128xf32> to vector<2x32xf32>
    %270 = vector.extract_strided_slice %266 {offsets = [0, 96], sizes = [2, 32], strides = [1, 1]} : vector<2x128xf32> to vector<2x32xf32>
    %271 = arith.mulf %268, %253 : vector<2x32xf32>
    %272 = arith.mulf %267, %269 : vector<2x32xf32>
    %273 = arith.addf %271, %272 : vector<2x32xf32>
    %274 = math.tanh %273 : vector<2x32xf32>
    %275 = arith.mulf %270, %274 : vector<2x32xf32>
    %c4_81 = arith.constant 4 : index
    %c0_82 = arith.constant 0 : index
    %276 = vector.load %arg14[%c4_81, %c0_82] : memref<16x32xf32, #tpu.memory_space<vmem>>, vector<2x32xf32>
    tpu.vector_store %arg14[%c4_81, %c0_82], %275 {strides = array<i32>} : memref<16x32xf32, #tpu.memory_space<vmem>>, vector<2x32xf32>,
    %277 = vector.extract_strided_slice %214 {offsets = [6, 0], sizes = [2, 128], strides = [1, 1]} : vector<16x128xf32> to vector<2x128xf32>
    %cst_83 = arith.constant dense<0.000000e+00> : vector<2x128xf32>
    %278 = tpu.matmul %275, %211, %cst_83 {dimension_numbers = #tpu.dot_dimension_numbers<[1], [0], [0], [1], [0, 0, 1, 1], [], []>} : vector<2x32xf32>, vector<32x128xf32>, vector<2x128xf32> -> vector<2x128xf32>
    %279 = arith.addf %277, %278 : vector<2x128xf32>
    %280 = math.tanh %279 : vector<2x128xf32>
    %281 = arith.negf %279 : vector<2x128xf32>
    %282 = math.exp %281 : vector<2x128xf32>
    %cst_84 = arith.constant 1.000000e+00 : f32
    %283 = vector.broadcast %cst_84 : f32 to vector<2x128xf32>
    %284 = arith.addf %283, %282 : vector<2x128xf32>
    %285 = arith.divf %283, %284 : vector<2x128xf32>
    %286 = arith.select %38, %280, %285 : vector<2x128xi1>, vector<2x128xf32>
    %287 = vector.extract_strided_slice %286 {offsets = [0, 0], sizes = [2, 32], strides = [1, 1]} : vector<2x128xf32> to vector<2x32xf32>
    %288 = vector.extract_strided_slice %286 {offsets = [0, 32], sizes = [2, 32], strides = [1, 1]} : vector<2x128xf32> to vector<2x32xf32>
    %289 = vector.extract_strided_slice %286 {offsets = [0, 64], sizes = [2, 32], strides = [1, 1]} : vector<2x128xf32> to vector<2x32xf32>
    %290 = vector.extract_strided_slice %286 {offsets = [0, 96], sizes = [2, 32], strides = [1, 1]} : vector<2x128xf32> to vector<2x32xf32>
    %291 = arith.mulf %288, %273 : vector<2x32xf32>
    %292 = arith.mulf %287, %289 : vector<2x32xf32>
    %293 = arith.addf %291, %292 : vector<2x32xf32>
    %294 = math.tanh %293 : vector<2x32xf32>
    %295 = arith.mulf %290, %294 : vector<2x32xf32>
    %c6_85 = arith.constant 6 : index
    %c0_86 = arith.constant 0 : index
    %296 = vector.load %arg14[%c6_85, %c0_86] : memref<16x32xf32, #tpu.memory_space<vmem>>, vector<2x32xf32>
    tpu.vector_store %arg14[%c6_85, %c0_86], %295 {strides = array<i32>} : memref<16x32xf32, #tpu.memory_space<vmem>>, vector<2x32xf32>,
    %297 = vector.extract_strided_slice %214 {offsets = [8, 0], sizes = [2, 128], strides = [1, 1]} : vector<16x128xf32> to vector<2x128xf32>
    %cst_87 = arith.constant dense<0.000000e+00> : vector<2x128xf32>
    %298 = tpu.matmul %295, %211, %cst_87 {dimension_numbers = #tpu.dot_dimension_numbers<[1], [0], [0], [1], [0, 0, 1, 1], [], []>} : vector<2x32xf32>, vector<32x128xf32>, vector<2x128xf32> -> vector<2x128xf32>
    %299 = arith.addf %297, %298 : vector<2x128xf32>
    %300 = math.tanh %299 : vector<2x128xf32>
    %301 = arith.negf %299 : vector<2x128xf32>
    %302 = math.exp %301 : vector<2x128xf32>
    %cst_88 = arith.constant 1.000000e+00 : f32
    %303 = vector.broadcast %cst_88 : f32 to vector<2x128xf32>
    %304 = arith.addf %303, %302 : vector<2x128xf32>
    %305 = arith.divf %303, %304 : vector<2x128xf32>
    %306 = arith.select %38, %300, %305 : vector<2x128xi1>, vector<2x128xf32>
    %307 = vector.extract_strided_slice %306 {offsets = [0, 0], sizes = [2, 32], strides = [1, 1]} : vector<2x128xf32> to vector<2x32xf32>
    %308 = vector.extract_strided_slice %306 {offsets = [0, 32], sizes = [2, 32], strides = [1, 1]} : vector<2x128xf32> to vector<2x32xf32>
    %309 = vector.extract_strided_slice %306 {offsets = [0, 64], sizes = [2, 32], strides = [1, 1]} : vector<2x128xf32> to vector<2x32xf32>
    %310 = vector.extract_strided_slice %306 {offsets = [0, 96], sizes = [2, 32], strides = [1, 1]} : vector<2x128xf32> to vector<2x32xf32>
    %311 = arith.mulf %308, %293 : vector<2x32xf32>
    %312 = arith.mulf %307, %309 : vector<2x32xf32>
    %313 = arith.addf %311, %312 : vector<2x32xf32>
    %314 = math.tanh %313 : vector<2x32xf32>
    %315 = arith.mulf %310, %314 : vector<2x32xf32>
    %c8_89 = arith.constant 8 : index
    %c0_90 = arith.constant 0 : index
    %316 = vector.load %arg14[%c8_89, %c0_90] : memref<16x32xf32, #tpu.memory_space<vmem>>, vector<2x32xf32>
    tpu.vector_store %arg14[%c8_89, %c0_90], %315 {strides = array<i32>} : memref<16x32xf32, #tpu.memory_space<vmem>>, vector<2x32xf32>,
    %317 = vector.extract_strided_slice %214 {offsets = [10, 0], sizes = [2, 128], strides = [1, 1]} : vector<16x128xf32> to vector<2x128xf32>
    %cst_91 = arith.constant dense<0.000000e+00> : vector<2x128xf32>
    %318 = tpu.matmul %315, %211, %cst_91 {dimension_numbers = #tpu.dot_dimension_numbers<[1], [0], [0], [1], [0, 0, 1, 1], [], []>} : vector<2x32xf32>, vector<32x128xf32>, vector<2x128xf32> -> vector<2x128xf32>
    %319 = arith.addf %317, %318 : vector<2x128xf32>
    %320 = math.tanh %319 : vector<2x128xf32>
    %321 = arith.negf %319 : vector<2x128xf32>
    %322 = math.exp %321 : vector<2x128xf32>
    %cst_92 = arith.constant 1.000000e+00 : f32
    %323 = vector.broadcast %cst_92 : f32 to vector<2x128xf32>
    %324 = arith.addf %323, %322 : vector<2x128xf32>
    %325 = arith.divf %323, %324 : vector<2x128xf32>
    %326 = arith.select %38, %320, %325 : vector<2x128xi1>, vector<2x128xf32>
    %327 = vector.extract_strided_slice %326 {offsets = [0, 0], sizes = [2, 32], strides = [1, 1]} : vector<2x128xf32> to vector<2x32xf32>
    %328 = vector.extract_strided_slice %326 {offsets = [0, 32], sizes = [2, 32], strides = [1, 1]} : vector<2x128xf32> to vector<2x32xf32>
    %329 = vector.extract_strided_slice %326 {offsets = [0, 64], sizes = [2, 32], strides = [1, 1]} : vector<2x128xf32> to vector<2x32xf32>
    %330 = vector.extract_strided_slice %326 {offsets = [0, 96], sizes = [2, 32], strides = [1, 1]} : vector<2x128xf32> to vector<2x32xf32>
    %331 = arith.mulf %328, %313 : vector<2x32xf32>
    %332 = arith.mulf %327, %329 : vector<2x32xf32>
    %333 = arith.addf %331, %332 : vector<2x32xf32>
    %334 = math.tanh %333 : vector<2x32xf32>
    %335 = arith.mulf %330, %334 : vector<2x32xf32>
    %c10_93 = arith.constant 10 : index
    %c0_94 = arith.constant 0 : index
    %336 = vector.load %arg14[%c10_93, %c0_94] : memref<16x32xf32, #tpu.memory_space<vmem>>, vector<2x32xf32>
    tpu.vector_store %arg14[%c10_93, %c0_94], %335 {strides = array<i32>} : memref<16x32xf32, #tpu.memory_space<vmem>>, vector<2x32xf32>,
    %337 = vector.extract_strided_slice %214 {offsets = [12, 0], sizes = [2, 128], strides = [1, 1]} : vector<16x128xf32> to vector<2x128xf32>
    %cst_95 = arith.constant dense<0.000000e+00> : vector<2x128xf32>
    %338 = tpu.matmul %335, %211, %cst_95 {dimension_numbers = #tpu.dot_dimension_numbers<[1], [0], [0], [1], [0, 0, 1, 1], [], []>} : vector<2x32xf32>, vector<32x128xf32>, vector<2x128xf32> -> vector<2x128xf32>
    %339 = arith.addf %337, %338 : vector<2x128xf32>
    %340 = math.tanh %339 : vector<2x128xf32>
    %341 = arith.negf %339 : vector<2x128xf32>
    %342 = math.exp %341 : vector<2x128xf32>
    %cst_96 = arith.constant 1.000000e+00 : f32
    %343 = vector.broadcast %cst_96 : f32 to vector<2x128xf32>
    %344 = arith.addf %343, %342 : vector<2x128xf32>
    %345 = arith.divf %343, %344 : vector<2x128xf32>
    %346 = arith.select %38, %340, %345 : vector<2x128xi1>, vector<2x128xf32>
    %347 = vector.extract_strided_slice %346 {offsets = [0, 0], sizes = [2, 32], strides = [1, 1]} : vector<2x128xf32> to vector<2x32xf32>
    %348 = vector.extract_strided_slice %346 {offsets = [0, 32], sizes = [2, 32], strides = [1, 1]} : vector<2x128xf32> to vector<2x32xf32>
    %349 = vector.extract_strided_slice %346 {offsets = [0, 64], sizes = [2, 32], strides = [1, 1]} : vector<2x128xf32> to vector<2x32xf32>
    %350 = vector.extract_strided_slice %346 {offsets = [0, 96], sizes = [2, 32], strides = [1, 1]} : vector<2x128xf32> to vector<2x32xf32>
    %351 = arith.mulf %348, %333 : vector<2x32xf32>
    %352 = arith.mulf %347, %349 : vector<2x32xf32>
    %353 = arith.addf %351, %352 : vector<2x32xf32>
    %354 = math.tanh %353 : vector<2x32xf32>
    %355 = arith.mulf %350, %354 : vector<2x32xf32>
    %c12_97 = arith.constant 12 : index
    %c0_98 = arith.constant 0 : index
    %356 = vector.load %arg14[%c12_97, %c0_98] : memref<16x32xf32, #tpu.memory_space<vmem>>, vector<2x32xf32>
    tpu.vector_store %arg14[%c12_97, %c0_98], %355 {strides = array<i32>} : memref<16x32xf32, #tpu.memory_space<vmem>>, vector<2x32xf32>,
    %357 = vector.extract_strided_slice %214 {offsets = [14, 0], sizes = [2, 128], strides = [1, 1]} : vector<16x128xf32> to vector<2x128xf32>
    %cst_99 = arith.constant dense<0.000000e+00> : vector<2x128xf32>
    %358 = tpu.matmul %355, %211, %cst_99 {dimension_numbers = #tpu.dot_dimension_numbers<[1], [0], [0], [1], [0, 0, 1, 1], [], []>} : vector<2x32xf32>, vector<32x128xf32>, vector<2x128xf32> -> vector<2x128xf32>
    %359 = arith.addf %357, %358 : vector<2x128xf32>
    %360 = math.tanh %359 : vector<2x128xf32>
    %361 = arith.negf %359 : vector<2x128xf32>
    %362 = math.exp %361 : vector<2x128xf32>
    %cst_100 = arith.constant 1.000000e+00 : f32
    %363 = vector.broadcast %cst_100 : f32 to vector<2x128xf32>
    %364 = arith.addf %363, %362 : vector<2x128xf32>
    %365 = arith.divf %363, %364 : vector<2x128xf32>
    %366 = arith.select %38, %360, %365 : vector<2x128xi1>, vector<2x128xf32>
    %367 = vector.extract_strided_slice %366 {offsets = [0, 0], sizes = [2, 32], strides = [1, 1]} : vector<2x128xf32> to vector<2x32xf32>
    %368 = vector.extract_strided_slice %366 {offsets = [0, 32], sizes = [2, 32], strides = [1, 1]} : vector<2x128xf32> to vector<2x32xf32>
    %369 = vector.extract_strided_slice %366 {offsets = [0, 64], sizes = [2, 32], strides = [1, 1]} : vector<2x128xf32> to vector<2x32xf32>
    %370 = vector.extract_strided_slice %366 {offsets = [0, 96], sizes = [2, 32], strides = [1, 1]} : vector<2x128xf32> to vector<2x32xf32>
    %371 = arith.mulf %368, %353 : vector<2x32xf32>
    %372 = arith.mulf %367, %369 : vector<2x32xf32>
    %373 = arith.addf %371, %372 : vector<2x32xf32>
    %374 = math.tanh %373 : vector<2x32xf32>
    %375 = arith.mulf %370, %374 : vector<2x32xf32>
    %c14_101 = arith.constant 14 : index
    %c0_102 = arith.constant 0 : index
    %376 = vector.load %arg14[%c14_101, %c0_102] : memref<16x32xf32, #tpu.memory_space<vmem>>, vector<2x32xf32>
    tpu.vector_store %arg14[%c14_101, %c0_102], %375 {strides = array<i32>} : memref<16x32xf32, #tpu.memory_space<vmem>>, vector<2x32xf32>,
    %c0_103 = arith.constant 0 : index
    %c0_104 = arith.constant 0 : index
    %377 = vector.load %arg14[%c0_103, %c0_104] : memref<16x32xf32, #tpu.memory_space<vmem>>, vector<16x32xf32>
    %c0_105 = arith.constant 0 : index
    %c0_106 = arith.constant 0 : index
    %378 = vector.load %arg7[%c0_105, %c0_106] : memref<32x128xf32, #tpu.memory_space<vmem>>, vector<32x128xf32>
    %c0_107 = arith.constant 0 : index
    %c0_108 = arith.constant 0 : index
    %379 = vector.load %arg9[%c0_107, %c0_108] : memref<1x128xf32, #tpu.memory_space<vmem>>, vector<1x128xf32>
    %c0_109 = arith.constant 0 : index
    %c0_110 = arith.constant 0 : index
    %380 = vector.load %arg8[%c0_109, %c0_110] : memref<32x128xf32, #tpu.memory_space<vmem>>, vector<32x128xf32>
    %cst_111 = arith.constant dense<0.000000e+00> : vector<16x128xf32>
    %381 = tpu.matmul %377, %378, %cst_111 {dimension_numbers = #tpu.dot_dimension_numbers<[1], [0], [0], [1], [0, 0, 1, 1], [], []>} : vector<16x32xf32>, vector<32x128xf32>, vector<16x128xf32> -> vector<16x128xf32>
    %382 = vector.broadcast %379 : vector<1x128xf32> to vector<16x128xf32>
    %383 = arith.addf %381, %382 : vector<16x128xf32>
    %cst_112 = arith.constant 0.000000e+00 : f32
    %384 = vector.broadcast %cst_112 : f32 to vector<2x32xf32>
    %cst_113 = arith.constant 0.000000e+00 : f32
    %385 = vector.broadcast %cst_113 : f32 to vector<2x32xf32>
    %386 = vector.extract_strided_slice %383 {offsets = [0, 0], sizes = [2, 128], strides = [1, 1]} : vector<16x128xf32> to vector<2x128xf32>
    %cst_114 = arith.constant dense<0.000000e+00> : vector<2x128xf32>
    %387 = tpu.matmul %384, %380, %cst_114 {dimension_numbers = #tpu.dot_dimension_numbers<[1], [0], [0], [1], [0, 0, 1, 1], [], []>} : vector<2x32xf32>, vector<32x128xf32>, vector<2x128xf32> -> vector<2x128xf32>
    %388 = arith.addf %386, %387 : vector<2x128xf32>
    %389 = math.tanh %388 : vector<2x128xf32>
    %390 = arith.negf %388 : vector<2x128xf32>
    %391 = math.exp %390 : vector<2x128xf32>
    %cst_115 = arith.constant 1.000000e+00 : f32
    %392 = vector.broadcast %cst_115 : f32 to vector<2x128xf32>
    %393 = arith.addf %392, %391 : vector<2x128xf32>
    %394 = arith.divf %392, %393 : vector<2x128xf32>
    %395 = arith.select %38, %389, %394 : vector<2x128xi1>, vector<2x128xf32>
    %396 = vector.extract_strided_slice %395 {offsets = [0, 0], sizes = [2, 32], strides = [1, 1]} : vector<2x128xf32> to vector<2x32xf32>
    %397 = vector.extract_strided_slice %395 {offsets = [0, 32], sizes = [2, 32], strides = [1, 1]} : vector<2x128xf32> to vector<2x32xf32>
    %398 = vector.extract_strided_slice %395 {offsets = [0, 64], sizes = [2, 32], strides = [1, 1]} : vector<2x128xf32> to vector<2x32xf32>
    %399 = vector.extract_strided_slice %395 {offsets = [0, 96], sizes = [2, 32], strides = [1, 1]} : vector<2x128xf32> to vector<2x32xf32>
    %400 = arith.mulf %397, %385 : vector<2x32xf32>
    %401 = arith.mulf %396, %398 : vector<2x32xf32>
    %402 = arith.addf %400, %401 : vector<2x32xf32>
    %403 = math.tanh %402 : vector<2x32xf32>
    %404 = arith.mulf %399, %403 : vector<2x32xf32>
    %c0_116 = arith.constant 0 : index
    %c0_117 = arith.constant 0 : index
    %405 = vector.load %arg14[%c0_116, %c0_117] : memref<16x32xf32, #tpu.memory_space<vmem>>, vector<2x32xf32>
    tpu.vector_store %arg14[%c0_116, %c0_117], %404 {strides = array<i32>} : memref<16x32xf32, #tpu.memory_space<vmem>>, vector<2x32xf32>,
    %406 = vector.extract_strided_slice %383 {offsets = [2, 0], sizes = [2, 128], strides = [1, 1]} : vector<16x128xf32> to vector<2x128xf32>
    %cst_118 = arith.constant dense<0.000000e+00> : vector<2x128xf32>
    %407 = tpu.matmul %404, %380, %cst_118 {dimension_numbers = #tpu.dot_dimension_numbers<[1], [0], [0], [1], [0, 0, 1, 1], [], []>} : vector<2x32xf32>, vector<32x128xf32>, vector<2x128xf32> -> vector<2x128xf32>
    %408 = arith.addf %406, %407 : vector<2x128xf32>
    %409 = math.tanh %408 : vector<2x128xf32>
    %410 = arith.negf %408 : vector<2x128xf32>
    %411 = math.exp %410 : vector<2x128xf32>
    %cst_119 = arith.constant 1.000000e+00 : f32
    %412 = vector.broadcast %cst_119 : f32 to vector<2x128xf32>
    %413 = arith.addf %412, %411 : vector<2x128xf32>
    %414 = arith.divf %412, %413 : vector<2x128xf32>
    %415 = arith.select %38, %409, %414 : vector<2x128xi1>, vector<2x128xf32>
    %416 = vector.extract_strided_slice %415 {offsets = [0, 0], sizes = [2, 32], strides = [1, 1]} : vector<2x128xf32> to vector<2x32xf32>
    %417 = vector.extract_strided_slice %415 {offsets = [0, 32], sizes = [2, 32], strides = [1, 1]} : vector<2x128xf32> to vector<2x32xf32>
    %418 = vector.extract_strided_slice %415 {offsets = [0, 64], sizes = [2, 32], strides = [1, 1]} : vector<2x128xf32> to vector<2x32xf32>
    %419 = vector.extract_strided_slice %415 {offsets = [0, 96], sizes = [2, 32], strides = [1, 1]} : vector<2x128xf32> to vector<2x32xf32>
    %420 = arith.mulf %417, %402 : vector<2x32xf32>
    %421 = arith.mulf %416, %418 : vector<2x32xf32>
    %422 = arith.addf %420, %421 : vector<2x32xf32>
    %423 = math.tanh %422 : vector<2x32xf32>
    %424 = arith.mulf %419, %423 : vector<2x32xf32>
    %c2_120 = arith.constant 2 : index
    %c0_121 = arith.constant 0 : index
    %425 = vector.load %arg14[%c2_120, %c0_121] : memref<16x32xf32, #tpu.memory_space<vmem>>, vector<2x32xf32>
    tpu.vector_store %arg14[%c2_120, %c0_121], %424 {strides = array<i32>} : memref<16x32xf32, #tpu.memory_space<vmem>>, vector<2x32xf32>,
    %426 = vector.extract_strided_slice %383 {offsets = [4, 0], sizes = [2, 128], strides = [1, 1]} : vector<16x128xf32> to vector<2x128xf32>
    %cst_122 = arith.constant dense<0.000000e+00> : vector<2x128xf32>
    %427 = tpu.matmul %424, %380, %cst_122 {dimension_numbers = #tpu.dot_dimension_numbers<[1], [0], [0], [1], [0, 0, 1, 1], [], []>} : vector<2x32xf32>, vector<32x128xf32>, vector<2x128xf32> -> vector<2x128xf32>
    %428 = arith.addf %426, %427 : vector<2x128xf32>
    %429 = math.tanh %428 : vector<2x128xf32>
    %430 = arith.negf %428 : vector<2x128xf32>
    %431 = math.exp %430 : vector<2x128xf32>
    %cst_123 = arith.constant 1.000000e+00 : f32
    %432 = vector.broadcast %cst_123 : f32 to vector<2x128xf32>
    %433 = arith.addf %432, %431 : vector<2x128xf32>
    %434 = arith.divf %432, %433 : vector<2x128xf32>
    %435 = arith.select %38, %429, %434 : vector<2x128xi1>, vector<2x128xf32>
    %436 = vector.extract_strided_slice %435 {offsets = [0, 0], sizes = [2, 32], strides = [1, 1]} : vector<2x128xf32> to vector<2x32xf32>
    %437 = vector.extract_strided_slice %435 {offsets = [0, 32], sizes = [2, 32], strides = [1, 1]} : vector<2x128xf32> to vector<2x32xf32>
    %438 = vector.extract_strided_slice %435 {offsets = [0, 64], sizes = [2, 32], strides = [1, 1]} : vector<2x128xf32> to vector<2x32xf32>
    %439 = vector.extract_strided_slice %435 {offsets = [0, 96], sizes = [2, 32], strides = [1, 1]} : vector<2x128xf32> to vector<2x32xf32>
    %440 = arith.mulf %437, %422 : vector<2x32xf32>
    %441 = arith.mulf %436, %438 : vector<2x32xf32>
    %442 = arith.addf %440, %441 : vector<2x32xf32>
    %443 = math.tanh %442 : vector<2x32xf32>
    %444 = arith.mulf %439, %443 : vector<2x32xf32>
    %c4_124 = arith.constant 4 : index
    %c0_125 = arith.constant 0 : index
    %445 = vector.load %arg14[%c4_124, %c0_125] : memref<16x32xf32, #tpu.memory_space<vmem>>, vector<2x32xf32>
    tpu.vector_store %arg14[%c4_124, %c0_125], %444 {strides = array<i32>} : memref<16x32xf32, #tpu.memory_space<vmem>>, vector<2x32xf32>,
    %446 = vector.extract_strided_slice %383 {offsets = [6, 0], sizes = [2, 128], strides = [1, 1]} : vector<16x128xf32> to vector<2x128xf32>
    %cst_126 = arith.constant dense<0.000000e+00> : vector<2x128xf32>
    %447 = tpu.matmul %444, %380, %cst_126 {dimension_numbers = #tpu.dot_dimension_numbers<[1], [0], [0], [1], [0, 0, 1, 1], [], []>} : vector<2x32xf32>, vector<32x128xf32>, vector<2x128xf32> -> vector<2x128xf32>
    %448 = arith.addf %446, %447 : vector<2x128xf32>
    %449 = math.tanh %448 : vector<2x128xf32>
    %450 = arith.negf %448 : vector<2x128xf32>
    %451 = math.exp %450 : vector<2x128xf32>
    %cst_127 = arith.constant 1.000000e+00 : f32
    %452 = vector.broadcast %cst_127 : f32 to vector<2x128xf32>
    %453 = arith.addf %452, %451 : vector<2x128xf32>
    %454 = arith.divf %452, %453 : vector<2x128xf32>
    %455 = arith.select %38, %449, %454 : vector<2x128xi1>, vector<2x128xf32>
    %456 = vector.extract_strided_slice %455 {offsets = [0, 0], sizes = [2, 32], strides = [1, 1]} : vector<2x128xf32> to vector<2x32xf32>
    %457 = vector.extract_strided_slice %455 {offsets = [0, 32], sizes = [2, 32], strides = [1, 1]} : vector<2x128xf32> to vector<2x32xf32>
    %458 = vector.extract_strided_slice %455 {offsets = [0, 64], sizes = [2, 32], strides = [1, 1]} : vector<2x128xf32> to vector<2x32xf32>
    %459 = vector.extract_strided_slice %455 {offsets = [0, 96], sizes = [2, 32], strides = [1, 1]} : vector<2x128xf32> to vector<2x32xf32>
    %460 = arith.mulf %457, %442 : vector<2x32xf32>
    %461 = arith.mulf %456, %458 : vector<2x32xf32>
    %462 = arith.addf %460, %461 : vector<2x32xf32>
    %463 = math.tanh %462 : vector<2x32xf32>
    %464 = arith.mulf %459, %463 : vector<2x32xf32>
    %c6_128 = arith.constant 6 : index
    %c0_129 = arith.constant 0 : index
    %465 = vector.load %arg14[%c6_128, %c0_129] : memref<16x32xf32, #tpu.memory_space<vmem>>, vector<2x32xf32>
    tpu.vector_store %arg14[%c6_128, %c0_129], %464 {strides = array<i32>} : memref<16x32xf32, #tpu.memory_space<vmem>>, vector<2x32xf32>,
    %466 = vector.extract_strided_slice %383 {offsets = [8, 0], sizes = [2, 128], strides = [1, 1]} : vector<16x128xf32> to vector<2x128xf32>
    %cst_130 = arith.constant dense<0.000000e+00> : vector<2x128xf32>
    %467 = tpu.matmul %464, %380, %cst_130 {dimension_numbers = #tpu.dot_dimension_numbers<[1], [0], [0], [1], [0, 0, 1, 1], [], []>} : vector<2x32xf32>, vector<32x128xf32>, vector<2x128xf32> -> vector<2x128xf32>
    %468 = arith.addf %466, %467 : vector<2x128xf32>
    %469 = math.tanh %468 : vector<2x128xf32>
    %470 = arith.negf %468 : vector<2x128xf32>
    %471 = math.exp %470 : vector<2x128xf32>
    %cst_131 = arith.constant 1.000000e+00 : f32
    %472 = vector.broadcast %cst_131 : f32 to vector<2x128xf32>
    %473 = arith.addf %472, %471 : vector<2x128xf32>
    %474 = arith.divf %472, %473 : vector<2x128xf32>
    %475 = arith.select %38, %469, %474 : vector<2x128xi1>, vector<2x128xf32>
    %476 = vector.extract_strided_slice %475 {offsets = [0, 0], sizes = [2, 32], strides = [1, 1]} : vector<2x128xf32> to vector<2x32xf32>
    %477 = vector.extract_strided_slice %475 {offsets = [0, 32], sizes = [2, 32], strides = [1, 1]} : vector<2x128xf32> to vector<2x32xf32>
    %478 = vector.extract_strided_slice %475 {offsets = [0, 64], sizes = [2, 32], strides = [1, 1]} : vector<2x128xf32> to vector<2x32xf32>
    %479 = vector.extract_strided_slice %475 {offsets = [0, 96], sizes = [2, 32], strides = [1, 1]} : vector<2x128xf32> to vector<2x32xf32>
    %480 = arith.mulf %477, %462 : vector<2x32xf32>
    %481 = arith.mulf %476, %478 : vector<2x32xf32>
    %482 = arith.addf %480, %481 : vector<2x32xf32>
    %483 = math.tanh %482 : vector<2x32xf32>
    %484 = arith.mulf %479, %483 : vector<2x32xf32>
    %c8_132 = arith.constant 8 : index
    %c0_133 = arith.constant 0 : index
    %485 = vector.load %arg14[%c8_132, %c0_133] : memref<16x32xf32, #tpu.memory_space<vmem>>, vector<2x32xf32>
    tpu.vector_store %arg14[%c8_132, %c0_133], %484 {strides = array<i32>} : memref<16x32xf32, #tpu.memory_space<vmem>>, vector<2x32xf32>,
    %486 = vector.extract_strided_slice %383 {offsets = [10, 0], sizes = [2, 128], strides = [1, 1]} : vector<16x128xf32> to vector<2x128xf32>
    %cst_134 = arith.constant dense<0.000000e+00> : vector<2x128xf32>
    %487 = tpu.matmul %484, %380, %cst_134 {dimension_numbers = #tpu.dot_dimension_numbers<[1], [0], [0], [1], [0, 0, 1, 1], [], []>} : vector<2x32xf32>, vector<32x128xf32>, vector<2x128xf32> -> vector<2x128xf32>
    %488 = arith.addf %486, %487 : vector<2x128xf32>
    %489 = math.tanh %488 : vector<2x128xf32>
    %490 = arith.negf %488 : vector<2x128xf32>
    %491 = math.exp %490 : vector<2x128xf32>
    %cst_135 = arith.constant 1.000000e+00 : f32
    %492 = vector.broadcast %cst_135 : f32 to vector<2x128xf32>
    %493 = arith.addf %492, %491 : vector<2x128xf32>
    %494 = arith.divf %492, %493 : vector<2x128xf32>
    %495 = arith.select %38, %489, %494 : vector<2x128xi1>, vector<2x128xf32>
    %496 = vector.extract_strided_slice %495 {offsets = [0, 0], sizes = [2, 32], strides = [1, 1]} : vector<2x128xf32> to vector<2x32xf32>
    %497 = vector.extract_strided_slice %495 {offsets = [0, 32], sizes = [2, 32], strides = [1, 1]} : vector<2x128xf32> to vector<2x32xf32>
    %498 = vector.extract_strided_slice %495 {offsets = [0, 64], sizes = [2, 32], strides = [1, 1]} : vector<2x128xf32> to vector<2x32xf32>
    %499 = vector.extract_strided_slice %495 {offsets = [0, 96], sizes = [2, 32], strides = [1, 1]} : vector<2x128xf32> to vector<2x32xf32>
    %500 = arith.mulf %497, %482 : vector<2x32xf32>
    %501 = arith.mulf %496, %498 : vector<2x32xf32>
    %502 = arith.addf %500, %501 : vector<2x32xf32>
    %503 = math.tanh %502 : vector<2x32xf32>
    %504 = arith.mulf %499, %503 : vector<2x32xf32>
    %c10_136 = arith.constant 10 : index
    %c0_137 = arith.constant 0 : index
    %505 = vector.load %arg14[%c10_136, %c0_137] : memref<16x32xf32, #tpu.memory_space<vmem>>, vector<2x32xf32>
    tpu.vector_store %arg14[%c10_136, %c0_137], %504 {strides = array<i32>} : memref<16x32xf32, #tpu.memory_space<vmem>>, vector<2x32xf32>,
    %506 = vector.extract_strided_slice %383 {offsets = [12, 0], sizes = [2, 128], strides = [1, 1]} : vector<16x128xf32> to vector<2x128xf32>
    %cst_138 = arith.constant dense<0.000000e+00> : vector<2x128xf32>
    %507 = tpu.matmul %504, %380, %cst_138 {dimension_numbers = #tpu.dot_dimension_numbers<[1], [0], [0], [1], [0, 0, 1, 1], [], []>} : vector<2x32xf32>, vector<32x128xf32>, vector<2x128xf32> -> vector<2x128xf32>
    %508 = arith.addf %506, %507 : vector<2x128xf32>
    %509 = math.tanh %508 : vector<2x128xf32>
    %510 = arith.negf %508 : vector<2x128xf32>
    %511 = math.exp %510 : vector<2x128xf32>
    %cst_139 = arith.constant 1.000000e+00 : f32
    %512 = vector.broadcast %cst_139 : f32 to vector<2x128xf32>
    %513 = arith.addf %512, %511 : vector<2x128xf32>
    %514 = arith.divf %512, %513 : vector<2x128xf32>
    %515 = arith.select %38, %509, %514 : vector<2x128xi1>, vector<2x128xf32>
    %516 = vector.extract_strided_slice %515 {offsets = [0, 0], sizes = [2, 32], strides = [1, 1]} : vector<2x128xf32> to vector<2x32xf32>
    %517 = vector.extract_strided_slice %515 {offsets = [0, 32], sizes = [2, 32], strides = [1, 1]} : vector<2x128xf32> to vector<2x32xf32>
    %518 = vector.extract_strided_slice %515 {offsets = [0, 64], sizes = [2, 32], strides = [1, 1]} : vector<2x128xf32> to vector<2x32xf32>
    %519 = vector.extract_strided_slice %515 {offsets = [0, 96], sizes = [2, 32], strides = [1, 1]} : vector<2x128xf32> to vector<2x32xf32>
    %520 = arith.mulf %517, %502 : vector<2x32xf32>
    %521 = arith.mulf %516, %518 : vector<2x32xf32>
    %522 = arith.addf %520, %521 : vector<2x32xf32>
    %523 = math.tanh %522 : vector<2x32xf32>
    %524 = arith.mulf %519, %523 : vector<2x32xf32>
    %c12_140 = arith.constant 12 : index
    %c0_141 = arith.constant 0 : index
    %525 = vector.load %arg14[%c12_140, %c0_141] : memref<16x32xf32, #tpu.memory_space<vmem>>, vector<2x32xf32>
    tpu.vector_store %arg14[%c12_140, %c0_141], %524 {strides = array<i32>} : memref<16x32xf32, #tpu.memory_space<vmem>>, vector<2x32xf32>,
    %526 = vector.extract_strided_slice %383 {offsets = [14, 0], sizes = [2, 128], strides = [1, 1]} : vector<16x128xf32> to vector<2x128xf32>
    %cst_142 = arith.constant dense<0.000000e+00> : vector<2x128xf32>
    %527 = tpu.matmul %524, %380, %cst_142 {dimension_numbers = #tpu.dot_dimension_numbers<[1], [0], [0], [1], [0, 0, 1, 1], [], []>} : vector<2x32xf32>, vector<32x128xf32>, vector<2x128xf32> -> vector<2x128xf32>
    %528 = arith.addf %526, %527 : vector<2x128xf32>
    %529 = math.tanh %528 : vector<2x128xf32>
    %530 = arith.negf %528 : vector<2x128xf32>
    %531 = math.exp %530 : vector<2x128xf32>
    %cst_143 = arith.constant 1.000000e+00 : f32
    %532 = vector.broadcast %cst_143 : f32 to vector<2x128xf32>
    %533 = arith.addf %532, %531 : vector<2x128xf32>
    %534 = arith.divf %532, %533 : vector<2x128xf32>
    %535 = arith.select %38, %529, %534 : vector<2x128xi1>, vector<2x128xf32>
    %536 = vector.extract_strided_slice %535 {offsets = [0, 0], sizes = [2, 32], strides = [1, 1]} : vector<2x128xf32> to vector<2x32xf32>
    %537 = vector.extract_strided_slice %535 {offsets = [0, 32], sizes = [2, 32], strides = [1, 1]} : vector<2x128xf32> to vector<2x32xf32>
    %538 = vector.extract_strided_slice %535 {offsets = [0, 64], sizes = [2, 32], strides = [1, 1]} : vector<2x128xf32> to vector<2x32xf32>
    %539 = vector.extract_strided_slice %535 {offsets = [0, 96], sizes = [2, 32], strides = [1, 1]} : vector<2x128xf32> to vector<2x32xf32>
    %540 = arith.mulf %537, %522 : vector<2x32xf32>
    %541 = arith.mulf %536, %538 : vector<2x32xf32>
    %542 = arith.addf %540, %541 : vector<2x32xf32>
    %543 = math.tanh %542 : vector<2x32xf32>
    %544 = arith.mulf %539, %543 : vector<2x32xf32>
    %c14_144 = arith.constant 14 : index
    %c0_145 = arith.constant 0 : index
    %545 = vector.load %arg14[%c14_144, %c0_145] : memref<16x32xf32, #tpu.memory_space<vmem>>, vector<2x32xf32>
    tpu.vector_store %arg14[%c14_144, %c0_145], %544 {strides = array<i32>} : memref<16x32xf32, #tpu.memory_space<vmem>>, vector<2x32xf32>,
    %c0_146 = arith.constant 0 : index
    %c0_147 = arith.constant 0 : index
    %546 = vector.load %arg14[%c0_146, %c0_147] : memref<16x32xf32, #tpu.memory_space<vmem>>, vector<16x32xf32>
    %c0_148 = arith.constant 0 : index
    %c0_149 = arith.constant 0 : index
    %547 = vector.load %arg10[%c0_148, %c0_149] : memref<32x16xf32, #tpu.memory_space<vmem>>, vector<32x16xf32>
    %cst_150 = arith.constant dense<0.000000e+00> : vector<16x16xf32>
    %548 = tpu.matmul %546, %547, %cst_150 {dimension_numbers = #tpu.dot_dimension_numbers<[1], [0], [0], [1], [0, 0, 1, 1], [], []>} : vector<16x32xf32>, vector<32x16xf32>, vector<16x16xf32> -> vector<16x16xf32>
    %c0_151 = arith.constant 0 : index
    %c0_152 = arith.constant 0 : index
    %549 = vector.load %arg11[%c0_151, %c0_152] : memref<1x16xf32, #tpu.memory_space<vmem>>, vector<1x16xf32>
    %550 = vector.broadcast %549 : vector<1x16xf32> to vector<16x16xf32>
    %551 = arith.addf %548, %550 : vector<16x16xf32>
    %552 = vector.extract_strided_slice %551 {offsets = [0, 0], sizes = [1, 16], strides = [1, 1]} : vector<16x16xf32> to vector<1x16xf32>
    %c0_153 = arith.constant 0 : index
    %c0_154 = arith.constant 0 : index
    %553 = vector.load %arg12[%c0_153, %c0_154] : memref<16x16xf32, #tpu.memory_space<vmem>>, vector<1x16xf32>
    tpu.vector_store %arg12[%c0_153, %c0_154], %552 {strides = array<i32>} : memref<16x16xf32, #tpu.memory_space<vmem>>, vector<1x16xf32>,
    %554 = vector.extract_strided_slice %551 {offsets = [2, 0], sizes = [1, 16], strides = [1, 1]} : vector<16x16xf32> to vector<1x16xf32>
    %c1_155 = arith.constant 1 : index
    %c0_156 = arith.constant 0 : index
    %555 = vector.load %arg12[%c1_155, %c0_156] : memref<16x16xf32, #tpu.memory_space<vmem>>, vector<1x16xf32>
    tpu.vector_store %arg12[%c1_155, %c0_156], %554 {strides = array<i32>} : memref<16x16xf32, #tpu.memory_space<vmem>>, vector<1x16xf32>,
    %556 = vector.extract_strided_slice %551 {offsets = [4, 0], sizes = [1, 16], strides = [1, 1]} : vector<16x16xf32> to vector<1x16xf32>
    %c2_157 = arith.constant 2 : index
    %c0_158 = arith.constant 0 : index
    %557 = vector.load %arg12[%c2_157, %c0_158] : memref<16x16xf32, #tpu.memory_space<vmem>>, vector<1x16xf32>
    tpu.vector_store %arg12[%c2_157, %c0_158], %556 {strides = array<i32>} : memref<16x16xf32, #tpu.memory_space<vmem>>, vector<1x16xf32>,
    %558 = vector.extract_strided_slice %551 {offsets = [6, 0], sizes = [1, 16], strides = [1, 1]} : vector<16x16xf32> to vector<1x16xf32>
    %c3_159 = arith.constant 3 : index
    %c0_160 = arith.constant 0 : index
    %559 = vector.load %arg12[%c3_159, %c0_160] : memref<16x16xf32, #tpu.memory_space<vmem>>, vector<1x16xf32>
    tpu.vector_store %arg12[%c3_159, %c0_160], %558 {strides = array<i32>} : memref<16x16xf32, #tpu.memory_space<vmem>>, vector<1x16xf32>,
    %560 = vector.extract_strided_slice %551 {offsets = [8, 0], sizes = [1, 16], strides = [1, 1]} : vector<16x16xf32> to vector<1x16xf32>
    %c4_161 = arith.constant 4 : index
    %c0_162 = arith.constant 0 : index
    %561 = vector.load %arg12[%c4_161, %c0_162] : memref<16x16xf32, #tpu.memory_space<vmem>>, vector<1x16xf32>
    tpu.vector_store %arg12[%c4_161, %c0_162], %560 {strides = array<i32>} : memref<16x16xf32, #tpu.memory_space<vmem>>, vector<1x16xf32>,
    %562 = vector.extract_strided_slice %551 {offsets = [10, 0], sizes = [1, 16], strides = [1, 1]} : vector<16x16xf32> to vector<1x16xf32>
    %c5_163 = arith.constant 5 : index
    %c0_164 = arith.constant 0 : index
    %563 = vector.load %arg12[%c5_163, %c0_164] : memref<16x16xf32, #tpu.memory_space<vmem>>, vector<1x16xf32>
    tpu.vector_store %arg12[%c5_163, %c0_164], %562 {strides = array<i32>} : memref<16x16xf32, #tpu.memory_space<vmem>>, vector<1x16xf32>,
    %564 = vector.extract_strided_slice %551 {offsets = [12, 0], sizes = [1, 16], strides = [1, 1]} : vector<16x16xf32> to vector<1x16xf32>
    %c6_165 = arith.constant 6 : index
    %c0_166 = arith.constant 0 : index
    %565 = vector.load %arg12[%c6_165, %c0_166] : memref<16x16xf32, #tpu.memory_space<vmem>>, vector<1x16xf32>
    tpu.vector_store %arg12[%c6_165, %c0_166], %564 {strides = array<i32>} : memref<16x16xf32, #tpu.memory_space<vmem>>, vector<1x16xf32>,
    %566 = vector.extract_strided_slice %551 {offsets = [14, 0], sizes = [1, 16], strides = [1, 1]} : vector<16x16xf32> to vector<1x16xf32>
    %c7_167 = arith.constant 7 : index
    %c0_168 = arith.constant 0 : index
    %567 = vector.load %arg12[%c7_167, %c0_168] : memref<16x16xf32, #tpu.memory_space<vmem>>, vector<1x16xf32>
    tpu.vector_store %arg12[%c7_167, %c0_168], %566 {strides = array<i32>} : memref<16x16xf32, #tpu.memory_space<vmem>>, vector<1x16xf32>,
    %568 = vector.extract_strided_slice %551 {offsets = [1, 0], sizes = [1, 16], strides = [1, 1]} : vector<16x16xf32> to vector<1x16xf32>
    %c8_169 = arith.constant 8 : index
    %c0_170 = arith.constant 0 : index
    %569 = vector.load %arg12[%c8_169, %c0_170] : memref<16x16xf32, #tpu.memory_space<vmem>>, vector<1x16xf32>
    tpu.vector_store %arg12[%c8_169, %c0_170], %568 {strides = array<i32>} : memref<16x16xf32, #tpu.memory_space<vmem>>, vector<1x16xf32>,
    %570 = vector.extract_strided_slice %551 {offsets = [3, 0], sizes = [1, 16], strides = [1, 1]} : vector<16x16xf32> to vector<1x16xf32>
    %c9_171 = arith.constant 9 : index
    %c0_172 = arith.constant 0 : index
    %571 = vector.load %arg12[%c9_171, %c0_172] : memref<16x16xf32, #tpu.memory_space<vmem>>, vector<1x16xf32>
    tpu.vector_store %arg12[%c9_171, %c0_172], %570 {strides = array<i32>} : memref<16x16xf32, #tpu.memory_space<vmem>>, vector<1x16xf32>,
    %572 = vector.extract_strided_slice %551 {offsets = [5, 0], sizes = [1, 16], strides = [1, 1]} : vector<16x16xf32> to vector<1x16xf32>
    %c10_173 = arith.constant 10 : index
    %c0_174 = arith.constant 0 : index
    %573 = vector.load %arg12[%c10_173, %c0_174] : memref<16x16xf32, #tpu.memory_space<vmem>>, vector<1x16xf32>
    tpu.vector_store %arg12[%c10_173, %c0_174], %572 {strides = array<i32>} : memref<16x16xf32, #tpu.memory_space<vmem>>, vector<1x16xf32>,
    %574 = vector.extract_strided_slice %551 {offsets = [7, 0], sizes = [1, 16], strides = [1, 1]} : vector<16x16xf32> to vector<1x16xf32>
    %c11_175 = arith.constant 11 : index
    %c0_176 = arith.constant 0 : index
    %575 = vector.load %arg12[%c11_175, %c0_176] : memref<16x16xf32, #tpu.memory_space<vmem>>, vector<1x16xf32>
    tpu.vector_store %arg12[%c11_175, %c0_176], %574 {strides = array<i32>} : memref<16x16xf32, #tpu.memory_space<vmem>>, vector<1x16xf32>,
    %576 = vector.extract_strided_slice %551 {offsets = [9, 0], sizes = [1, 16], strides = [1, 1]} : vector<16x16xf32> to vector<1x16xf32>
    %c12_177 = arith.constant 12 : index
    %c0_178 = arith.constant 0 : index
    %577 = vector.load %arg12[%c12_177, %c0_178] : memref<16x16xf32, #tpu.memory_space<vmem>>, vector<1x16xf32>
    tpu.vector_store %arg12[%c12_177, %c0_178], %576 {strides = array<i32>} : memref<16x16xf32, #tpu.memory_space<vmem>>, vector<1x16xf32>,
    %578 = vector.extract_strided_slice %551 {offsets = [11, 0], sizes = [1, 16], strides = [1, 1]} : vector<16x16xf32> to vector<1x16xf32>
    %c13_179 = arith.constant 13 : index
    %c0_180 = arith.constant 0 : index
    %579 = vector.load %arg12[%c13_179, %c0_180] : memref<16x16xf32, #tpu.memory_space<vmem>>, vector<1x16xf32>
    tpu.vector_store %arg12[%c13_179, %c0_180], %578 {strides = array<i32>} : memref<16x16xf32, #tpu.memory_space<vmem>>, vector<1x16xf32>,
    %580 = vector.extract_strided_slice %551 {offsets = [13, 0], sizes = [1, 16], strides = [1, 1]} : vector<16x16xf32> to vector<1x16xf32>
    %c14_181 = arith.constant 14 : index
    %c0_182 = arith.constant 0 : index
    %581 = vector.load %arg12[%c14_181, %c0_182] : memref<16x16xf32, #tpu.memory_space<vmem>>, vector<1x16xf32>
    tpu.vector_store %arg12[%c14_181, %c0_182], %580 {strides = array<i32>} : memref<16x16xf32, #tpu.memory_space<vmem>>, vector<1x16xf32>,
    %582 = vector.extract_strided_slice %551 {offsets = [15, 0], sizes = [1, 16], strides = [1, 1]} : vector<16x16xf32> to vector<1x16xf32>
    %c15_183 = arith.constant 15 : index
    %c0_184 = arith.constant 0 : index
    %583 = vector.load %arg12[%c15_183, %c0_184] : memref<16x16xf32, #tpu.memory_space<vmem>>, vector<1x16xf32>
    tpu.vector_store %arg12[%c15_183, %c0_184], %582 {strides = array<i32>} : memref<16x16xf32, #tpu.memory_space<vmem>>, vector<1x16xf32>,
    return
  }
}

</mosaic_0001>

<bundles_post_ra>
// kernel: dyn_lstm_forward.1
= control target key start
LH: loop header
LB: loop body
LE: loop exit
PB: predicated region body
PF: predicated region fallthrough
CT: control target
= control target key end

     0   :  { %17 = vsyncpa [#allocation5], 0  ;;  %s3212_s0 = inlined_call_operand.vmem [shape: f32[16,16], index: 0, kind: input, shape index: {}]   ;;  %s3213_s1 = inlined_call_operand.hbm [shape: f32[16,128], index: 1, kind: input, shape index: {}]   ;;  %s3214_s2 = inlined_call_operand.vmem [shape: f32[32,128], index: 2, kind: input, shape index: {}]   ;;  %s3215_s3 = inlined_call_operand.vmem [shape: f32[1,128], index: 3, kind: input, shape index: {}]   ;;  %s3216_s4 = inlined_call_operand.hbm [shape: f32[32,128], index: 4, kind: input, shape index: {}]   ;;  %s3217_s5 = inlined_call_operand.hbm [shape: f32[32,128], index: 5, kind: input, shape index: {}]   ;;  %s3218_s6 = inlined_call_operand.vmem [shape: f32[1,128], index: 6, kind: input, shape index: {}]   ;;  %s3219_s7 = inlined_call_operand.hbm [shape: f32[32,128], index: 7, kind: input, shape index: {}]   ;;  %s3220_s8 = inlined_call_operand.hbm [shape: f32[32,128], index: 8, kind: input, shape index: {}]   ;;  %s3221_s9 = inlined_call_operand.vmem [shape: f32[1,128], index: 9, kind: input, shape index: {}]   ;;  %s3222_s10 = inlined_call_operand.vmem [shape: f32[32,16], index: 10, kind: input, shape index: {}]   ;;  %s3223_s11 = inlined_call_operand.vmem [shape: f32[1,16], index: 11, kind: input, shape index: {}]   ;;  %s3224_s12 = inlined_call_operand.hbm [shape: f32[16,16], index: 12, kind: output, shape index: {}]  }
   0x1   :  { %18 = vsyncpa [#allocation8], 0 }
   0x2   :  { %19 = vsyncpa [#allocation11], 0 }
   0x3   :  { %20 = vsyncpa [#allocation6], 0  ;;  %s44_s23 = sshll.u32 %s3216_s4, 4  ;;  %s2515_s24 = smov [#allocation7]   ;;  %s45_s23 = int_to_ptr.hbm [resolvable:$true] %s44_s23 }
   0x4   :  { %s46_s25 = sshll.u32 %s2515_s24, 4  ;;  %s72_s28 = sshll.u32 %s3219_s7, 4  ;;  %s47_s25 = int_to_ptr.vmem [resolvable:$true] %s46_s25  ;;  %s73_s28 = int_to_ptr.hbm [resolvable:$true] %s72_s28 }
   0x5   :  { %s2516_s29 = smov 128   ;;  %s2517_s30 = smov 8  }
   0x6   :  { %52 = dma.hbm_to_vmem [thread:$0]  %s45_s23, 512, %s47_s25, [#allocation8], %s2516_s29, %s2516_s29, %s2517_s30  }
   0x7   :  { %s2518_s13 = smov [#allocation10]   ;;  %s27_s4 = sshll.u32 %s3213_s1, 4  ;;  %s28_s4 = int_to_ptr.hbm [resolvable:$true] %s27_s4 }
   0x8   :  { %s74_s14 = sshll.u32 %s2518_s13, 4  ;;  %s57_s18 = sshll.u32 %s3217_s5, 4  ;;  %s75_s14 = int_to_ptr.vmem [resolvable:$true] %s74_s14  ;;  %s58_s18 = int_to_ptr.hbm [resolvable:$true] %s57_s18 }
   0x9   :  { %80 = dma.hbm_to_vmem [thread:$0]  %s73_s28, 512, %s75_s14, [#allocation11], %s2516_s29, %s2516_s29, %s2517_s30  }
   0xa   :  { %s2519_s19 = smov [#allocation4]   ;;  %s2520_s21 = smov [#allocation9]  }
   0xb   :  { %s29_s20 = sshll.u32 %s2519_s19, 4  ;;  %s59_s1 = sshll.u32 %s2520_s21, 4  ;;  %s30_s20 = int_to_ptr.vmem [resolvable:$true] %s29_s20  ;;  %s60_s1 = int_to_ptr.vmem [resolvable:$true] %s59_s1 }
   0xc   :  { %35 = dma.hbm_to_vmem [thread:$0]  %s28_s4, 256, %s30_s20, [#allocation5], %s2516_s29, %s2516_s29, %s2517_s30  }
   0xd   :  { %s85_s24 = sshll.u32 %s3220_s8, 4  ;;  %s2521_s5 = smov [#allocation12]   ;;  %s86_s24 = int_to_ptr.hbm [resolvable:$true] %s85_s24 }
   0xe   :  { %65 = dma.hbm_to_vmem [thread:$0]  %s58_s18, 512, %s60_s1, [#allocation8], %s2516_s29, %s2516_s29, %s2517_s30  }
   0xf   :  { %s87_s25 = sshll.u32 %s2521_s5, 4  ;;  %s88_s25 = int_to_ptr.vmem [resolvable:$true] %s87_s25 }
  0x10   :  { %93 = dma.hbm_to_vmem [thread:$0]  %s86_s24, 512, %s88_s25, [#allocation11], %s2516_s29, %s2516_s29, %s2517_s30  }
  0x11   :  { %2507 = dma.done.wait [#allocation5], 256  }
  0x12   :  { %2508 = vsyncadd [#allocation5], 4294967040 }
  0x13   :  { %2509 = dma.done.wait [#allocation8], 1024  }
  0x14   :  { %2510 = vsyncadd [#allocation8], 4294966272 }
  0x15   :  { %2511 = dma.done.wait [#allocation11], 1024  }
  0x16   :  { %2512 = vsyncadd [#allocation11], 4294966272  ;;  %vm122_vm0 = vcmask 122880   ;;  %v2624_v0 = vld [vmem:[%s3214_s2 + $0x18] sm:$0xff]  ;;  %v154_v1 = vld [vmem:[#allocation4 + $0x8] sm:$0xff]  ;;  %vm125_vm1 = vcmask 123905   ;;  %v146_v18 = vlaneseq }
  0x17   :  { %v2629_v2 = vld [vmem:[%s3214_s2 + $0x10] sm:$0xff]  ;;  %209 = vmatpush.msra.mxu1 %v2624_v0  ;;  %184 = vmatpush.msra.mxu0 %v154_v1  ;;  %v153_v3 = vld [vmem:[#allocation4] sm:$0xff]  ;;  %v2640_v5 = vld [vmem:[%s3214_s2 + $0x8] sm:$0xff]  ;;  %vm128_vm2 = vcmask 124930   ;;  %vm3227_vm3 = vcmask 125955   ;;  %v2522_v8 = vmov 0.0  }
  0x18   :  { %v2635_v4 = vld [vmem:[%s3212_s0] sm:$0xff]  ;;  %v2645_v6 = vld [vmem:[%s3212_s0 + $0x8] sm:$0xff]  ;;  %276 = vmatpush.msra.mxu3 %v2624_v0  ;;  %504 = vmatpush.msra.mxu2 %v2624_v0  ;;  %vm163_vm4 = vcmask 130048   ;;  %v147_v20 = vand.u32 127, %v146_v18  ;;  %s2524_s19 = smov 32   ;;  %vm260_vm12 = vcmask 254976  }
  0x19   :  { %123 = vst.msk [vmem:[#allocation2] sm:$0x1] %vm122_vm0, %v2635_v4  ;;  %210 = vmatpush.msra.mxu1 %v2629_v2  ;;  %185 = vmatpush.msra.mxu0 %v153_v3  ;;  %v2657_v7 = vld [vmem:[%s3214_s2] sm:$0xff]  ;;  %vm193_vm13 = vcmask 261120   ;;  %s2088_s15 = sshll.u32 %s3224_s12, 4  ;;  %s2089_s15 = int_to_ptr.hbm [resolvable:$true] %s2088_s15 }
  0x1a   :  { %124 = vst.msk [vmem:[#allocation2 + $0x1] sm:$0x1] %vm122_vm0, %v2645_v6  ;;  %277 = vmatpush.msra.mxu3 %v2629_v2  ;;  %505 = vmatpush.msra.mxu2 %v2629_v2  ;;  %v2700_v10 = vld [vmem:[%s3215_s3] ss:$0 sm:$0xff]  ;;  %vm148_vm5 = vcmp.ge.s32.totalorder %v147_v20, 64  ;;  %vm149_vm6 = vcmp.lt.s32.totalorder %v147_v20, 96 }
  0x1b   :  { %126 = vst.msk [vmem:[#allocation2 + $0x1] sm:$0x2] %vm125_vm1, %v2635_v4  ;;  %211 = vmatpush.msra.mxu1 %v2640_v5  ;;  %648 = vmatpush.msrb.mxu0 %v2624_v0  ;;  %vm2706_vm8 = vmand %vm148_vm5, %vm149_vm6  ;;  %s2523_s3 = smov 64  }
  0x1c   :  { %127 = vst.msk [vmem:[#allocation2 + $0x2] sm:$0x2] %vm125_vm1, %v2645_v6  ;;  %278 = vmatpush.msra.mxu3 %v2640_v5  ;;  %506 = vmatpush.msra.mxu2 %v2640_v5 }
  0x1d   :  { %129 = vst.msk [vmem:[#allocation2 + $0x2] sm:$0x4] %vm128_vm2, %v2635_v4  ;;  %212 = vmatpush.msra.mxu1 %v2657_v7  ;;  %649 = vmatpush.msrb.mxu0 %v2629_v2 }
  0x1e   :  { %130 = vst.msk [vmem:[#allocation2 + $0x3] sm:$0x4] %vm128_vm2, %v2645_v6  ;;  %213 = vmatmul.f32.vlgmr.msra.gmra.mxu1 %v2522_v8  ;;  %279 = vmatpush.msra.mxu3 %v2657_v7 }
  0x1f   :  { %132 = vst.msk [vmem:[#allocation2 + $0x3] sm:$0x8] %vm3227_vm3, %v2635_v4  ;;  %428 = vmatpush.msrb.mxu1 %v2624_v0  ;;  %507 = vmatpush.msra.mxu2 %v2657_v7 }
  0x20   :  { %133 = vst.msk [vmem:[#allocation2 + $0x4] sm:$0x8] %vm3227_vm3, %v2645_v6  ;;  %352 = vmatpush.msrb.mxu3 %v2624_v0  ;;  %650 = vmatpush.msrb.mxu0 %v2640_v5 }
  0x21   :  { %429 = vmatpush.msrb.mxu1 %v2629_v2 }
  0x22   :  { %353 = vmatpush.msrb.mxu3 %v2629_v2  ;;  %651 = vmatpush.msrb.mxu0 %v2657_v7 }
  0x23   :  { %430 = vmatpush.msrb.mxu1 %v2640_v5 }
  0x24   :  { %354 = vmatpush.msrb.mxu3 %v2640_v5 }
  0x25   :  { %431 = vmatpush.msrb.mxu1 %v2657_v7 }
  0x26   :  { %355 = vmatpush.msrb.mxu3 %v2657_v7 }
  0x27   :  { %v151_v9 = vld [vmem:[#allocation2] sm:$0xff]  ;;  %723 = vmatpush.msra.mxu1 %v2624_v0 }
  0x28   :  { %2103 = vmatmul.msk.f32.vlgmr.msra.gmra.mxu0 %vm163_vm4, %v151_v9 }
  0x29   :  { %724 = vmatpush.msra.mxu1 %v2629_v2 }
  0x2b   :  { %725 = vmatpush.msra.mxu1 %v2640_v5 }
  0x2d   :  { %726 = vmatpush.msra.mxu1 %v2657_v7 }
  0x9b   :  { %v214_v12 = vpop.f32.mrf.mxu1 }
  0xa5   :  { %v187_v11 = vpop.f32.mrf.mxu0 }
  0xa6   :  { %v2703_v13 = vadd.f32 %v2700_v10, %v187_v11 }
  0xa8   :  { %v217_v14 = vadd.f32 %v214_v12, %v2703_v13 }
  0xaa   :  { %v2105_v15 = vmul.f32 -1.442695, %v217_v14 }
  0xac   :  { %2171 = vpow2.f32 %v2105_v15 }
  0xb2   :  { %v2172_v16 = vpop.eup %2171 }
  0xb3   :  { %v222_v17 = vadd.f32 1.0, %v2172_v16 }
  0xb5   :  { %2173 = vrcp.f32 %v222_v17  ;;  %v234_v23 = vand.u32 2147483648, %v222_v17  ;;  %v232_v25 = vand.u32 2147483647, %v222_v17  ;;  %vm228_vm9 = vweird.f32 %v222_v17 }
  0xb6   :  { %2175 = vtanh.f32 %v217_v14 }
  0xb7   :  { %v235_v28 = vor.u32 1.1754944e-38, %v234_v23  ;;  %vm233_vm11 = vcmp.eq.f32.partialorder %v232_v25, 8.507059e+37 }
  0xbb   :  { %v2174_v19 = vpop.eup %2173 }
  0xbc   :  { %v224_v21 = vmul.f32 %v2174_v19, %v222_v17  ;;  %vm229_vm7 = vweird.f32 %v2174_v19  ;;  %v2176_v30 = vpop.eup %2175 }
  0xbd   :  { %vm230_vm10 = vmor %vm228_vm9, %vm229_vm7 }
  0xbe   :  { %v225_v22 = vsub.f32 1.0, %v224_v21 }
  0xc0   :  { %v226_v24 = vmul.f32 %v2174_v19, %v225_v22 }
  0xc2   :  { %v227_v27 = vadd.f32 %v2174_v19, %v226_v24 }
  0xc4   :  { %v231_v29 = vsel %vm230_vm10, %v2174_v19, %v227_v27 }
  0xc5   :  { %v236_v31 = vsel %vm233_vm11, %v235_v28, %v231_v29 }
  0xc6   :  { %v238_v32 = vsel %vm2706_vm8, %v2176_v30, %v236_v31 }
  0xc7   :  { %241 = vrot.lane.b32.xlu0 %v238_v32, %s2523_s3  ;;  %v239_v35 = vmul.f32 0.0, %v238_v32 }
 0x139   :  { %v242_v33 = vpop.permute.xlu0 %241 }
 0x13a   :  { %v244_v34 = vmul.f32 %v242_v33, %v238_v32 }
 0x13c   :  { %246 = vrot.lane.b32.xlu0 %v244_v34, %s2524_s19 }
 0x1ae   :  { %v247_v36 = vpop.permute.xlu0 %246 }
 0x1af   :  { %v249_v37 = vadd.f32 %v247_v36, %v239_v35 }
 0x1b1   :  { %2177 = vtanh.f32 %v249_v37  ;;  %v310_v62 = vrot.slane %v249_v37, 6 }
 0x1b7   :  { %v2178_v38 = vpop.eup %2177 }
 0x1b8   :  { %252 = vrot.lane.b32.xlu1 %v2178_v38, %s2523_s3 }
 0x22a   :  { %v253_v39 = vpop.permute.xlu1 %252 }
 0x22b   :  { %v255_v40 = vmul.f32 %v253_v39, %v238_v32 }
 0x22d   :  { %257 = vrot.lane.b32.xlu1 %v255_v40, %s2524_s19 }
 0x29f   :  { %v258_v41 = vpop.permute.xlu1 %257 }
 0x2a0   :  { %261 = vst.msk [vmem:[#allocation3] sm:$0x3] %vm260_vm12, %v258_v41  ;;  %2106 = vmatmul.msk.f32.vlgmr.msra.gmra.mxu3 %vm193_vm13, %v258_v41 }
 0x2a1   :  { %573 = vmatpush.msra.mxu3 %v2624_v0 }
 0x2a3   :  { %574 = vmatpush.msra.mxu3 %v2629_v2 }
 0x2a5   :  { %575 = vmatpush.msra.mxu3 %v2640_v5 }
 0x2a7   :  { %576 = vmatpush.msra.mxu3 %v2657_v7 }
 0x323   :  { %v281_v42 = vpop.f32.mrf.mxu3 }
 0x324   :  { %v285_v43 = vrot.slane %v281_v42, 6 }
 0x326   :  { %v287_v44 = vadd.f32 %v285_v43, %v2703_v13 }
 0x328   :  { %v2107_v45 = vmul.f32 -1.442695, %v287_v44 }
 0x32a   :  { %2179 = vpow2.f32 %v2107_v45 }
 0x330   :  { %v2180_v46 = vpop.eup %2179 }
 0x331   :  { %v292_v47 = vadd.f32 1.0, %v2180_v46 }
 0x333   :  { %2181 = vrcp.f32 %v292_v47  ;;  %v304_v51 = vand.u32 2147483648, %v292_v47  ;;  %v302_v53 = vand.u32 2147483647, %v292_v47  ;;  %vm298_vm15 = vweird.f32 %v292_v47 }
 0x334   :  { %2183 = vtanh.f32 %v287_v44 }
 0x335   :  { %v305_v55 = vor.u32 1.1754944e-38, %v304_v51  ;;  %vm303_vm6 = vcmp.eq.f32.partialorder %v302_v53, 8.507059e+37 }
 0x339   :  { %v2182_v48 = vpop.eup %2181 }
 0x33a   :  { %v294_v49 = vmul.f32 %v2182_v48, %v292_v47  ;;  %vm299_vm14 = vweird.f32 %v2182_v48  ;;  %v2184_v57 = vpop.eup %2183 }
 0x33b   :  { %vm300_vm5 = vmor %vm298_vm15, %vm299_vm14 }
 0x33c   :  { %v295_v50 = vsub.f32 1.0, %v294_v49 }
 0x33e   :  { %v296_v52 = vmul.f32 %v2182_v48, %v295_v50 }
 0x340   :  { %v297_v54 = vadd.f32 %v2182_v48, %v296_v52 }
 0x342   :  { %v301_v56 = vsel %vm300_vm5, %v2182_v48, %v297_v54 }
 0x343   :  { %v306_v58 = vsel %vm303_vm6, %v305_v55, %v301_v56 }
 0x344   :  { %v308_v59 = vsel %vm2706_vm8, %v2184_v57, %v306_v58 }
 0x345   :  { %314 = vrot.lane.b32.xlu2 %v308_v59, %s2523_s3  ;;  %v312_v63 = vmul.f32 %v310_v62, %v308_v59 }
 0x39f   :  { %v315_v60 = vpop.permute.xlu2 %314 }
 0x3a0   :  { %v317_v61 = vmul.f32 %v315_v60, %v308_v59 }
 0x3a2   :  { %319 = vrot.lane.b32.xlu2 %v317_v61, %s2524_s19 }
 0x3fc   :  { %v320_v0 = vpop.permute.xlu2 %319 }
 0x3fd   :  { %v322_v1 = vadd.f32 %v320_v0, %v312_v63 }
 0x3ff   :  { %2185 = vtanh.f32 %v322_v1  ;;  %v386_v33 = vrot.slane %v322_v1, 6 }
 0x405   :  { %v2186_v2 = vpop.eup %2185 }
 0x406   :  { %325 = vrot.lane.b32.xlu0 %v2186_v2, %s2523_s3 }
 0x478   :  { %v326_v3 = vpop.permute.xlu0 %325 }
 0x479   :  { %v2728_v5 = vmul.f32 %v326_v3, %v308_v59 }
 0x47b   :  { %v335_v7 = vrot.slane %v2728_v5, 2 }
 0x47d   :  { %336 = vrot.lane.b32.xlu1 %v335_v7, %s2524_s19 }
 0x4ef   :  { %v337_v9 = vpop.permute.xlu1 %336 }
 0x4f0   :  { %2108 = vmatmul.msk.f32.vlgmr.msrb.gmra.mxu3 %vm193_vm13, %v337_v9 }
 0x573   :  { %v357_v11 = vpop.f32.mrf.mxu3 }
 0x574   :  { %v361_v12 = vrot.slane %v357_v11, 4 }
 0x576   :  { %v363_v14 = vadd.f32 %v361_v12, %v2703_v13 }
 0x578   :  { %v2109_v15 = vmul.f32 -1.442695, %v363_v14 }
 0x57a   :  { %2187 = vpow2.f32 %v2109_v15 }
 0x580   :  { %v2188_v16 = vpop.eup %2187 }
 0x581   :  { %v368_v17 = vadd.f32 1.0, %v2188_v16 }
 0x583   :  { %2189 = vrcp.f32 %v368_v17  ;;  %v380_v21 = vand.u32 2147483648, %v368_v17  ;;  %v378_v23 = vand.u32 2147483647, %v368_v17  ;;  %vm374_vm9 = vweird.f32 %v368_v17 }
 0x584   :  { %2191 = vtanh.f32 %v363_v14 }
 0x585   :  { %v381_v25 = vor.u32 1.1754944e-38, %v380_v21  ;;  %vm379_vm11 = vcmp.eq.f32.partialorder %v378_v23, 8.507059e+37 }
 0x589   :  { %v2190_v18 = vpop.eup %2189 }
 0x58a   :  { %v370_v19 = vmul.f32 %v2190_v18, %v368_v17  ;;  %vm375_vm7 = vweird.f32 %v2190_v18  ;;  %v2192_v28 = vpop.eup %2191 }
 0x58b   :  { %vm376_vm10 = vmor %vm374_vm9, %vm375_vm7  ;;  %vm134_vm7 = vcmask 126980   ;;  %vm3226_vm9 = vcmask 128005  }
 0x58c   :  { %v371_v20 = vsub.f32 1.0, %v370_v19  ;;  %135 = vst.msk [vmem:[#allocation2 + $0x4] sm:$0x10] %vm134_vm7, %v2635_v4 }
 0x58d   :  { %136 = vst.msk [vmem:[#allocation2 + $0x5] sm:$0x10] %vm134_vm7, %v2645_v6 }
 0x58e   :  { %v372_v22 = vmul.f32 %v2190_v18, %v371_v20  ;;  %138 = vst.msk [vmem:[#allocation2 + $0x5] sm:$0x20] %vm3226_vm9, %v2635_v4 }
 0x58f   :  { %139 = vst.msk [vmem:[#allocation2 + $0x6] sm:$0x20] %vm3226_vm9, %v2645_v6 }
 0x590   :  { %v373_v24 = vadd.f32 %v2190_v18, %v372_v22 }
 0x592   :  { %v377_v27 = vsel %vm376_vm10, %v2190_v18, %v373_v24  ;;  %vm140_vm10 = vcmask 129030  }
 0x593   :  { %v382_v29 = vsel %vm379_vm11, %v381_v25, %v377_v27  ;;  %vm3225_vm11 = vcmask 130055   ;;  %141 = vst.msk [vmem:[#allocation2 + $0x6] sm:$0x40] %vm140_vm10, %v2635_v4 }
 0x594   :  { %v384_v30 = vsel %vm2706_vm8, %v2192_v28, %v382_v29  ;;  %142 = vst.msk [vmem:[#allocation2 + $0x7] sm:$0x40] %vm140_vm10, %v2645_v6 }
 0x595   :  { %390 = vrot.lane.b32.xlu2 %v384_v30, %s2523_s3  ;;  %v388_v34 = vmul.f32 %v386_v33, %v384_v30  ;;  %144 = vst.msk [vmem:[#allocation2 + $0x7] sm:$0x80] %vm3225_vm11, %v2635_v4 }
 0x596   :  { %145 = vst.msk [vmem:[#allocation2 + $0x8] sm:$0x80] %vm3225_vm11, %v2645_v6 }
 0x59d   :  { %v152_v9 = vld [vmem:[#allocation2 + $0x8] sm:$0xff] }
 0x59e   :  { %2104 = vmatmul.msk.f32.gmra.mxu0 %vm163_vm4, %v152_v9 }
 0x5ef   :  { %v391_v31 = vpop.permute.xlu2 %390 }
 0x5f0   :  { %v393_v32 = vmul.f32 %v391_v31, %v384_v30 }
 0x5f2   :  { %395 = vrot.lane.b32.xlu0 %v393_v32, %s2524_s19 }
 0x61b   :  { %v190_v12 = vpop.f32.mrf.mxu0 }
 0x61c   :  { %v2773_v14 = vadd.f32 %v2700_v10, %v190_v12 }
 0x664   :  { %v396_v35 = vpop.permute.xlu0 %395 }
 0x665   :  { %v398_v36 = vadd.f32 %v396_v35, %v388_v34 }
 0x667   :  { %2193 = vtanh.f32 %v398_v36  ;;  %v462_v61 = vrot.slane %v398_v36, 6 }
 0x66d   :  { %v2194_v37 = vpop.eup %2193 }
 0x66e   :  { %401 = vrot.lane.b32.xlu1 %v2194_v37, %s2523_s3 }
 0x6e0   :  { %v402_v38 = vpop.permute.xlu1 %401 }
 0x6e1   :  { %v2739_v39 = vmul.f32 %v402_v38, %v384_v30 }
 0x6e3   :  { %v411_v40 = vrot.slane %v2739_v39, 4 }
 0x6e5   :  { %412 = vrot.lane.b32.xlu2 %v411_v40, %s2524_s19 }
 0x73f   :  { %v413_v41 = vpop.permute.xlu2 %412 }
 0x740   :  { %2110 = vmatmul.msk.f32.vlgmr.msrb.gmra.mxu1 %vm193_vm13, %v413_v41  ;;  %v786_v41 = vld [vmem:[#allocation7 + $0x18] sm:$0xff] }
 0x741   :  { %813 = vmatpush.msrb.mxu2 %v786_v41 }
 0x7bd   :  { %v433_v42 = vpop.f32.mrf.mxu1 }
 0x7be   :  { %v437_v43 = vrot.slane %v433_v42, 2  ;;  %v785_v42 = vld [vmem:[#allocation7 + $0x10] sm:$0xff] }
 0x7bf   :  { %814 = vmatpush.msrb.mxu2 %v785_v42 }
 0x7c0   :  { %v439_v44 = vadd.f32 %v437_v43, %v2703_v13  ;;  %v2793_v43 = vld [vmem:[#allocation9 + $0x18] sm:$0xff] }
 0x7c1   :  { %836 = vmatpush.msrb.mxu3 %v2793_v43  ;;  %902 = vmatpush.msra.mxu0 %v2793_v43 }
 0x7c2   :  { %v2111_v45 = vmul.f32 -1.442695, %v439_v44  ;;  %977 = vmatpush.msrb.mxu1 %v2793_v43 }
 0x7c4   :  { %2195 = vpow2.f32 %v2111_v45  ;;  %v2798_v45 = vld [vmem:[#allocation9 + $0x8] sm:$0xff] }
 0x7ca   :  { %v2196_v46 = vpop.eup %2195 }
 0x7cb   :  { %v444_v47 = vadd.f32 1.0, %v2196_v46  ;;  %v783_v46 = vld [vmem:[#allocation7] sm:$0xff] }
 0x7cd   :  { %2197 = vrcp.f32 %v444_v47  ;;  %v456_v51 = vand.u32 2147483648, %v444_v47  ;;  %v454_v53 = vand.u32 2147483647, %v444_v47  ;;  %vm450_vm15 = vweird.f32 %v444_v47 }
 0x7ce   :  { %2199 = vtanh.f32 %v439_v44  ;;  %v2796_v44 = vld [vmem:[#allocation9 + $0x10] sm:$0xff] }
 0x7cf   :  { %v457_v55 = vor.u32 1.1754944e-38, %v456_v51  ;;  %vm455_vm6 = vcmp.eq.f32.partialorder %v454_v53, 8.507059e+37  ;;  %837 = vmatpush.msrb.mxu3 %v2796_v44  ;;  %903 = vmatpush.msra.mxu0 %v2796_v44 }
 0x7d0   :  { %978 = vmatpush.msrb.mxu1 %v2796_v44 }
 0x7d1   :  { %838 = vmatpush.msrb.mxu3 %v2798_v45  ;;  %904 = vmatpush.msra.mxu0 %v2798_v45 }
 0x7d2   :  { %979 = vmatpush.msrb.mxu1 %v2798_v45 }
 0x7d3   :  { %v2198_v48 = vpop.eup %2197 }
 0x7d4   :  { %v446_v49 = vmul.f32 %v2198_v48, %v444_v47  ;;  %vm451_vm14 = vweird.f32 %v2198_v48  ;;  %v2200_v13 = vpop.eup %2199  ;;  %v2808_v47 = vld [vmem:[#allocation9] sm:$0xff] }
 0x7d5   :  { %vm452_vm5 = vmor %vm450_vm15, %vm451_vm14  ;;  %839 = vmatpush.msrb.mxu3 %v2808_v47  ;;  %905 = vmatpush.msra.mxu0 %v2808_v47 }
 0x7d6   :  { %v447_v50 = vsub.f32 1.0, %v446_v49  ;;  %980 = vmatpush.msrb.mxu1 %v2808_v47 }
 0x7d8   :  { %v448_v52 = vmul.f32 %v2198_v48, %v447_v50 }
 0x7da   :  { %v449_v54 = vadd.f32 %v2198_v48, %v448_v52 }
 0x7dc   :  { %v453_v56 = vsel %vm452_vm5, %v2198_v48, %v449_v54 }
 0x7dd   :  { %v458_v57 = vsel %vm455_vm6, %v457_v55, %v453_v56  ;;  %vm333_vm6 = vcmask 257026   ;;  %v2834_v56 = vld [vmem:[%s3218_s6] ss:$0 sm:$0xff] }
 0x7de   :  { %v460_v58 = vsel %vm2706_vm8, %v2200_v13, %v458_v57 }
 0x7df   :  { %466 = vrot.lane.b32.xlu0 %v460_v58, %s2523_s3  ;;  %v464_v62 = vmul.f32 %v462_v61, %v460_v58 }
 0x851   :  { %v467_v59 = vpop.permute.xlu0 %466 }
 0x852   :  { %v469_v60 = vmul.f32 %v467_v59, %v460_v58 }
 0x854   :  { %471 = vrot.lane.b32.xlu1 %v469_v60, %s2524_s19 }
 0x8c6   :  { %v472_v63 = vpop.permute.xlu1 %471 }
 0x8c7   :  { %v474_v0 = vadd.f32 %v472_v63, %v464_v62 }
 0x8c9   :  { %2201 = vtanh.f32 %v474_v0  ;;  %v535_v32 = vrot.slane %v474_v0, 6 }
 0x8cf   :  { %v2202_v1 = vpop.eup %2201 }
 0x8d0   :  { %477 = vrot.lane.b32.xlu2 %v2202_v1, %s2523_s3 }
 0x92a   :  { %v478_v2 = vpop.permute.xlu2 %477 }
 0x92b   :  { %v2750_v3 = vmul.f32 %v478_v2, %v460_v58 }
 0x92d   :  { %v487_v7 = vrot.slane %v2750_v3, 6 }
 0x92f   :  { %488 = vrot.lane.b32.xlu0 %v487_v7, %s2524_s19 }
 0x9a1   :  { %v489_v11 = vpop.permute.xlu0 %488 }
 0x9a2   :  { %2112 = vmatmul.msk.f32.vlgmr.msra.gmra.mxu2 %vm193_vm13, %v489_v11 }
 0xa25   :  { %v509_v15 = vpop.f32.mrf.mxu2 }
 0xa26   :  { %v512_v16 = vadd.f32 %v509_v15, %v2773_v14 }
 0xa28   :  { %v2113_v17 = vmul.f32 -1.442695, %v512_v16 }
 0xa2a   :  { %2203 = vpow2.f32 %v2113_v17 }
 0xa30   :  { %v2204_v18 = vpop.eup %2203 }
 0xa31   :  { %v517_v4 = vadd.f32 1.0, %v2204_v18 }
 0xa33   :  { %2205 = vrcp.f32 %v517_v4  ;;  %v529_v21 = vand.u32 2147483648, %v517_v4  ;;  %v527_v23 = vand.u32 2147483647, %v517_v4  ;;  %vm523_vm14 = vweird.f32 %v517_v4 }
 0xa34   :  { %2207 = vtanh.f32 %v512_v16 }
 0xa35   :  { %v530_v10 = vor.u32 1.1754944e-38, %v529_v21  ;;  %vm528_vm5 = vcmp.eq.f32.partialorder %v527_v23, 8.507059e+37 }
 0xa39   :  { %v2206_v19 = vpop.eup %2205 }
 0xa3a   :  { %v519_v6 = vmul.f32 %v2206_v19, %v517_v4  ;;  %vm524_vm4 = vweird.f32 %v2206_v19  ;;  %v2208_v27 = vpop.eup %2207 }
 0xa3b   :  { %vm525_vm15 = vmor %vm523_vm14, %vm524_vm4  ;;  %vm409_vm4 = vcmask 259076   ;;  %vm485_vm14 = vcmask 261126  }
 0xa3c   :  { %v520_v20 = vsub.f32 1.0, %v519_v6 }
 0xa3e   :  { %v521_v22 = vmul.f32 %v2206_v19, %v520_v20 }
 0xa40   :  { %v522_v24 = vadd.f32 %v2206_v19, %v521_v22 }
 0xa42   :  { %v526_v25 = vsel %vm525_vm15, %v2206_v19, %v522_v24 }
 0xa43   :  { %v531_v28 = vsel %vm528_vm5, %v530_v10, %v526_v25 }
 0xa44   :  { %v533_v29 = vsel %vm2706_vm8, %v2208_v27, %v531_v28 }
 0xa45   :  { %539 = vrot.lane.b32.xlu1 %v533_v29, %s2523_s3  ;;  %v537_v33 = vmul.f32 %v535_v32, %v533_v29 }
 0xab7   :  { %v540_v30 = vpop.permute.xlu1 %539 }
 0xab8   :  { %v542_v31 = vmul.f32 %v540_v30, %v533_v29 }
 0xaba   :  { %544 = vrot.lane.b32.xlu2 %v542_v31, %s2524_s19 }
 0xac2   :  { %330 = vrot.lane.b32.xlu2 %v2728_v5, %s2524_s19 }
 0xb14   :  { %v545_v34 = vpop.permute.xlu2 %544 }
 0xb15   :  { %v2782_v35 = vadd.f32 %v545_v34, %v537_v33 }
 0xb17   :  { %2209 = vtanh.f32 %v2782_v35  ;;  %v607_v33 = vrot.slane %v2782_v35, 6 }
 0xb1c   :  { %v331_v36 = vpop.permute.xlu2 %330 }
 0xb1d   :  { %v2210_v37 = vpop.eup %2209  ;;  %334 = vst.msk [vmem:[#allocation3] sm:$0xc] %vm333_vm6, %v331_v36 }
 0xb1e   :  { %550 = vrot.lane.b32.xlu0 %v2210_v37, %s2523_s3 }
 0xb26   :  { %406 = vrot.lane.b32.xlu0 %v2739_v39, %s2524_s19  ;;  %v784_v39 = vld [vmem:[#allocation7 + $0x8] sm:$0xff] }
 0xb27   :  { %815 = vmatpush.msrb.mxu2 %v784_v39 }
 0xb29   :  { %816 = vmatpush.msrb.mxu2 %v783_v46 }
 0xb2b   :  { %1271 = vmatpush.msra.mxu2 %v2793_v43 }
 0xb2d   :  { %1272 = vmatpush.msra.mxu2 %v2796_v44 }
 0xb2f   :  { %1273 = vmatpush.msra.mxu2 %v2798_v45 }
 0xb31   :  { %1274 = vmatpush.msra.mxu2 %v2808_v47 }
 0xb90   :  { %v551_v38 = vpop.permute.xlu0 %550 }
 0xb91   :  { %v553_v40 = vmul.f32 %v551_v38, %v533_v29 }
 0xb93   :  { %555 = vrot.lane.b32.xlu1 %v553_v40, %s2524_s19 }
 0xb98   :  { %v407_v5 = vpop.permute.xlu0 %406 }
 0xb99   :  { %410 = vst.msk [vmem:[#allocation3] sm:$0x30] %vm409_vm4, %v407_v5 }
 0xb9b   :  { %482 = vrot.lane.b32.xlu1 %v2750_v3, %s2524_s19 }
 0xc05   :  { %v556_v48 = vpop.permute.xlu1 %555 }
 0xc06   :  { %558 = vst.msk [vmem:[#allocation3 + $0x8] sm:$0x3] %vm260_vm12, %v556_v48  ;;  %2114 = vmatmul.msk.f32.vlgmr.msra.gmra.mxu3 %vm193_vm13, %v556_v48 }
 0xc07   :  { %1052 = vmatpush.msra.mxu3 %v2793_v43 }
 0xc09   :  { %1053 = vmatpush.msra.mxu3 %v2796_v44 }
 0xc0b   :  { %1054 = vmatpush.msra.mxu3 %v2798_v45 }
 0xc0d   :  { %v483_v49 = vpop.permute.xlu1 %482  ;;  %1055 = vmatpush.msra.mxu3 %v2808_v47 }
 0xc0e   :  { %486 = vst.msk [vmem:[#allocation3] sm:$0xc0] %vm485_vm14, %v483_v49  ;;  %840 = vmatmul.f32.vlgmr.msrb.gmra.mxu3 %v2522_v8 }
 0xc0f   :  { %1346 = vmatpush.msrb.mxu3 %v2793_v43 }
 0xc11   :  { %1347 = vmatpush.msrb.mxu3 %v2796_v44 }
 0xc13   :  { %1348 = vmatpush.msrb.mxu3 %v2798_v45 }
 0xc15   :  { %v781_v50 = vld [vmem:[#allocation3] sm:$0xff]  ;;  %1349 = vmatpush.msrb.mxu3 %v2808_v47 }
 0xc16   :  { %2120 = vmatmul.msk.f32.vlgmr.msrb.gmra.mxu2 %vm193_vm13, %v781_v50 }
 0xc89   :  { %v578_v51 = vpop.f32.mrf.mxu3 }
 0xc8a   :  { %v582_v52 = vrot.slane %v578_v51, 6 }
 0xc8c   :  { %v584_v53 = vadd.f32 %v582_v52, %v2773_v14 }
 0xc8e   :  { %v2115_v54 = vmul.f32 -1.442695, %v584_v53 }
 0xc90   :  { %2211 = vpow2.f32 %v2115_v54 }
 0xc91   :  { %v841_v58 = vpop.f32.mrf.mxu3 }
 0xc96   :  { %v2212_v55 = vpop.eup %2211 }
 0xc97   :  { %v589_v13 = vadd.f32 1.0, %v2212_v55 }
 0xc99   :  { %2213 = vrcp.f32 %v589_v13  ;;  %v818_v57 = vpop.f32.mrf.mxu2  ;;  %v601_v1 = vand.u32 2147483648, %v589_v13  ;;  %v599_v3 = vand.u32 2147483647, %v589_v13  ;;  %vm595_vm5 = vweird.f32 %v589_v13 }
 0xc9a   :  { %v2837_v59 = vadd.f32 %v2834_v56, %v818_v57 }
 0xc9b   :  { %v602_v12 = vor.u32 1.1754944e-38, %v601_v1  ;;  %vm600_vm9 = vcmp.eq.f32.partialorder %v599_v3, 8.507059e+37 }
 0xc9c   :  { %v844_v60 = vadd.f32 %v841_v58, %v2837_v59 }
 0xc9e   :  { %v2122_v61 = vmul.f32 -1.442695, %v844_v60 }
 0xc9f   :  { %v2214_v62 = vpop.eup %2213 }
 0xca0   :  { %2215 = vpow2.f32 %v2122_v61  ;;  %v591_v63 = vmul.f32 %v2214_v62, %v589_v13  ;;  %vm596_vm15 = vweird.f32 %v2214_v62 }
 0xca1   :  { %2217 = vtanh.f32 %v584_v53  ;;  %vm597_vm11 = vmor %vm595_vm5, %vm596_vm15 }
 0xca2   :  { %v592_v0 = vsub.f32 1.0, %v591_v63 }
 0xca4   :  { %v593_v2 = vmul.f32 %v2214_v62, %v592_v0 }
 0xca6   :  { %v2216_v7 = vpop.eup %2215  ;;  %v594_v9 = vadd.f32 %v2214_v62, %v593_v2 }
 0xca7   :  { %v849_v11 = vadd.f32 1.0, %v2216_v7  ;;  %v2218_v16 = vpop.eup %2217 }
 0xca8   :  { %v598_v15 = vsel %vm597_vm11, %v2214_v62, %v594_v9 }
 0xca9   :  { %2219 = vrcp.f32 %v849_v11  ;;  %v603_v17 = vsel %vm600_vm9, %v602_v12, %v598_v15  ;;  %v861_v20 = vand.u32 2147483648, %v849_v11  ;;  %v859_v22 = vand.u32 2147483647, %v849_v11 }
 0xcaa   :  { %v605_v18 = vsel %vm2706_vm8, %v2218_v16, %v603_v17  ;;  %2221 = vtanh.f32 %v844_v60  ;;  %vm855_vm15 = vweird.f32 %v849_v11 }
 0xcab   :  { %611 = vrot.lane.b32.xlu2 %v605_v18, %s2523_s3  ;;  %v862_v24 = vor.u32 1.1754944e-38, %v861_v20  ;;  %vm860_vm5 = vcmp.eq.f32.partialorder %v859_v22, 8.507059e+37  ;;  %v609_v34 = vmul.f32 %v607_v33, %v605_v18 }
 0xcaf   :  { %v2220_v4 = vpop.eup %2219 }
 0xcb0   :  { %v851_v19 = vmul.f32 %v2220_v4, %v849_v11  ;;  %vm856_vm3 = vweird.f32 %v2220_v4  ;;  %v2222_v25 = vpop.eup %2221 }
 0xcb1   :  { %vm857_vm11 = vmor %vm855_vm15, %vm856_vm3 }
 0xcb2   :  { %v852_v6 = vsub.f32 1.0, %v851_v19 }
 0xcb4   :  { %v853_v21 = vmul.f32 %v2220_v4, %v852_v6 }
 0xcb6   :  { %v854_v23 = vadd.f32 %v2220_v4, %v853_v21 }
 0xcb8   :  { %v858_v10 = vsel %vm857_vm11, %v2220_v4, %v854_v23 }
 0xcb9   :  { %v863_v27 = vsel %vm860_vm5, %v862_v24, %v858_v10 }
 0xcba   :  { %v865_v28 = vsel %vm2706_vm8, %v2222_v25, %v863_v27 }
 0xcbb   :  { %868 = vrot.lane.b32.xlu0 %v865_v28, %s2523_s3  ;;  %v866_v40 = vmul.f32 0.0, %v865_v28 }
 0xd05   :  { %v612_v29 = vpop.permute.xlu2 %611 }
 0xd06   :  { %v614_v30 = vmul.f32 %v612_v29, %v605_v18 }
 0xd08   :  { %616 = vrot.lane.b32.xlu1 %v614_v30, %s2524_s19 }
 0xd2d   :  { %v869_v31 = vpop.permute.xlu0 %868 }
 0xd2e   :  { %v871_v32 = vmul.f32 %v869_v31, %v865_v28 }
 0xd30   :  { %873 = vrot.lane.b32.xlu2 %v871_v32, %s2524_s19 }
 0xd7a   :  { %v617_v36 = vpop.permute.xlu1 %616 }
 0xd7b   :  { %v2849_v37 = vadd.f32 %v617_v36, %v609_v34 }
 0xd7d   :  { %2223 = vtanh.f32 %v2849_v37  ;;  %v682_v34 = vrot.slane %v2849_v37, 6 }
 0xd83   :  { %v2224_v38 = vpop.eup %2223 }
 0xd84   :  { %622 = vrot.lane.b32.xlu0 %v2224_v38, %s2523_s3 }
 0xd8a   :  { %v874_v5 = vpop.permute.xlu2 %873 }
 0xd8b   :  { %v2853_v41 = vadd.f32 %v874_v5, %v866_v40 }
 0xd8d   :  { %2225 = vtanh.f32 %v2853_v41 }
 0xd93   :  { %v2226_v42 = vpop.eup %2225 }
 0xd94   :  { %879 = vrot.lane.b32.xlu1 %v2226_v42, %s2523_s3  ;;  %v936_v42 = vrot.slane %v2853_v41, 6 }
 0xdf6   :  { %v623_v39 = vpop.permute.xlu0 %622 }
 0xdf7   :  { %v2857_v35 = vmul.f32 %v623_v39, %v605_v18 }
 0xdf9   :  { %v631_v46 = vrot.slane %v2857_v35, 2 }
 0xdfb   :  { %632 = vrot.lane.b32.xlu2 %v631_v46, %s2524_s19 }
 0xe06   :  { %v880_v48 = vpop.permute.xlu1 %879 }
 0xe07   :  { %v882_v49 = vmul.f32 %v880_v48, %v865_v28 }
 0xe09   :  { %884 = vrot.lane.b32.xlu0 %v882_v49, %s2524_s19 }
 0xe55   :  { %v633_v50 = vpop.permute.xlu2 %632 }
 0xe56   :  { %2116 = vmatmul.msk.f32.vlgmr.msrb.gmra.mxu0 %vm193_vm13, %v633_v50 }
 0xe57   :  { %1127 = vmatpush.msrb.mxu0 %v2793_v43 }
 0xe59   :  { %1128 = vmatpush.msrb.mxu0 %v2796_v44 }
 0xe5b   :  { %1129 = vmatpush.msrb.mxu0 %v2798_v45 }
 0xe5d   :  { %1130 = vmatpush.msrb.mxu0 %v2808_v47 }
 0xe7b   :  { %v885_v51 = vpop.permute.xlu0 %884 }
 0xe7c   :  { %887 = vst.msk [vmem:[#allocation3] sm:$0x3] %vm260_vm12, %v885_v51  ;;  %2123 = vmatmul.msk.f32.vlgmr.msra.gmra.mxu0 %vm193_vm13, %v885_v51 }
 0xed3   :  { %v653_v52 = vpop.f32.mrf.mxu0 }
 0xed4   :  { %v657_v53 = vrot.slane %v653_v52, 4 }
 0xed6   :  { %v659_v54 = vadd.f32 %v657_v53, %v2773_v14 }
 0xed8   :  { %v2117_v55 = vmul.f32 -1.442695, %v659_v54 }
 0xeda   :  { %2227 = vpow2.f32 %v2117_v55 }
 0xee0   :  { %v2228_v13 = vpop.eup %2227 }
 0xee1   :  { %v664_v57 = vadd.f32 1.0, %v2228_v13 }
 0xee3   :  { %2229 = vrcp.f32 %v664_v57  ;;  %v676_v62 = vand.u32 2147483648, %v664_v57  ;;  %v674_v0 = vand.u32 2147483647, %v664_v57  ;;  %vm670_vm9 = vweird.f32 %v664_v57 }
 0xee4   :  { %2231 = vtanh.f32 %v659_v54 }
 0xee5   :  { %v677_v2 = vor.u32 1.1754944e-38, %v676_v62  ;;  %vm675_vm11 = vcmp.eq.f32.partialorder %v674_v0, 8.507059e+37 }
 0xee9   :  { %v2230_v58 = vpop.eup %2229 }
 0xeea   :  { %v666_v60 = vmul.f32 %v2230_v58, %v664_v57  ;;  %vm671_vm3 = vweird.f32 %v2230_v58  ;;  %v2232_v7 = vpop.eup %2231 }
 0xeeb   :  { %vm672_vm15 = vmor %vm670_vm9, %vm671_vm3 }
 0xeec   :  { %v667_v61 = vsub.f32 1.0, %v666_v60 }
 0xeee   :  { %v668_v63 = vmul.f32 %v2230_v58, %v667_v61 }
 0xef0   :  { %v669_v1 = vadd.f32 %v2230_v58, %v668_v63 }
 0xef2   :  { %v673_v3 = vsel %vm672_vm15, %v2230_v58, %v669_v1 }
 0xef3   :  { %v678_v9 = vsel %vm675_vm11, %v677_v2, %v673_v3 }
 0xef4   :  { %v680_v11 = vsel %vm2706_vm8, %v2232_v7, %v678_v9 }
 0xef5   :  { %686 = vrot.lane.b32.xlu1 %v680_v11, %s2523_s3  ;;  %v684_v36 = vmul.f32 %v682_v34, %v680_v11 }
 0xef9   :  { %v907_v12 = vpop.f32.mrf.mxu0 }
 0xefa   :  { %v911_v15 = vrot.slane %v907_v12, 6 }
 0xefc   :  { %v913_v16 = vadd.f32 %v911_v15, %v2837_v59 }
 0xefe   :  { %v2124_v17 = vmul.f32 -1.442695, %v913_v16 }
 0xf00   :  { %2233 = vpow2.f32 %v2124_v17 }
 0xf06   :  { %v2234_v18 = vpop.eup %2233 }
 0xf07   :  { %v918_v4 = vadd.f32 1.0, %v2234_v18 }
 0xf09   :  { %2235 = vrcp.f32 %v918_v4  ;;  %v930_v21 = vand.u32 2147483648, %v918_v4  ;;  %v928_v23 = vand.u32 2147483647, %v918_v4  ;;  %vm924_vm3 = vweird.f32 %v918_v4 }
 0xf0a   :  { %2237 = vtanh.f32 %v913_v16 }
 0xf0b   :  { %v931_v10 = vor.u32 1.1754944e-38, %v930_v21  ;;  %vm929_vm15 = vcmp.eq.f32.partialorder %v928_v23, 8.507059e+37 }
 0xf0f   :  { %v2236_v19 = vpop.eup %2235 }
 0xf10   :  { %v920_v6 = vmul.f32 %v2236_v19, %v918_v4  ;;  %vm925_vm5 = vweird.f32 %v2236_v19  ;;  %v2238_v27 = vpop.eup %2237 }
 0xf11   :  { %vm926_vm9 = vmor %vm924_vm3, %vm925_vm5 }
 0xf12   :  { %v921_v20 = vsub.f32 1.0, %v920_v6 }
 0xf14   :  { %v922_v22 = vmul.f32 %v2236_v19, %v921_v20 }
 0xf16   :  { %v923_v24 = vadd.f32 %v2236_v19, %v922_v22 }
 0xf18   :  { %v927_v25 = vsel %vm926_vm9, %v2236_v19, %v923_v24 }
 0xf19   :  { %v932_v28 = vsel %vm929_vm15, %v931_v10, %v927_v25 }
 0xf1a   :  { %v934_v29 = vsel %vm2706_vm8, %v2238_v27, %v932_v28 }
 0xf1b   :  { %940 = vrot.lane.b32.xlu2 %v934_v29, %s2523_s3  ;;  %v938_v39 = vmul.f32 %v936_v42, %v934_v29 }
 0xf67   :  { %v687_v30 = vpop.permute.xlu1 %686 }
 0xf68   :  { %v689_v31 = vmul.f32 %v687_v30, %v680_v11 }
 0xf6a   :  { %691 = vrot.lane.b32.xlu0 %v689_v31, %s2524_s19 }
 0xf75   :  { %v941_v32 = vpop.permute.xlu2 %940 }
 0xf76   :  { %v943_v33 = vmul.f32 %v941_v32, %v934_v29 }
 0xf78   :  { %945 = vrot.lane.b32.xlu1 %v943_v33, %s2524_s19 }
 0xfdc   :  { %v692_v38 = vpop.permute.xlu0 %691 }
 0xfdd   :  { %v2880_v40 = vadd.f32 %v692_v38, %v684_v36 }
 0xfdf   :  { %2239 = vtanh.f32 %v2880_v40 }
 0xfe5   :  { %v2240_v5 = vpop.eup %2239 }
 0xfe6   :  { %697 = vrot.lane.b32.xlu2 %v2240_v5, %s2523_s3 }
 0xfea   :  { %v946_v46 = vpop.permute.xlu1 %945 }
 0xfeb   :  { %v2885_v48 = vadd.f32 %v946_v46, %v938_v39 }
 0xfed   :  { %2241 = vtanh.f32 %v2885_v48  ;;  %v1011_v31 = vrot.slane %v2885_v48, 6 }
 0xff3   :  { %v2242_v49 = vpop.eup %2241 }
 0xff4   :  { %951 = vrot.lane.b32.xlu0 %v2242_v49, %s2523_s3 }
0x1040   :  { %v698_v37 = vpop.permute.xlu2 %697 }
0x1041   :  { %v2889_v50 = vmul.f32 %v698_v37, %v680_v11 }
0x1043   :  { %v706_v51 = vrot.slane %v2889_v50, 4 }
0x1045   :  { %707 = vrot.lane.b32.xlu1 %v706_v51, %s2524_s19 }
0x1066   :  { %v952_v52 = vpop.permute.xlu0 %951 }
0x1067   :  { %v2893_v53 = vmul.f32 %v952_v52, %v934_v29 }
0x1069   :  { %v960_v41 = vrot.slane %v2893_v53, 2 }
0x106b   :  { %961 = vrot.lane.b32.xlu2 %v960_v41, %s2524_s19 }
0x10b7   :  { %v708_v54 = vpop.permute.xlu1 %707 }
0x10b8   :  { %2118 = vmatmul.msk.f32.vlgmr.msra.gmra.mxu1 %vm193_vm13, %v708_v54 }
0x10b9   :  { %1196 = vmatpush.msra.mxu1 %v2793_v43 }
0x10bb   :  { %1197 = vmatpush.msra.mxu1 %v2796_v44 }
0x10bd   :  { %1198 = vmatpush.msra.mxu1 %v2798_v45 }
0x10bf   :  { %1199 = vmatpush.msra.mxu1 %v2808_v47 }
0x10c5   :  { %v962_v55 = vpop.permute.xlu2 %961 }
0x10c6   :  { %2125 = vmatmul.msk.f32.vlgmr.msrb.gmra.mxu1 %vm193_vm13, %v962_v55 }
0x1135   :  { %v728_v13 = vpop.f32.mrf.mxu1 }
0x1136   :  { %v732_v15 = vrot.slane %v728_v13, 2 }
0x1138   :  { %v734_v16 = vadd.f32 %v732_v15, %v2773_v14 }
0x113a   :  { %v2119_v17 = vmul.f32 -1.442695, %v734_v16 }
0x1143   :  { %v982_v57 = vpop.f32.mrf.mxu1 }
0x1144   :  { %v986_v58 = vrot.slane %v982_v57, 4 }
0x1146   :  { %v988_v60 = vadd.f32 %v986_v58, %v2837_v59 }
0x1148   :  { %v2126_v61 = vmul.f32 -1.442695, %v988_v60 }
0x114a   :  { %2243 = vpow2.f32 %v2126_v61 }
0x1150   :  { %v2244_v62 = vpop.eup %2243 }
0x1151   :  { %v993_v63 = vadd.f32 1.0, %v2244_v62 }
0x1153   :  { %2245 = vrcp.f32 %v993_v63  ;;  %v1005_v45 = vand.u32 2147483648, %v993_v63  ;;  %v1003_v47 = vand.u32 2147483647, %v993_v63  ;;  %vm999_vm5 = vweird.f32 %v993_v63 }
0x1154   :  { %2247 = vtanh.f32 %v988_v60  ;;  %v757_v60 = vrot.slane %v2880_v40, 6 }
0x1155   :  { %v1006_v3 = vor.u32 1.1754944e-38, %v1005_v45  ;;  %vm1004_vm9 = vcmp.eq.f32.partialorder %v1003_v47, 8.507059e+37  ;;  %2249 = vpow2.f32 %v2119_v17 }
0x1159   :  { %v2246_v43 = vpop.eup %2245 }
0x115a   :  { %v995_v0 = vmul.f32 %v2246_v43, %v993_v63  ;;  %vm1000_vm11 = vweird.f32 %v2246_v43  ;;  %v2248_v9 = vpop.eup %2247 }
0x115b   :  { %vm1001_vm3 = vmor %vm999_vm5, %vm1000_vm11  ;;  %v2250_v18 = vpop.eup %2249 }
0x115c   :  { %v996_v44 = vsub.f32 1.0, %v995_v0  ;;  %v739_v4 = vadd.f32 1.0, %v2250_v18 }
0x115e   :  { %v997_v1 = vmul.f32 %v2246_v43, %v996_v44  ;;  %2251 = vrcp.f32 %v739_v4  ;;  %v751_v10 = vand.u32 2147483648, %v739_v4  ;;  %vm745_vm11 = vweird.f32 %v739_v4 }
0x115f   :  { %v749_v25 = vand.u32 2147483647, %v739_v4  ;;  %2253 = vtanh.f32 %v734_v16 }
0x1160   :  { %v998_v2 = vadd.f32 %v2246_v43, %v997_v1  ;;  %v752_v27 = vor.u32 1.1754944e-38, %v751_v10 }
0x1162   :  { %v1002_v7 = vsel %vm1001_vm3, %v2246_v43, %v998_v2  ;;  %vm750_vm3 = vcmp.eq.f32.partialorder %v749_v25, 8.507059e+37 }
0x1163   :  { %v1007_v11 = vsel %vm1004_vm9, %v1006_v3, %v1002_v7 }
0x1164   :  { %v1009_v12 = vsel %vm2706_vm8, %v2248_v9, %v1007_v11  ;;  %v2252_v19 = vpop.eup %2251 }
0x1165   :  { %1015 = vrot.lane.b32.xlu0 %v1009_v12, %s2523_s3  ;;  %v741_v6 = vmul.f32 %v2252_v19, %v739_v4  ;;  %vm746_vm15 = vweird.f32 %v2252_v19  ;;  %v2254_v29 = vpop.eup %2253  ;;  %v1013_v32 = vmul.f32 %v1011_v31, %v1009_v12 }
0x1166   :  { %vm747_vm5 = vmor %vm745_vm11, %vm746_vm15 }
0x1167   :  { %v742_v20 = vsub.f32 1.0, %v741_v6 }
0x1169   :  { %v743_v21 = vmul.f32 %v2252_v19, %v742_v20 }
0x116b   :  { %v744_v23 = vadd.f32 %v2252_v19, %v743_v21 }
0x116d   :  { %v748_v14 = vsel %vm747_vm5, %v2252_v19, %v744_v23 }
0x116e   :  { %v753_v28 = vsel %vm750_vm3, %v752_v27, %v748_v14 }
0x116f   :  { %v2911_v30 = vsel %vm2706_vm8, %v2254_v29, %v753_v28 }
0x1170   :  { %v759_v43 = vmul.f32 %v757_v60, %v2911_v30  ;;  %v1408_v60 = vld [vmem:[#allocation10 + $0x10] sm:$0xff] }
0x11d7   :  { %v1016_v22 = vpop.permute.xlu0 %1015 }
0x11d8   :  { %v1018_v24 = vmul.f32 %v1016_v22, %v1009_v12 }
0x11da   :  { %1020 = vrot.lane.b32.xlu1 %v1018_v24, %s2524_s19 }
0x11e2   :  { %761 = vrot.lane.b32.xlu1 %v2911_v30, %s2523_s3 }
0x124c   :  { %v1021_v33 = vpop.permute.xlu1 %1020 }
0x124d   :  { %v1023_v34 = vadd.f32 %v1021_v33, %v1013_v32 }
0x124f   :  { %2255 = vtanh.f32 %v1023_v34 }
0x1254   :  { %v762_v39 = vpop.permute.xlu1 %761 }
0x1255   :  { %v2256_v36 = vpop.eup %2255  ;;  %v764_v46 = vmul.f32 %v762_v39, %v2911_v30 }
0x1256   :  { %1026 = vrot.lane.b32.xlu2 %v2256_v36, %s2523_s3 }
0x12b0   :  { %v1027_v38 = vpop.permute.xlu2 %1026 }
0x12b1   :  { %v2917_v5 = vmul.f32 %v1027_v38, %v1009_v12  ;;  %v1086_v12 = vrot.slane %v1023_v34, 6 }
0x12b3   :  { %v1035_v42 = vrot.slane %v2917_v5, 4 }
0x12b5   :  { %1036 = vrot.lane.b32.xlu0 %v1035_v42, %s2524_s19 }
0x12bd   :  { %766 = vrot.lane.b32.xlu0 %v764_v46, %s2524_s19 }
0x1327   :  { %v1037_v48 = vpop.permute.xlu0 %1036 }
0x1328   :  { %2127 = vmatmul.msk.f32.vlgmr.msra.gmra.mxu3 %vm193_vm13, %v1037_v48 }
0x132f   :  { %v767_v63 = vpop.permute.xlu0 %766 }
0x1330   :  { %v769_v44 = vadd.f32 %v767_v63, %v759_v43  ;;  %v1407_v63 = vld [vmem:[#allocation10 + $0x8] sm:$0xff]  ;;  %v1406_v43 = vld [vmem:[#allocation10] sm:$0xff] }
0x13ab   :  { %v1057_v49 = vpop.f32.mrf.mxu3 }
0x13ac   :  { %v1061_v37 = vrot.slane %v1057_v49, 2 }
0x13ae   :  { %v1063_v51 = vadd.f32 %v1061_v37, %v2837_v59 }
0x13b0   :  { %v2128_v52 = vmul.f32 -1.442695, %v1063_v51 }
0x13b2   :  { %2257 = vpow2.f32 %v2128_v52 }
0x13b8   :  { %v2258_v41 = vpop.eup %2257 }
0x13b9   :  { %v1068_v54 = vadd.f32 1.0, %v2258_v41 }
0x13bb   :  { %2259 = vrcp.f32 %v1068_v54  ;;  %v1080_v58 = vand.u32 2147483648, %v1068_v54  ;;  %v1078_v62 = vand.u32 2147483647, %v1068_v54  ;;  %vm1074_vm15 = vweird.f32 %v1068_v54 }
0x13bc   :  { %2261 = vtanh.f32 %v1063_v51 }
0x13bd   :  { %v1081_v59 = vor.u32 1.1754944e-38, %v1080_v58  ;;  %vm1079_vm5 = vcmp.eq.f32.partialorder %v1078_v62, 8.507059e+37  ;;  %2263 = vtanh.f32 %v769_v44  ;;  %v1409_v58 = vld [vmem:[#allocation10 + $0x18] sm:$0xff]  ;;  %v2968_v62 = vld [vmem:[#allocation12 + $0x10] sm:$0xff] }
0x13be   :  { %1436 = vmatpush.msra.mxu0 %v1409_v58 }
0x13c0   :  { %1437 = vmatpush.msra.mxu0 %v1408_v60 }
0x13c1   :  { %v2260_v55 = vpop.eup %2259 }
0x13c2   :  { %v1070_v13 = vmul.f32 %v2260_v55, %v1068_v54  ;;  %vm1075_vm9 = vweird.f32 %v2260_v55  ;;  %v2262_v1 = vpop.eup %2261  ;;  %1438 = vmatpush.msra.mxu0 %v1407_v63 }
0x13c3   :  { %vm1076_vm11 = vmor %vm1074_vm15, %vm1075_vm9  ;;  %v2264_v40 = vpop.eup %2263 }
0x13c4   :  { %v1071_v57 = vsub.f32 1.0, %v1070_v13  ;;  %1439 = vmatpush.msra.mxu0 %v1406_v43 }
0x13c6   :  { %v1072_v61 = vmul.f32 %v2260_v55, %v1071_v57 }
0x13c8   :  { %v1073_v0 = vadd.f32 %v2260_v55, %v1072_v61  ;;  %v2965_v61 = vld [vmem:[#allocation12 + $0x18] sm:$0xff] }
0x13c9   :  { %1459 = vmatpush.msrb.mxu1 %v2965_v61  ;;  %1525 = vmatpush.msrb.mxu2 %v2965_v61 }
0x13ca   :  { %v1077_v45 = vsel %vm1076_vm11, %v2260_v55, %v1073_v0  ;;  %1600 = vmatpush.msra.mxu3 %v2965_v61  ;;  %v2980_v0 = vld [vmem:[#allocation12] sm:$0xff] }
0x13cb   :  { %v1082_v47 = vsel %vm1079_vm5, %v1081_v59, %v1077_v45  ;;  %1460 = vmatpush.msrb.mxu1 %v2968_v62  ;;  %1526 = vmatpush.msrb.mxu2 %v2968_v62 }
0x13cc   :  { %v1084_v2 = vsel %vm2706_vm8, %v2262_v1, %v1082_v47  ;;  %1601 = vmatpush.msra.mxu3 %v2968_v62 }
0x13cd   :  { %1090 = vrot.lane.b32.xlu2 %v1084_v2, %s2523_s3  ;;  %v1088_v15 = vmul.f32 %v1086_v12, %v1084_v2 }
0x13d5   :  { %772 = vrot.lane.b32.xlu2 %v2264_v40, %s2523_s3 }
0x13dd   :  { %702 = vrot.lane.b32.xlu2 %v2889_v50, %s2524_s19 }
0x1427   :  { %v1091_v3 = vpop.permute.xlu2 %1090 }
0x1428   :  { %v1093_v7 = vmul.f32 %v1091_v3, %v1084_v2 }
0x142a   :  { %1095 = vrot.lane.b32.xlu1 %v1093_v7, %s2524_s19 }
0x142f   :  { %v773_v9 = vpop.permute.xlu2 %772 }
0x1430   :  { %v775_v50 = vmul.f32 %v773_v9, %v2911_v30 }
0x1432   :  { %627 = vrot.lane.b32.xlu1 %v2857_v35, %s2524_s19 }
0x1437   :  { %v703_v11 = vpop.permute.xlu2 %702 }
0x1438   :  { %705 = vst.msk [vmem:[#allocation3 + $0x8] sm:$0x30] %vm409_vm4, %v703_v11 }
0x149c   :  { %v1096_v16 = vpop.permute.xlu1 %1095 }
0x149d   :  { %v1098_v17 = vadd.f32 %v1096_v16, %v1088_v15 }
0x149f   :  { %2265 = vtanh.f32 %v1098_v17  ;;  %v1158_v37 = vrot.slane %v1098_v17, 6 }
0x14a4   :  { %v628_v18 = vpop.permute.xlu1 %627 }
0x14a5   :  { %v2266_v4 = vpop.eup %2265  ;;  %630 = vst.msk [vmem:[#allocation3 + $0x8] sm:$0xc] %vm333_vm6, %v628_v18 }
0x14a6   :  { %1101 = vrot.lane.b32.xlu0 %v2266_v4, %s2523_s3 }
0x14ae   :  { %777 = vrot.lane.b32.xlu0 %v775_v50, %s2524_s19 }
0x1518   :  { %v1102_v19 = vpop.permute.xlu0 %1101 }
0x1519   :  { %v1104_v35 = vmul.f32 %v1102_v19, %v1084_v2 }
0x151b   :  { %v1110_v6 = vrot.slane %v1104_v35, 6 }
0x151d   :  { %1111 = vrot.lane.b32.xlu1 %v1110_v6, %s2524_s19 }
0x1520   :  { %v778_v20 = vpop.permute.xlu0 %777 }
0x1521   :  { %780 = vst.msk [vmem:[#allocation3 + $0x8] sm:$0xc0] %vm485_vm14, %v778_v20 }
0x1528   :  { %v782_v21 = vld [vmem:[#allocation3 + $0x8] sm:$0xff] }
0x1529   :  { %2121 = vmatmul.msk.f32.gmra.mxu2 %vm193_vm13, %v782_v21 }
0x158f   :  { %v1112_v22 = vpop.permute.xlu1 %1111 }
0x1590   :  { %2129 = vmatmul.msk.f32.vlgmr.msrb.gmra.mxu0 %vm193_vm13, %v1112_v22 }
0x1591   :  { %1894 = vmatpush.msrb.mxu0 %v2965_v61 }
0x1593   :  { %1895 = vmatpush.msrb.mxu0 %v2968_v62 }
0x15ac   :  { %v821_v23 = vpop.f32.mrf.mxu2 }
0x15ad   :  { %v2946_v24 = vadd.f32 %v2834_v56, %v821_v23 }
0x160d   :  { %v1132_v10 = vpop.f32.mrf.mxu0 }
0x160e   :  { %v1135_v25 = vadd.f32 %v1132_v10, %v2946_v24 }
0x1610   :  { %v2130_v14 = vmul.f32 -1.442695, %v1135_v25 }
0x1612   :  { %2267 = vpow2.f32 %v2130_v14 }
0x1618   :  { %v2268_v27 = vpop.eup %2267 }
0x1619   :  { %v1140_v28 = vadd.f32 1.0, %v2268_v27 }
0x161b   :  { %2269 = vrcp.f32 %v1140_v28  ;;  %v1152_v32 = vand.u32 2147483648, %v1140_v28  ;;  %v1150_v34 = vand.u32 2147483647, %v1140_v28  ;;  %vm1146_vm9 = vweird.f32 %v1140_v28 }
0x161c   :  { %2271 = vtanh.f32 %v1135_v25 }
0x161d   :  { %v1153_v56 = vor.u32 1.1754944e-38, %v1152_v32  ;;  %vm1151_vm11 = vcmp.eq.f32.partialorder %v1150_v34, 8.507059e+37 }
0x1621   :  { %v2270_v29 = vpop.eup %2269 }
0x1622   :  { %v1142_v30 = vmul.f32 %v2270_v29, %v1140_v28  ;;  %vm1147_vm3 = vweird.f32 %v2270_v29  ;;  %v2272_v42 = vpop.eup %2271 }
0x1623   :  { %vm1148_vm15 = vmor %vm1146_vm9, %vm1147_vm3 }
0x1624   :  { %v1143_v31 = vsub.f32 1.0, %v1142_v30 }
0x1626   :  { %v1144_v33 = vmul.f32 %v2270_v29, %v1143_v31 }
0x1628   :  { %v1145_v36 = vadd.f32 %v2270_v29, %v1144_v33 }
0x162a   :  { %v1149_v38 = vsel %vm1148_vm15, %v2270_v29, %v1145_v36 }
0x162b   :  { %v1154_v39 = vsel %vm1151_vm11, %v1153_v56, %v1149_v38 }
0x162c   :  { %v1156_v46 = vsel %vm2706_vm8, %v2272_v42, %v1154_v39 }
0x162d   :  { %1162 = vrot.lane.b32.xlu2 %v1156_v46, %s2523_s3  ;;  %v1160_v51 = vmul.f32 %v1158_v37, %v1156_v46 }
0x1687   :  { %v1163_v48 = vpop.permute.xlu2 %1162 }
0x1688   :  { %v1165_v49 = vmul.f32 %v1163_v48, %v1156_v46 }
0x168a   :  { %1167 = vrot.lane.b32.xlu0 %v1165_v49, %s2524_s19 }
0x1692   :  { %956 = vrot.lane.b32.xlu0 %v2893_v53, %s2524_s19 }
0x16fc   :  { %v1168_v52 = vpop.permute.xlu0 %1167 }
0x16fd   :  { %v2955_v41 = vadd.f32 %v1168_v52, %v1160_v51 }
0x16ff   :  { %2273 = vtanh.f32 %v2955_v41  ;;  %v1230_v37 = vrot.slane %v2955_v41, 6 }
0x1704   :  { %v957_v54 = vpop.permute.xlu0 %956 }
0x1705   :  { %v2274_v55 = vpop.eup %2273  ;;  %959 = vst.msk [vmem:[#allocation3] sm:$0xc] %vm333_vm6, %v957_v54 }
0x1706   :  { %1173 = vrot.lane.b32.xlu1 %v2274_v55, %s2523_s3 }
0x170e   :  { %1031 = vrot.lane.b32.xlu1 %v2917_v5, %s2524_s19  ;;  %v2970_v5 = vld [vmem:[#allocation12 + $0x8] sm:$0xff] }
0x170f   :  { %1461 = vmatpush.msrb.mxu1 %v2970_v5  ;;  %1527 = vmatpush.msrb.mxu2 %v2970_v5 }
0x1710   :  { %1602 = vmatpush.msra.mxu3 %v2970_v5  ;;  %1896 = vmatpush.msrb.mxu0 %v2970_v5 }
0x1711   :  { %1462 = vmatpush.msrb.mxu1 %v2980_v0  ;;  %1528 = vmatpush.msrb.mxu2 %v2980_v0 }
0x1712   :  { %1603 = vmatpush.msra.mxu3 %v2980_v0  ;;  %1897 = vmatpush.msrb.mxu0 %v2980_v0 }
0x1778   :  { %v1174_v13 = vpop.permute.xlu1 %1173 }
0x1779   :  { %v1176_v57 = vmul.f32 %v1174_v13, %v1156_v46 }
0x177b   :  { %1178 = vrot.lane.b32.xlu2 %v1176_v57, %s2524_s19 }
0x1780   :  { %v1032_v53 = vpop.permute.xlu1 %1031 }
0x1781   :  { %1034 = vst.msk [vmem:[#allocation3] sm:$0x30] %vm409_vm4, %v1032_v53 }
0x1783   :  { %1106 = vrot.lane.b32.xlu2 %v1104_v35, %s2524_s19 }
0x17d5   :  { %v1179_v59 = vpop.permute.xlu2 %1178 }
0x17d6   :  { %1181 = vst.msk [vmem:[#allocation3 + $0x8] sm:$0x3] %vm260_vm12, %v1179_v59  ;;  %2131 = vmatmul.msk.f32.vlgmr.msra.gmra.mxu1 %vm193_vm13, %v1179_v59 }
0x17d7   :  { %1675 = vmatpush.msra.mxu1 %v2965_v61 }
0x17d9   :  { %1676 = vmatpush.msra.mxu1 %v2968_v62 }
0x17db   :  { %1677 = vmatpush.msra.mxu1 %v2970_v5 }
0x17dd   :  { %v1107_v44 = vpop.permute.xlu2 %1106  ;;  %1678 = vmatpush.msra.mxu1 %v2980_v0 }
0x17de   :  { %1109 = vst.msk [vmem:[#allocation3] sm:$0xc0] %vm485_vm14, %v1107_v44  ;;  %1463 = vmatmul.f32.vlgmr.msrb.gmra.mxu1 %v2522_v8  ;;  %v3006_v8 = vld [vmem:[%s3221_s9] ss:$0 sm:$0xff] }
0x17df   :  { %1969 = vmatpush.msrb.mxu1 %v2965_v61 }
0x17e1   :  { %1970 = vmatpush.msrb.mxu1 %v2968_v62 }
0x17e3   :  { %1971 = vmatpush.msrb.mxu1 %v2970_v5 }
0x17e5   :  { %v1404_v45 = vld [vmem:[#allocation3] sm:$0xff]  ;;  %1972 = vmatpush.msrb.mxu1 %v2980_v0 }
0x17e6   :  { %2137 = vmatmul.msk.f32.vlgmr.msra.gmra.mxu0 %vm193_vm13, %v1404_v45 }
0x1853   :  { %v1201_v1 = vpop.f32.mrf.mxu1 }
0x1854   :  { %v1205_v47 = vrot.slane %v1201_v1, 6 }
0x1856   :  { %v1207_v2 = vadd.f32 %v1205_v47, %v2946_v24 }
0x1858   :  { %v2132_v40 = vmul.f32 -1.442695, %v1207_v2 }
0x185a   :  { %2275 = vpow2.f32 %v2132_v40 }
0x185b   :  { %v1464_v11 = vpop.f32.mrf.mxu1 }
0x1860   :  { %v2276_v3 = vpop.eup %2275 }
0x1861   :  { %v1212_v7 = vadd.f32 1.0, %v2276_v3 }
0x1863   :  { %2277 = vrcp.f32 %v1212_v7  ;;  %v1441_v9 = vpop.f32.mrf.mxu0  ;;  %v1224_v50 = vand.u32 2147483648, %v1212_v7  ;;  %v1222_v35 = vand.u32 2147483647, %v1212_v7  ;;  %vm1218_vm3 = vweird.f32 %v1212_v7 }
0x1864   :  { %v3009_v12 = vadd.f32 %v3006_v8, %v1441_v9 }
0x1865   :  { %v1225_v22 = vor.u32 1.1754944e-38, %v1224_v50  ;;  %vm1223_vm15 = vcmp.eq.f32.partialorder %v1222_v35, 8.507059e+37 }
0x1866   :  { %v1467_v15 = vadd.f32 %v1464_v11, %v3009_v12 }
0x1868   :  { %v2139_v16 = vmul.f32 -1.442695, %v1467_v15 }
0x1869   :  { %v2278_v17 = vpop.eup %2277 }
0x186a   :  { %2279 = vpow2.f32 %v2139_v16  ;;  %v1214_v18 = vmul.f32 %v2278_v17, %v1212_v7  ;;  %vm1219_vm5 = vweird.f32 %v2278_v17 }
0x186b   :  { %2281 = vtanh.f32 %v1207_v2  ;;  %vm1220_vm9 = vmor %vm1218_vm3, %vm1219_vm5 }
0x186c   :  { %v1215_v4 = vsub.f32 1.0, %v1214_v18 }
0x186e   :  { %v1216_v19 = vmul.f32 %v2278_v17, %v1215_v4 }
0x1870   :  { %v2280_v6 = vpop.eup %2279  ;;  %v1217_v20 = vadd.f32 %v2278_v17, %v1216_v19 }
0x1871   :  { %v1472_v21 = vadd.f32 1.0, %v2280_v6  ;;  %v2282_v10 = vpop.eup %2281 }
0x1872   :  { %v1221_v23 = vsel %vm1220_vm9, %v2278_v17, %v1217_v20 }
0x1873   :  { %2283 = vrcp.f32 %v1472_v21  ;;  %v1226_v25 = vsel %vm1223_vm15, %v1225_v22, %v1221_v23  ;;  %v1484_v30 = vand.u32 2147483648, %v1472_v21  ;;  %v1482_v32 = vand.u32 2147483647, %v1472_v21 }
0x1874   :  { %v1228_v14 = vsel %vm2706_vm8, %v2282_v10, %v1226_v25  ;;  %2285 = vtanh.f32 %v1467_v15  ;;  %vm1478_vm5 = vweird.f32 %v1472_v21 }
0x1875   :  { %1234 = vrot.lane.b32.xlu0 %v1228_v14, %s2523_s3  ;;  %v1485_v34 = vor.u32 1.1754944e-38, %v1484_v30  ;;  %vm1483_vm9 = vcmp.eq.f32.partialorder %v1482_v32, 8.507059e+37  ;;  %v1232_v51 = vmul.f32 %v1230_v37, %v1228_v14 }
0x1879   :  { %v2284_v27 = vpop.eup %2283 }
0x187a   :  { %v1474_v28 = vmul.f32 %v2284_v27, %v1472_v21  ;;  %vm1479_vm11 = vweird.f32 %v2284_v27  ;;  %v2286_v56 = vpop.eup %2285 }
0x187b   :  { %vm1480_vm3 = vmor %vm1478_vm5, %vm1479_vm11 }
0x187c   :  { %v1475_v29 = vsub.f32 1.0, %v1474_v28 }
0x187e   :  { %v1476_v31 = vmul.f32 %v2284_v27, %v1475_v29 }
0x1880   :  { %v1477_v33 = vadd.f32 %v2284_v27, %v1476_v31 }
0x1882   :  { %v1481_v36 = vsel %vm1480_vm3, %v2284_v27, %v1477_v33 }
0x1883   :  { %v1486_v38 = vsel %vm1483_vm9, %v1485_v34, %v1481_v36 }
0x1884   :  { %v1488_v42 = vsel %vm2706_vm8, %v2286_v56, %v1486_v38 }
0x1885   :  { %1491 = vrot.lane.b32.xlu1 %v1488_v42, %s2523_s3  ;;  %v1489_v13 = vmul.f32 0.0, %v1488_v42 }
0x18e7   :  { %v1235_v39 = vpop.permute.xlu0 %1234 }
0x18e8   :  { %v1237_v46 = vmul.f32 %v1235_v39, %v1228_v14 }
0x18ea   :  { %1239 = vrot.lane.b32.xlu2 %v1237_v46, %s2524_s19 }
0x18f7   :  { %v1492_v48 = vpop.permute.xlu1 %1491 }
0x18f8   :  { %v1494_v49 = vmul.f32 %v1492_v48, %v1488_v42 }
0x18fa   :  { %1496 = vrot.lane.b32.xlu0 %v1494_v49, %s2524_s19 }
0x1944   :  { %v1240_v52 = vpop.permute.xlu2 %1239 }
0x1945   :  { %v3021_v54 = vadd.f32 %v1240_v52, %v1232_v51 }
0x1947   :  { %2287 = vtanh.f32 %v3021_v54  ;;  %v1305_v37 = vrot.slane %v3021_v54, 6 }
0x194d   :  { %v2288_v55 = vpop.eup %2287 }
0x194e   :  { %1245 = vrot.lane.b32.xlu1 %v2288_v55, %s2523_s3 }
0x196c   :  { %v1497_v57 = vpop.permute.xlu0 %1496 }
0x196d   :  { %v3025_v53 = vadd.f32 %v1497_v57, %v1489_v13 }
0x196f   :  { %2289 = vtanh.f32 %v3025_v53  ;;  %v1559_v57 = vrot.slane %v3025_v53, 6 }
0x1975   :  { %v2290_v58 = vpop.eup %2289 }
0x1976   :  { %1502 = vrot.lane.b32.xlu2 %v2290_v58, %s2523_s3 }
0x19c0   :  { %v1246_v60 = vpop.permute.xlu1 %1245 }
0x19c1   :  { %v3029_v41 = vmul.f32 %v1246_v60, %v1228_v14 }
0x19c3   :  { %v1254_v63 = vrot.slane %v3029_v41, 2 }
0x19c5   :  { %1255 = vrot.lane.b32.xlu0 %v1254_v63, %s2524_s19 }
0x19d0   :  { %v1503_v43 = vpop.permute.xlu2 %1502 }
0x19d1   :  { %v1505_v59 = vmul.f32 %v1503_v43, %v1488_v42 }
0x19d3   :  { %1507 = vrot.lane.b32.xlu1 %v1505_v59, %s2524_s19 }
0x1a37   :  { %v1256_v44 = vpop.permute.xlu0 %1255 }
0x1a38   :  { %2133 = vmatmul.msk.f32.vlgmr.msra.gmra.mxu2 %vm193_vm13, %v1256_v44 }
0x1a39   :  { %1750 = vmatpush.msra.mxu2 %v2965_v61 }
0x1a3b   :  { %1751 = vmatpush.msra.mxu2 %v2968_v62 }
0x1a3d   :  { %1752 = vmatpush.msra.mxu2 %v2970_v5 }
0x1a3f   :  { %1753 = vmatpush.msra.mxu2 %v2980_v0 }
0x1a45   :  { %v1508_v45 = vpop.permute.xlu1 %1507 }
0x1a46   :  { %1510 = vst.msk [vmem:[#allocation3] sm:$0x3] %vm260_vm12, %v1508_v45  ;;  %2140 = vmatmul.msk.f32.vlgmr.msrb.gmra.mxu2 %vm193_vm13, %v1508_v45 }
0x1abb   :  { %v1276_v1 = vpop.f32.mrf.mxu2 }
0x1abc   :  { %v1280_v47 = vrot.slane %v1276_v1, 4 }
0x1abe   :  { %v1282_v2 = vadd.f32 %v1280_v47, %v2946_v24 }
0x1ac0   :  { %v2134_v40 = vmul.f32 -1.442695, %v1282_v2 }
0x1ac2   :  { %2291 = vpow2.f32 %v2134_v40 }
0x1ac8   :  { %v2292_v3 = vpop.eup %2291 }
0x1ac9   :  { %v1287_v7 = vadd.f32 1.0, %v2292_v3  ;;  %v1530_v9 = vpop.f32.mrf.mxu2 }
0x1aca   :  { %v1534_v11 = vrot.slane %v1530_v9, 6 }
0x1acb   :  { %2293 = vrcp.f32 %v1287_v7  ;;  %v1299_v50 = vand.u32 2147483648, %v1287_v7  ;;  %v1297_v6 = vand.u32 2147483647, %v1287_v7  ;;  %vm1293_vm11 = vweird.f32 %v1287_v7 }
0x1acc   :  { %v1536_v15 = vadd.f32 %v1534_v11, %v3009_v12 }
0x1acd   :  { %v1300_v22 = vor.u32 1.1754944e-38, %v1299_v50  ;;  %vm1298_vm3 = vcmp.eq.f32.partialorder %v1297_v6, 8.507059e+37 }
0x1ace   :  { %v2141_v16 = vmul.f32 -1.442695, %v1536_v15 }
0x1ad0   :  { %2295 = vpow2.f32 %v2141_v16 }
0x1ad1   :  { %v2294_v17 = vpop.eup %2293  ;;  %2297 = vtanh.f32 %v1282_v2 }
0x1ad2   :  { %v1289_v18 = vmul.f32 %v2294_v17, %v1287_v7  ;;  %vm1294_vm15 = vweird.f32 %v2294_v17 }
0x1ad3   :  { %vm1295_vm5 = vmor %vm1293_vm11, %vm1294_vm15 }
0x1ad4   :  { %v1290_v4 = vsub.f32 1.0, %v1289_v18 }
0x1ad6   :  { %v2296_v19 = vpop.eup %2295  ;;  %v1291_v35 = vmul.f32 %v2294_v17, %v1290_v4 }
0x1ad7   :  { %v1541_v20 = vadd.f32 1.0, %v2296_v19  ;;  %v2298_v10 = vpop.eup %2297 }
0x1ad8   :  { %v1292_v21 = vadd.f32 %v2294_v17, %v1291_v35 }
0x1ad9   :  { %2299 = vrcp.f32 %v1541_v20  ;;  %v1553_v30 = vand.u32 2147483648, %v1541_v20  ;;  %v1551_v32 = vand.u32 2147483647, %v1541_v20  ;;  %vm1547_vm15 = vweird.f32 %v1541_v20 }
0x1ada   :  { %v1296_v23 = vsel %vm1295_vm5, %v2294_v17, %v1292_v21  ;;  %2301 = vtanh.f32 %v1536_v15 }
0x1adb   :  { %v1301_v25 = vsel %vm1298_vm3, %v1300_v22, %v1296_v23  ;;  %v1554_v34 = vor.u32 1.1754944e-38, %v1553_v30  ;;  %vm1552_vm5 = vcmp.eq.f32.partialorder %v1551_v32, 8.507059e+37 }
0x1adc   :  { %v1303_v14 = vsel %vm2706_vm8, %v2298_v10, %v1301_v25 }
0x1add   :  { %1309 = vrot.lane.b32.xlu2 %v1303_v14, %s2523_s3  ;;  %v1307_v51 = vmul.f32 %v1305_v37, %v1303_v14 }
0x1adf   :  { %v2300_v27 = vpop.eup %2299 }
0x1ae0   :  { %v1543_v28 = vmul.f32 %v2300_v27, %v1541_v20  ;;  %vm1548_vm9 = vweird.f32 %v2300_v27  ;;  %v2302_v56 = vpop.eup %2301 }
0x1ae1   :  { %vm1549_vm11 = vmor %vm1547_vm15, %vm1548_vm9 }
0x1ae2   :  { %v1544_v29 = vsub.f32 1.0, %v1543_v28 }
0x1ae4   :  { %v1545_v31 = vmul.f32 %v2300_v27, %v1544_v29 }
0x1ae6   :  { %v1546_v33 = vadd.f32 %v2300_v27, %v1545_v31 }
0x1ae8   :  { %v1550_v36 = vsel %vm1549_vm11, %v2300_v27, %v1546_v33 }
0x1ae9   :  { %v1555_v38 = vsel %vm1552_vm5, %v1554_v34, %v1550_v36 }
0x1aea   :  { %v1557_v42 = vsel %vm2706_vm8, %v2302_v56, %v1555_v38 }
0x1aeb   :  { %1563 = vrot.lane.b32.xlu0 %v1557_v42, %s2523_s3  ;;  %v1561_v58 = vmul.f32 %v1559_v57, %v1557_v42 }
0x1b37   :  { %v1310_v39 = vpop.permute.xlu2 %1309 }
0x1b38   :  { %v1312_v46 = vmul.f32 %v1310_v39, %v1303_v14 }
0x1b3a   :  { %1314 = vrot.lane.b32.xlu1 %v1312_v46, %s2524_s19 }
0x1b5d   :  { %v1564_v48 = vpop.permute.xlu0 %1563 }
0x1b5e   :  { %v1566_v49 = vmul.f32 %v1564_v48, %v1557_v42 }
0x1b60   :  { %1568 = vrot.lane.b32.xlu2 %v1566_v49, %s2524_s19 }
0x1bac   :  { %v1315_v52 = vpop.permute.xlu1 %1314 }
0x1bad   :  { %v3052_v55 = vadd.f32 %v1315_v52, %v1307_v51 }
0x1baf   :  { %2303 = vtanh.f32 %v3052_v55 }
0x1bb5   :  { %v2304_v13 = vpop.eup %2303 }
0x1bb6   :  { %1320 = vrot.lane.b32.xlu0 %v2304_v13, %s2523_s3 }
0x1bba   :  { %v1569_v60 = vpop.permute.xlu2 %1568 }
0x1bbb   :  { %v3057_v63 = vadd.f32 %v1569_v60, %v1561_v58 }
0x1bbd   :  { %2305 = vtanh.f32 %v3057_v63  ;;  %v1634_v39 = vrot.slane %v3057_v63, 6 }
0x1bc3   :  { %v2306_v43 = vpop.eup %2305 }
0x1bc4   :  { %1574 = vrot.lane.b32.xlu1 %v2306_v43, %s2523_s3 }
0x1c28   :  { %v1321_v54 = vpop.permute.xlu0 %1320 }
0x1c29   :  { %v3061_v59 = vmul.f32 %v1321_v54, %v1303_v14 }
0x1c2b   :  { %v1329_v44 = vrot.slane %v3061_v59, 4 }
0x1c2d   :  { %1330 = vrot.lane.b32.xlu2 %v1329_v44, %s2524_s19 }
0x1c36   :  { %v1575_v45 = vpop.permute.xlu1 %1574 }
0x1c37   :  { %v3065_v1 = vmul.f32 %v1575_v45, %v1557_v42 }
0x1c39   :  { %v1583_v53 = vrot.slane %v3065_v1, 2 }
0x1c3b   :  { %1584 = vrot.lane.b32.xlu0 %v1583_v53, %s2524_s19 }
0x1c87   :  { %v1331_v47 = vpop.permute.xlu2 %1330 }
0x1c88   :  { %2135 = vmatmul.msk.f32.vlgmr.msrb.gmra.mxu3 %vm193_vm13, %v1331_v47 }
0x1c89   :  { %1819 = vmatpush.msrb.mxu3 %v2965_v61 }
0x1c8b   :  { %1820 = vmatpush.msrb.mxu3 %v2968_v62 }
0x1c8d   :  { %1821 = vmatpush.msrb.mxu3 %v2970_v5 }
0x1c8f   :  { %1822 = vmatpush.msrb.mxu3 %v2980_v0 }
0x1cad   :  { %v1585_v2 = vpop.permute.xlu0 %1584 }
0x1cae   :  { %2142 = vmatmul.msk.f32.vlgmr.msra.gmra.mxu3 %vm193_vm13, %v1585_v2 }
0x1d0b   :  { %v1351_v40 = vpop.f32.mrf.mxu3 }
0x1d0c   :  { %v1355_v21 = vrot.slane %v1351_v40, 2 }
0x1d0e   :  { %v1357_v22 = vadd.f32 %v1355_v21, %v2946_v24 }
0x1d10   :  { %v2136_v23 = vmul.f32 -1.442695, %v1357_v22 }
0x1d31   :  { %v1605_v3 = vpop.f32.mrf.mxu3 }
0x1d32   :  { %v1609_v7 = vrot.slane %v1605_v3, 4 }
0x1d34   :  { %v1611_v9 = vadd.f32 %v1609_v7, %v3009_v12  ;;  %v1380_v7 = vrot.slane %v3052_v55, 6 }
0x1d36   :  { %v2143_v11 = vmul.f32 -1.442695, %v1611_v9 }
0x1d38   :  { %2307 = vpow2.f32 %v2143_v11 }
0x1d3e   :  { %v2308_v15 = vpop.eup %2307 }
0x1d3f   :  { %v1616_v16 = vadd.f32 1.0, %v2308_v15 }
0x1d41   :  { %2309 = vrcp.f32 %v1616_v16  ;;  %v1628_v5 = vand.u32 2147483648, %v1616_v16  ;;  %v1626_v0 = vand.u32 2147483647, %v1616_v16  ;;  %vm1622_vm9 = vweird.f32 %v1616_v16 }
0x1d42   :  { %2311 = vtanh.f32 %v1611_v9 }
0x1d43   :  { %v1629_v50 = vor.u32 1.1754944e-38, %v1628_v5  ;;  %vm1627_vm11 = vcmp.eq.f32.partialorder %v1626_v0, 8.507059e+37  ;;  %2313 = vpow2.f32 %v2136_v23 }
0x1d47   :  { %v2310_v61 = vpop.eup %2309 }
0x1d48   :  { %v1618_v17 = vmul.f32 %v2310_v61, %v1616_v16  ;;  %vm1623_vm3 = vweird.f32 %v2310_v61  ;;  %v2312_v35 = vpop.eup %2311 }
0x1d49   :  { %vm1624_vm15 = vmor %vm1622_vm9, %vm1623_vm3  ;;  %v2314_v10 = vpop.eup %2313 }
0x1d4a   :  { %v1619_v62 = vsub.f32 1.0, %v1618_v17  ;;  %v1362_v25 = vadd.f32 1.0, %v2314_v10 }
0x1d4c   :  { %v1620_v18 = vmul.f32 %v2310_v61, %v1619_v62  ;;  %2315 = vrcp.f32 %v1362_v25  ;;  %v1374_v33 = vand.u32 2147483648, %v1362_v25  ;;  %vm1368_vm3 = vweird.f32 %v1362_v25 }
0x1d4d   :  { %v1372_v34 = vand.u32 2147483647, %v1362_v25  ;;  %2317 = vtanh.f32 %v1357_v22 }
0x1d4e   :  { %v1621_v4 = vadd.f32 %v2310_v61, %v1620_v18  ;;  %v1375_v36 = vor.u32 1.1754944e-38, %v1374_v33 }
0x1d50   :  { %v1625_v19 = vsel %vm1624_vm15, %v2310_v61, %v1621_v4  ;;  %vm1373_vm15 = vcmp.eq.f32.partialorder %v1372_v34, 8.507059e+37 }
0x1d51   :  { %v1630_v6 = vsel %vm1627_vm11, %v1629_v50, %v1625_v19 }
0x1d52   :  { %v1632_v20 = vsel %vm2706_vm8, %v2312_v35, %v1630_v6  ;;  %v2316_v14 = vpop.eup %2315 }
0x1d53   :  { %1638 = vrot.lane.b32.xlu1 %v1632_v20, %s2523_s3  ;;  %v1364_v27 = vmul.f32 %v2316_v14, %v1362_v25  ;;  %vm1369_vm5 = vweird.f32 %v2316_v14  ;;  %v2318_v38 = vpop.eup %2317  ;;  %v1636_v46 = vmul.f32 %v1634_v39, %v1632_v20 }
0x1d54   :  { %vm1370_vm9 = vmor %vm1368_vm3, %vm1369_vm5 }
0x1d55   :  { %v1365_v28 = vsub.f32 1.0, %v1364_v27 }
0x1d57   :  { %v1366_v29 = vmul.f32 %v2316_v14, %v1365_v28 }
0x1d59   :  { %v1367_v31 = vadd.f32 %v2316_v14, %v1366_v29 }
0x1d5b   :  { %v1371_v24 = vsel %vm1370_vm9, %v2316_v14, %v1367_v31 }
0x1d5c   :  { %v1376_v56 = vsel %vm1373_vm15, %v1375_v36, %v1371_v24 }
0x1d5d   :  { %v3083_v42 = vsel %vm2706_vm8, %v2318_v38, %v1376_v56 }
0x1d5e   :  { %v1382_v16 = vmul.f32 %v1380_v7, %v3083_v42 }
0x1dc5   :  { %v1639_v30 = vpop.permute.xlu1 %1638 }
0x1dc6   :  { %v1641_v32 = vmul.f32 %v1639_v30, %v1632_v20 }
0x1dc8   :  { %1643 = vrot.lane.b32.xlu2 %v1641_v32, %s2524_s19 }
0x1dd0   :  { %1384 = vrot.lane.b32.xlu2 %v3083_v42, %s2523_s3 }
0x1e22   :  { %v1644_v48 = vpop.permute.xlu2 %1643 }
0x1e23   :  { %v1646_v49 = vadd.f32 %v1644_v48, %v1636_v46 }
0x1e25   :  { %2319 = vtanh.f32 %v1646_v49  ;;  %v1709_v6 = vrot.slane %v1646_v49, 6 }
0x1e2a   :  { %v1385_v57 = vpop.permute.xlu2 %1384 }
0x1e2b   :  { %v2320_v37 = vpop.eup %2319  ;;  %v1387_v58 = vmul.f32 %v1385_v57, %v3083_v42 }
0x1e2c   :  { %1649 = vrot.lane.b32.xlu0 %v2320_v37, %s2523_s3 }
0x1e9e   :  { %v1650_v51 = vpop.permute.xlu0 %1649 }
0x1e9f   :  { %v3089_v52 = vmul.f32 %v1650_v51, %v1632_v20 }
0x1ea1   :  { %v1658_v13 = vrot.slane %v3089_v52, 4 }
0x1ea3   :  { %1659 = vrot.lane.b32.xlu1 %v1658_v13, %s2524_s19 }
0x1eab   :  { %1389 = vrot.lane.b32.xlu1 %v1387_v58, %s2524_s19 }
0x1f15   :  { %v1660_v60 = vpop.permute.xlu1 %1659 }
0x1f16   :  { %2144 = vmatmul.msk.f32.vlgmr.msra.gmra.mxu1 %vm193_vm13, %v1660_v60 }
0x1f1d   :  { %v1390_v15 = vpop.permute.xlu1 %1389 }
0x1f1e   :  { %v1392_v17 = vadd.f32 %v1390_v15, %v1382_v16 }
0x1f93   :  { %v1680_v63 = vpop.f32.mrf.mxu1 }
0x1f94   :  { %v1684_v43 = vrot.slane %v1680_v63, 2 }
0x1f96   :  { %v1686_v54 = vadd.f32 %v1684_v43, %v3009_v12 }
0x1f98   :  { %v2145_v44 = vmul.f32 -1.442695, %v1686_v54 }
0x1f9a   :  { %2321 = vpow2.f32 %v2145_v44 }
0x1fa0   :  { %v2322_v45 = vpop.eup %2321 }
0x1fa1   :  { %v1691_v53 = vadd.f32 1.0, %v2322_v45 }
0x1fa3   :  { %2323 = vrcp.f32 %v1691_v53  ;;  %v1703_v3 = vand.u32 2147483648, %v1691_v53  ;;  %v1701_v11 = vand.u32 2147483647, %v1691_v53  ;;  %vm1697_vm5 = vweird.f32 %v1691_v53 }
0x1fa4   :  { %2325 = vtanh.f32 %v1686_v54 }
0x1fa5   :  { %v1704_v12 = vor.u32 1.1754944e-38, %v1703_v3  ;;  %vm1702_vm9 = vcmp.eq.f32.partialorder %v1701_v11, 8.507059e+37  ;;  %2327 = vtanh.f32 %v1392_v17 }
0x1fa9   :  { %v2324_v47 = vpop.eup %2323 }
0x1faa   :  { %v1693_v2 = vmul.f32 %v2324_v47, %v1691_v53  ;;  %vm1698_vm11 = vweird.f32 %v2324_v47  ;;  %v2326_v5 = vpop.eup %2325 }
0x1fab   :  { %vm1699_vm3 = vmor %vm1697_vm5, %vm1698_vm11  ;;  %v2328_v55 = vpop.eup %2327 }
0x1fac   :  { %v1694_v40 = vsub.f32 1.0, %v1693_v2 }
0x1fae   :  { %v1695_v9 = vmul.f32 %v2324_v47, %v1694_v40 }
0x1fb0   :  { %v1696_v61 = vadd.f32 %v2324_v47, %v1695_v9 }
0x1fb2   :  { %v1700_v62 = vsel %vm1699_vm3, %v2324_v47, %v1696_v61 }
0x1fb3   :  { %v1705_v18 = vsel %vm1702_vm9, %v1704_v12, %v1700_v62 }
0x1fb4   :  { %v1707_v0 = vsel %vm2706_vm8, %v2326_v5, %v1705_v18 }
0x1fb5   :  { %1713 = vrot.lane.b32.xlu0 %v1707_v0, %s2523_s3  ;;  %v1711_v20 = vmul.f32 %v1709_v6, %v1707_v0 }
0x1fbd   :  { %1395 = vrot.lane.b32.xlu0 %v2328_v55, %s2523_s3 }
0x1fc5   :  { %1325 = vrot.lane.b32.xlu0 %v3061_v59, %s2524_s19 }
0x2027   :  { %v1714_v4 = vpop.permute.xlu0 %1713 }
0x2028   :  { %v1716_v50 = vmul.f32 %v1714_v4, %v1707_v0 }
0x202a   :  { %1718 = vrot.lane.b32.xlu2 %v1716_v50, %s2524_s19 }
0x202f   :  { %v1396_v19 = vpop.permute.xlu0 %1395 }
0x2030   :  { %v1398_v59 = vmul.f32 %v1396_v19, %v3083_v42 }
0x2032   :  { %1250 = vrot.lane.b32.xlu2 %v3029_v41, %s2524_s19 }
0x2037   :  { %v1326_v35 = vpop.permute.xlu0 %1325 }
0x2038   :  { %1328 = vst.msk [vmem:[#allocation3 + $0x8] sm:$0x30] %vm409_vm4, %v1326_v35 }
0x2084   :  { %v1719_v21 = vpop.permute.xlu2 %1718 }
0x2085   :  { %v1721_v22 = vadd.f32 %v1719_v21, %v1711_v20 }
0x2087   :  { %2329 = vtanh.f32 %v1721_v22  ;;  %v1781_v63 = vrot.slane %v1721_v22, 6 }
0x208c   :  { %v1251_v23 = vpop.permute.xlu2 %1250 }
0x208d   :  { %v2330_v10 = vpop.eup %2329  ;;  %1253 = vst.msk [vmem:[#allocation3 + $0x8] sm:$0xc] %vm333_vm6, %v1251_v23 }
0x208e   :  { %1724 = vrot.lane.b32.xlu1 %v2330_v10, %s2523_s3 }
0x2096   :  { %1400 = vrot.lane.b32.xlu1 %v1398_v59, %s2524_s19 }
0x2100   :  { %v1725_v25 = vpop.permute.xlu1 %1724 }
0x2101   :  { %v3113_v41 = vmul.f32 %v1725_v25, %v1707_v0 }
0x2103   :  { %v1733_v14 = vrot.slane %v3113_v41, 6 }
0x2105   :  { %1734 = vrot.lane.b32.xlu2 %v1733_v14, %s2524_s19 }
0x2108   :  { %v1401_v27 = vpop.permute.xlu1 %1400 }
0x2109   :  { %1403 = vst.msk [vmem:[#allocation3 + $0x8] sm:$0xc0] %vm485_vm14, %v1401_v27 }
0x2110   :  { %v1405_v28 = vld [vmem:[#allocation3 + $0x8] sm:$0xff] }
0x2111   :  { %2138 = vmatmul.msk.f32.gmra.mxu0 %vm193_vm13, %v1405_v28 }
0x215f   :  { %v1735_v29 = vpop.permute.xlu2 %1734 }
0x2160   :  { %2146 = vmatmul.msk.f32.vlgmr.msra.gmra.mxu2 %vm193_vm13, %v1735_v29 }
0x218e   :  { %v1444_v30 = vpop.f32.mrf.mxu0 }
0x218f   :  { %v3121_v31 = vadd.f32 %v3006_v8, %v1444_v30 }
0x21e3   :  { %v1755_v32 = vpop.f32.mrf.mxu2 }
0x21e4   :  { %v1758_v33 = vadd.f32 %v1755_v32, %v3121_v31 }
0x21e6   :  { %v2147_v34 = vmul.f32 -1.442695, %v1758_v33 }
0x21e8   :  { %2331 = vpow2.f32 %v2147_v34 }
0x21ee   :  { %v2332_v24 = vpop.eup %2331 }
0x21ef   :  { %v1763_v36 = vadd.f32 1.0, %v2332_v24 }
0x21f1   :  { %2333 = vrcp.f32 %v1763_v36  ;;  %v1775_v39 = vand.u32 2147483648, %v1763_v36  ;;  %v1773_v48 = vand.u32 2147483647, %v1763_v36  ;;  %vm1769_vm11 = vweird.f32 %v1763_v36 }
0x21f2   :  { %2335 = vtanh.f32 %v1758_v33 }
0x21f3   :  { %v1776_v8 = vor.u32 1.1754944e-38, %v1775_v39  ;;  %vm1774_vm3 = vcmp.eq.f32.partialorder %v1773_v48, 8.507059e+37 }
0x21f7   :  { %v2334_v56 = vpop.eup %2333 }
0x21f8   :  { %v1765_v38 = vmul.f32 %v2334_v56, %v1763_v36  ;;  %vm1770_vm15 = vweird.f32 %v2334_v56  ;;  %v2336_v51 = vpop.eup %2335 }
0x21f9   :  { %vm1771_vm5 = vmor %vm1769_vm11, %vm1770_vm15 }
0x21fa   :  { %v1766_v42 = vsub.f32 1.0, %v1765_v38 }
0x21fc   :  { %v1767_v46 = vmul.f32 %v2334_v56, %v1766_v42 }
0x21fe   :  { %v1768_v49 = vadd.f32 %v2334_v56, %v1767_v46 }
0x2200   :  { %v1772_v37 = vsel %vm1771_vm5, %v2334_v56, %v1768_v49 }
0x2201   :  { %v1777_v13 = vsel %vm1774_vm3, %v1776_v8, %v1772_v37 }
0x2202   :  { %v1779_v57 = vsel %vm2706_vm8, %v2336_v51, %v1777_v13 }
0x2203   :  { %1785 = vrot.lane.b32.xlu0 %v1779_v57, %s2523_s3  ;;  %v1783_v43 = vmul.f32 %v1781_v63, %v1779_v57 }
0x2275   :  { %v1786_v58 = vpop.permute.xlu0 %1785 }
0x2276   :  { %v1788_v60 = vmul.f32 %v1786_v58, %v1779_v57 }
0x2278   :  { %1790 = vrot.lane.b32.xlu1 %v1788_v60, %s2524_s19 }
0x22ea   :  { %v1791_v54 = vpop.permute.xlu1 %1790 }
0x22eb   :  { %v1793_v44 = vadd.f32 %v1791_v54, %v1783_v43 }
0x22ed   :  { %2337 = vtanh.f32 %v1793_v44  ;;  %v1853_v20 = vrot.slane %v1793_v44, 6 }
0x22f3   :  { %v2338_v45 = vpop.eup %2337 }
0x22f4   :  { %1796 = vrot.lane.b32.xlu2 %v2338_v45, %s2523_s3 }
0x234e   :  { %v1797_v53 = vpop.permute.xlu2 %1796 }
0x234f   :  { %v1799_v47 = vmul.f32 %v1797_v53, %v1779_v57 }
0x2351   :  { %1801 = vrot.lane.b32.xlu0 %v1799_v47, %s2524_s19 }
0x23c3   :  { %v1802_v2 = vpop.permute.xlu0 %1801 }
0x23c4   :  { %1804 = vst.msk [vmem:[#allocation3 + $0x8] sm:$0x3] %vm260_vm12, %v1802_v2  ;;  %2148 = vmatmul.msk.f32.vlgmr.msrb.gmra.mxu3 %vm193_vm13, %v1802_v2 }
0x2447   :  { %v1824_v40 = vpop.f32.mrf.mxu3 }
0x2448   :  { %v1828_v3 = vrot.slane %v1824_v40, 6 }
0x244a   :  { %v1830_v7 = vadd.f32 %v1828_v3, %v3121_v31 }
0x244c   :  { %v2149_v9 = vmul.f32 -1.442695, %v1830_v7 }
0x244e   :  { %2339 = vpow2.f32 %v2149_v9 }
0x2454   :  { %v2340_v11 = vpop.eup %2339 }
0x2455   :  { %v1835_v15 = vadd.f32 1.0, %v2340_v11 }
0x2457   :  { %2341 = vrcp.f32 %v1835_v15  ;;  %v1847_v17 = vand.u32 2147483648, %v1835_v15  ;;  %v1845_v5 = vand.u32 2147483647, %v1835_v15  ;;  %vm1841_vm12 = vweird.f32 %v1835_v15 }
0x2458   :  { %2343 = vtanh.f32 %v1830_v7 }
0x2459   :  { %v1848_v0 = vor.u32 1.1754944e-38, %v1847_v17  ;;  %vm1846_vm11 = vcmp.eq.f32.partialorder %v1845_v5, 8.507059e+37 }
0x245d   :  { %v2342_v16 = vpop.eup %2341 }
0x245e   :  { %v1837_v61 = vmul.f32 %v2342_v16, %v1835_v15  ;;  %vm1842_vm9 = vweird.f32 %v2342_v16  ;;  %v2344_v4 = vpop.eup %2343 }
0x245f   :  { %vm1843_vm15 = vmor %vm1841_vm12, %vm1842_vm9 }
0x2460   :  { %v1838_v12 = vsub.f32 1.0, %v1837_v61 }
0x2462   :  { %v1839_v62 = vmul.f32 %v2342_v16, %v1838_v12 }
0x2464   :  { %v1840_v18 = vadd.f32 %v2342_v16, %v1839_v62 }
0x2466   :  { %v1844_v55 = vsel %vm1843_vm15, %v2342_v16, %v1840_v18 }
0x2467   :  { %v1849_v50 = vsel %vm1846_vm11, %v1848_v0, %v1844_v55 }
0x2468   :  { %v1851_v19 = vsel %vm2706_vm8, %v2344_v4, %v1849_v50 }
0x2469   :  { %1857 = vrot.lane.b32.xlu1 %v1851_v19, %s2523_s3  ;;  %v1855_v21 = vmul.f32 %v1853_v20, %v1851_v19 }
0x24db   :  { %v1858_v35 = vpop.permute.xlu1 %1857 }
0x24dc   :  { %v1860_v6 = vmul.f32 %v1858_v35, %v1851_v19 }
0x24de   :  { %1862 = vrot.lane.b32.xlu2 %v1860_v6, %s2524_s19 }
0x2538   :  { %v1863_v22 = vpop.permute.xlu2 %1862 }
0x2539   :  { %v1865_v23 = vadd.f32 %v1863_v22, %v1855_v21 }
0x253b   :  { %2345 = vtanh.f32 %v1865_v23  ;;  %v1928_v58 = vrot.slane %v1865_v23, 6 }
0x2541   :  { %v2346_v10 = vpop.eup %2345 }
0x2542   :  { %1868 = vrot.lane.b32.xlu0 %v2346_v10, %s2523_s3 }
0x25b4   :  { %v1869_v59 = vpop.permute.xlu0 %1868 }
0x25b5   :  { %v3138_v25 = vmul.f32 %v1869_v59, %v1851_v19  ;;  %v2031_v59 = vld [vmem:[%s3222_s10 + $0x10] sm:$0xff] }
0x25b7   :  { %v1877_v14 = vrot.slane %v3138_v25, 2 }
0x25b9   :  { %1878 = vrot.lane.b32.xlu1 %v1877_v14, %s2524_s19  ;;  %v2029_v14 = vld [vmem:[%s3222_s10] sm:$0xff] }
0x262b   :  { %v1879_v27 = vpop.permute.xlu1 %1878 }
0x262c   :  { %2150 = vmatmul.msk.f32.vlgmr.msrb.gmra.mxu0 %vm193_vm13, %v1879_v27 }
0x26a9   :  { %v1899_v28 = vpop.f32.mrf.mxu0 }
0x26aa   :  { %v1903_v29 = vrot.slane %v1899_v28, 4 }
0x26ac   :  { %v1905_v30 = vadd.f32 %v1903_v29, %v3121_v31 }
0x26ae   :  { %v2151_v32 = vmul.f32 -1.442695, %v1905_v30 }
0x26b0   :  { %2347 = vpow2.f32 %v2151_v32 }
0x26b6   :  { %v2348_v33 = vpop.eup %2347 }
0x26b7   :  { %v1910_v34 = vadd.f32 1.0, %v2348_v33  ;;  %v2170_v33 = vld [vmem:[%s3223_s11] ss:$0 sm:$0xff]  ;;  %s2525_s11 = smov [#allocation13]  }
0x26b8   :  { %s2086_s28 = sshll.u32 %s2525_s11, 4  ;;  %s2087_s28 = int_to_ptr.vmem [resolvable:$true] %s2086_s28 }
0x26b9   :  { %2349 = vrcp.f32 %v1910_v34  ;;  %v1922_v38 = vand.u32 2147483648, %v1910_v34  ;;  %v1920_v39 = vand.u32 2147483647, %v1910_v34  ;;  %vm1916_vm3 = vweird.f32 %v1910_v34 }
0x26ba   :  { %2351 = vtanh.f32 %v1905_v30 }
0x26bb   :  { %v1923_v48 = vor.u32 1.1754944e-38, %v1922_v38  ;;  %vm1921_vm12 = vcmp.eq.f32.partialorder %v1920_v39, 8.507059e+37 }
0x26bf   :  { %v2350_v24 = vpop.eup %2349 }
0x26c0   :  { %v1912_v36 = vmul.f32 %v2350_v24, %v1910_v34  ;;  %vm1917_vm5 = vweird.f32 %v2350_v24  ;;  %v2352_v8 = vpop.eup %2351 }
0x26c1   :  { %vm1918_vm9 = vmor %vm1916_vm3, %vm1917_vm5 }
0x26c2   :  { %v1913_v56 = vsub.f32 1.0, %v1912_v36 }
0x26c4   :  { %v1914_v42 = vmul.f32 %v2350_v24, %v1913_v56 }
0x26c6   :  { %v1915_v46 = vadd.f32 %v2350_v24, %v1914_v42 }
0x26c8   :  { %v1919_v49 = vsel %vm1918_vm9, %v2350_v24, %v1915_v46 }
0x26c9   :  { %v1924_v37 = vsel %vm1921_vm12, %v1923_v48, %v1919_v49 }
0x26ca   :  { %v1926_v51 = vsel %vm2706_vm8, %v2352_v8, %v1924_v37 }
0x26cb   :  { %1932 = vrot.lane.b32.xlu2 %v1926_v51, %s2523_s3  ;;  %v1930_v60 = vmul.f32 %v1928_v58, %v1926_v51 }
0x2725   :  { %v1933_v13 = vpop.permute.xlu2 %1932 }
0x2726   :  { %v1935_v57 = vmul.f32 %v1933_v13, %v1926_v51 }
0x2728   :  { %1937 = vrot.lane.b32.xlu0 %v1935_v57, %s2524_s19 }
0x279a   :  { %v1938_v63 = vpop.permute.xlu0 %1937 }
0x279b   :  { %v1940_v43 = vadd.f32 %v1938_v63, %v1930_v60 }
0x279d   :  { %2353 = vtanh.f32 %v1940_v43  ;;  %v2003_v6 = vrot.slane %v1940_v43, 6 }
0x27a3   :  { %v2354_v54 = vpop.eup %2353 }
0x27a4   :  { %1943 = vrot.lane.b32.xlu1 %v2354_v54, %s2523_s3 }
0x2816   :  { %v1944_v44 = vpop.permute.xlu1 %1943 }
0x2817   :  { %v1946_v45 = vmul.f32 %v1944_v44, %v1926_v51 }
0x2819   :  { %v1952_v53 = vrot.slane %v1946_v45, 4 }
0x281b   :  { %1953 = vrot.lane.b32.xlu2 %v1952_v53, %s2524_s19 }
0x2875   :  { %v1954_v47 = vpop.permute.xlu2 %1953 }
0x2876   :  { %2152 = vmatmul.msk.f32.vlgmr.msrb.gmra.mxu1 %vm193_vm13, %v1954_v47 }
0x28f3   :  { %v1974_v2 = vpop.f32.mrf.mxu1 }
0x28f4   :  { %v1978_v40 = vrot.slane %v1974_v2, 2 }
0x28f6   :  { %v1980_v3 = vadd.f32 %v1978_v40, %v3121_v31 }
0x28f8   :  { %v2153_v7 = vmul.f32 -1.442695, %v1980_v3 }
0x28fa   :  { %2355 = vpow2.f32 %v2153_v7 }
0x2900   :  { %v2356_v9 = vpop.eup %2355 }
0x2901   :  { %v1985_v11 = vadd.f32 1.0, %v2356_v9 }
0x2903   :  { %2357 = vrcp.f32 %v1985_v11  ;;  %v1997_v12 = vand.u32 2147483648, %v1985_v11  ;;  %v1995_v62 = vand.u32 2147483647, %v1985_v11  ;;  %vm1991_vm11 = vweird.f32 %v1985_v11 }
0x2904   :  { %2359 = vtanh.f32 %v1980_v3 }
0x2905   :  { %v1998_v18 = vor.u32 1.1754944e-38, %v1997_v12  ;;  %vm1996_vm3 = vcmp.eq.f32.partialorder %v1995_v62, 8.507059e+37 }
0x2909   :  { %v2358_v15 = vpop.eup %2357 }
0x290a   :  { %v1987_v16 = vmul.f32 %v2358_v15, %v1985_v11  ;;  %vm1992_vm15 = vweird.f32 %v2358_v15  ;;  %v2360_v31 = vpop.eup %2359 }
0x290b   :  { %vm1993_vm5 = vmor %vm1991_vm11, %vm1992_vm15 }
0x290c   :  { %v1988_v61 = vsub.f32 1.0, %v1987_v16 }
0x290e   :  { %v1989_v17 = vmul.f32 %v2358_v15, %v1988_v61 }
0x2910   :  { %v1990_v5 = vadd.f32 %v2358_v15, %v1989_v17 }
0x2912   :  { %v1994_v0 = vsel %vm1993_vm5, %v2358_v15, %v1990_v5 }
0x2913   :  { %v1999_v55 = vsel %vm1996_vm3, %v1998_v18, %v1994_v0 }
0x2914   :  { %v2001_v4 = vsel %vm2706_vm8, %v2360_v31, %v1999_v55  ;;  %vm3230_vm8 = vcmask 125955  }
0x2915   :  { %2007 = vrot.lane.b32.xlu0 %v2001_v4, %s2523_s3 }
0x291d   :  { %1579 = vrot.lane.b32.xlu0 %v3065_v1, %s2524_s19  ;;  %v2005_v1 = vmul.f32 %v2003_v6, %v2001_v4 }
0x2925   :  { %1873 = vrot.lane.b32.xlu0 %v3138_v25, %s2524_s19  ;;  %v2030_v25 = vld [vmem:[%s3222_s10 + $0x8] sm:$0xff] }
0x2987   :  { %v2008_v50 = vpop.permute.xlu0 %2007 }
0x2988   :  { %v2010_v19 = vmul.f32 %v2008_v50, %v2001_v4 }
0x298a   :  { %2012 = vrot.lane.b32.xlu1 %v2010_v19, %s2524_s19 }
0x298f   :  { %v1580_v35 = vpop.permute.xlu0 %1579 }
0x2990   :  { %1582 = vst.msk [vmem:[#allocation3] sm:$0xc] %vm333_vm6, %v1580_v35 }
0x2992   :  { %1654 = vrot.lane.b32.xlu1 %v3089_v52, %s2524_s19  ;;  %v2032_v52 = vld [vmem:[%s3222_s10 + $0x18] sm:$0xff] }
0x2993   :  { %2055 = vmatpush.msrb.mxu2 %v2032_v52 }
0x2995   :  { %2056 = vmatpush.msrb.mxu2 %v2031_v59 }
0x2997   :  { %v1874_v26 = vpop.permute.xlu0 %1873  ;;  %2057 = vmatpush.msrb.mxu2 %v2030_v25 }
0x2998   :  { %1876 = vst.msk [vmem:[#allocation3 + $0x8] sm:$0xc] %vm333_vm6, %v1874_v26  ;;  %vm3231_vm6 = vcmask 128005  }
0x2999   :  { %2058 = vmatpush.msrb.mxu2 %v2029_v14 }
0x299a   :  { %1948 = vrot.lane.b32.xlu1 %v1946_v45, %s2524_s19 }
0x29fc   :  { %v2013_v20 = vpop.permute.xlu1 %2012 }
0x29fd   :  { %v2015_v21 = vadd.f32 %v2013_v20, %v2005_v1 }
0x29ff   :  { %2361 = vtanh.f32 %v2015_v21 }
0x2a04   :  { %v1655_v22 = vpop.permute.xlu1 %1654 }
0x2a05   :  { %v2362_v23 = vpop.eup %2361  ;;  %1657 = vst.msk [vmem:[#allocation3] sm:$0x30] %vm409_vm4, %v1655_v22 }
0x2a06   :  { %2018 = vrot.lane.b32.xlu2 %v2362_v23, %s2523_s3 }
0x2a0c   :  { %v1949_v10 = vpop.permute.xlu1 %1948 }
0x2a0d   :  { %1951 = vst.msk [vmem:[#allocation3 + $0x8] sm:$0x30] %vm409_vm4, %v1949_v10  ;;  %vm3233_vm4 = vmmov %vm3230_vm8 }
0x2a0e   :  { %1729 = vrot.lane.b32.xlu2 %v3113_v41, %s2524_s19 }
0x2a60   :  { %v2019_v41 = vpop.permute.xlu2 %2018 }
0x2a61   :  { %v2021_v27 = vmul.f32 %v2019_v41, %v2001_v4 }
0x2a63   :  { %2023 = vrot.lane.b32.xlu2 %v2021_v27, %s2524_s19 }
0x2a68   :  { %v1730_v28 = vpop.permute.xlu2 %1729 }
0x2a69   :  { %1732 = vst.msk [vmem:[#allocation3] sm:$0xc0] %vm485_vm14, %v1730_v28 }
0x2a70   :  { %v2027_v29 = vld [vmem:[#allocation3] sm:$0xff] }
0x2a71   :  { %2154 = vmatmul.msk.f32.vlgmr.msrb.gmra.mxu2 %vm193_vm13, %v2027_v29 }
0x2abd   :  { %v2024_v30 = vpop.permute.xlu2 %2023 }
0x2abe   :  { %2026 = vst.msk [vmem:[#allocation3 + $0x8] sm:$0xc0] %vm485_vm14, %v2024_v30  ;;  %vm3234_vm14 = vmmov %vm3231_vm6 }
0x2ac5   :  { %v2028_v32 = vld [vmem:[#allocation3 + $0x8] sm:$0xff] }
0x2ac6   :  { %2155 = vmatmul.msk.f32.gmra.mxu2 %vm193_vm13, %v2028_v32  ;;  %vm3232_vm13 = vcmask 130055  }
0x2af4   :  { %v2060_v34 = vpop.f32.mrf.mxu2 }
0x2af5   :  { %v2061_v24 = vadd.f32 %v2170_v33, %v2060_v34 }
0x2af7   :  { %2066 = vst.msk [vmem:[#allocation13] sm:$0x1] %vm122_vm0, %v2061_v24 }
0x2af8   :  { %2067 = vst.msk [vmem:[#allocation13 - $0x1] sm:$0x4] %vm128_vm2, %v2061_v24 }
0x2af9   :  { %2068 = vst.msk [vmem:[#allocation13 - $0x2] sm:$0x10] %vm134_vm7, %v2061_v24 }
0x2afa   :  { %2069 = vst.msk [vmem:[#allocation13 - $0x3] sm:$0x40] %vm140_vm10, %v2061_v24 }
0x2afb   :  { %2074 = vst.msk [vmem:[#allocation13 + $0x7] sm:$0x2] %vm125_vm1, %v2061_v24 }
0x2afc   :  { %2075 = vst.msk [vmem:[#allocation13 + $0x6] sm:$0x8] %vm3230_vm8, %v2061_v24 }
0x2afd   :  { %2076 = vst.msk [vmem:[#allocation13 + $0x5] sm:$0x20] %vm3231_vm6, %v2061_v24 }
0x2afe   :  { %2077 = vst.msk [vmem:[#allocation13 + $0x4] sm:$0x80] %vm3232_vm13, %v2061_v24 }
0x2b49   :  { %v2063_v36 = vpop.f32.mrf.mxu2 }
0x2b4a   :  { %v2064_v56 = vadd.f32 %v2170_v33, %v2063_v36 }
0x2b4c   :  { %2070 = vst.msk [vmem:[#allocation13 + $0x4] sm:$0x1] %vm122_vm0, %v2064_v56  ;;  %vm3235_vm0 = vmmov %vm3232_vm13 }
0x2b4d   :  { %2071 = vst.msk [vmem:[#allocation13 + $0x3] sm:$0x4] %vm128_vm2, %v2064_v56 }
0x2b4e   :  { %2072 = vst.msk [vmem:[#allocation13 + $0x2] sm:$0x10] %vm134_vm7, %v2064_v56 }
0x2b4f   :  { %2073 = vst.msk [vmem:[#allocation13 + $0x1] sm:$0x40] %vm140_vm10, %v2064_v56 }
0x2b50   :  { %2078 = vst.msk [vmem:[#allocation13 + $0xb] sm:$0x2] %vm125_vm1, %v2064_v56 }
0x2b51   :  { %2079 = vst.msk [vmem:[#allocation13 + $0xa] sm:$0x8] %vm3233_vm4, %v2064_v56 }
0x2b52   :  { %2080 = vst.msk [vmem:[#allocation13 + $0x9] sm:$0x20] %vm3234_vm14, %v2064_v56 }
0x2b53   :  { %2081 = vst.msk [vmem:[#allocation13 + $0x8] sm:$0x80] %vm3235_vm0, %v2064_v56 }
0x2b54   :  { %2094 = dma.vmem_to_hbm [thread:$0]  %s2087_s28, 256, %s2089_s15, [#allocation6], %s2516_s29, %s2516_s29, %s2517_s30  }
0x2b55   :  { %2513 = dma.done.wait [#allocation6], 256  }
0x2b56   :  { %2514 = vsyncadd [#allocation6], 4294967040 }
0x2b57   :  { %2099 = vsyncpa [#allocation5], 1 }
0x2b58   :  { %2100 = vsyncpa [#allocation8], 1 }
0x2b59   :  { %2101 = vsyncpa [#allocation11], 1 }
0x2b5a   :  { %2102 = vsyncpa [#allocation6], 1 }

</bundles_post_ra>
